<compile_context>
chip_gen: v6e
topology: v6e:2x2x1
jax: 0.10.0
libtpu: 0.0.40
codegen_flags: <defaults>
</compile_context>

<pallas_src>
import functools
import math

import jax
import jax.numpy as jnp
from jax import lax
from jax.experimental import pallas as pl
from jax.experimental.pallas import tpu as pltpu


_ROW_TILES = (256, 128, 64, 32, 16, 8)   # capped at 256 rows (v7x 64 MiB VMEM)
_COL_TILES = (512, 256, 128)


def _pick_tile(n, candidates):
    for t in candidates:
        if n % t == 0:
            return t
    return n  # full dimension is always a legal block size


# ----------------------------- linear kernels --------------------------------

def _linear_kernel(x_ref, w_ref, b_ref, o_ref):
    acc = jnp.dot(x_ref[...], w_ref[...], preferred_element_type=jnp.float32)
    o_ref[...] = (acc + b_ref[...]).astype(o_ref.dtype)


def linear_pallas(x, w, b=None, out_dtype=jnp.bfloat16):
    """(M, K) @ (K, N) + (N,), tiled over rows and output columns (bf16 MXU)."""
    M, K = x.shape
    N = w.shape[1]
    if b is None:
        b = jnp.zeros((N,), jnp.float32)
    tm = _pick_tile(M, _ROW_TILES)
    tn = _pick_tile(N, _COL_TILES)
    return pl.pallas_call(
        _linear_kernel,
        out_shape=jax.ShapeDtypeStruct((M, N), out_dtype),
        grid=(M // tm, N // tn),
        in_specs=[pl.BlockSpec((tm, K), lambda i, j: (i, 0)),
                  pl.BlockSpec((K, tn), lambda i, j: (0, j)),
                  pl.BlockSpec((1, tn), lambda i, j: (0, j))],
        out_specs=pl.BlockSpec((tm, tn), lambda i, j: (i, j)),
        compiler_params=pltpu.CompilerParams(
            dimension_semantics=("parallel", "parallel")),
    )(x, w, b.reshape(1, N).astype(jnp.float32))


def _ln_linear_kernel(x_ref, g_ref, beta_ref, w_ref, b_ref, o_ref):
    x = x_ref[...].astype(jnp.float32)
    mu = jnp.mean(x, axis=-1, keepdims=True)
    xc = x - mu
    var = jnp.mean(xc * xc, axis=-1, keepdims=True)
    xn = xc * lax.rsqrt(var + 1e-5) * g_ref[...] + beta_ref[...]
    acc = jnp.dot(xn.astype(w_ref.dtype), w_ref[...],
                  preferred_element_type=jnp.float32)
    o_ref[...] = (acc + b_ref[...]).astype(o_ref.dtype)


def ln_linear_pallas(x, g, beta, w, b, out_dtype=jnp.bfloat16):
    """Fused LayerNorm(x) @ W + b (LN math in f32, matmul operands bf16)."""
    M, K = x.shape
    N = w.shape[1]
    tm = _pick_tile(M, _ROW_TILES)
    tn = _pick_tile(N, _COL_TILES)
    return pl.pallas_call(
        _ln_linear_kernel,
        out_shape=jax.ShapeDtypeStruct((M, N), out_dtype),
        grid=(M // tm, N // tn),
        in_specs=[pl.BlockSpec((tm, K), lambda i, j: (i, 0)),
                  pl.BlockSpec((1, K), lambda i, j: (0, 0)),
                  pl.BlockSpec((1, K), lambda i, j: (0, 0)),
                  pl.BlockSpec((K, tn), lambda i, j: (0, j)),
                  pl.BlockSpec((1, tn), lambda i, j: (0, j))],
        out_specs=pl.BlockSpec((tm, tn), lambda i, j: (i, j)),
        compiler_params=pltpu.CompilerParams(
            dimension_semantics=("parallel", "parallel")),
    )(x, g.reshape(1, K).astype(jnp.float32),
      beta.reshape(1, K).astype(jnp.float32),
      w, b.reshape(1, N).astype(jnp.float32))


# --------------------------- LSH attention kernel ----------------------------

def _look_back(cur, prev, axis):
    """Reproduce look_one_back: concat(cur, shift-by-one-chunk(cur)) along `axis`.

    cur:  (G, ...)  chunks of the current group.
    prev: (1, ...)  the chunk just before this group (wrap-around fetch).
    """
    if cur.shape[0] == 1:
        shifted = prev
    else:
        shifted = jnp.concatenate([prev, cur[:-1]], axis=0)
    return jnp.concatenate([cur, shifted], axis=axis)


def _lsh_attn_kernel(qk_c_ref, qk_p_ref, v_c_ref, v_p_ref,
                     t_c_ref, t_p_ref, bkt_c_ref, bkt_p_ref,
                     locs_c_ref, locs_p_ref,
                     o_ref, lse_ref, *, scale, n_hashes, causal):
    f32 = jnp.float32
    qk_c = qk_c_ref[0]                      # (G, C, d)   bf16
    qk_p = qk_p_ref[0]                      # (1, C, d)
    v_c = v_c_ref[0]
    v_p = v_p_ref[0]

    # keys / values with look-one-back (previous chunk appended on kv axis)
    k_all = _look_back(qk_c, qk_p, axis=1).astype(f32)         # (G, 2C, d)
    k_norm = jnp.sqrt(jnp.sum(k_all * k_all, axis=-1, keepdims=True))
    k_unit = (k_all / (k_norm + 1e-6)).astype(qk_c.dtype)      # make_unit_length
    v_all = _look_back(v_c, v_p, axis=1)                       # (G, 2C, d) bf16

    # scores: bf16 MXU inputs, f32 accumulation
    dots = jnp.einsum('gqd,gkd->gqk', qk_c, k_unit,
                      preferred_element_type=f32) * scale      # (G, C, 2C)

    # ---- masks / penalties built on the VPU from int32 metadata ----
    t_c = t_c_ref[0][:, 0, :]               # (G, C)  original sequence positions
    t_p = t_p_ref[0][:, 0, :]               # (1, C)
    t_kv = _look_back(t_c, t_p, axis=1)     # (G, 2C)
    bkt_c = bkt_c_ref[0][:, 0, :]
    bkt_p = bkt_p_ref[0][:, 0, :]
    bkt_kv = _look_back(bkt_c, bkt_p, axis=1)

    tq = t_c[:, :, None]
    tk = t_kv[:, None, :]
    bias = (tq == tk).astype(f32) * (-1e5)                               # self
    bias += (bkt_c[:, :, None] != bkt_kv[:, None, :]).astype(f32) * (-1e7)  # bucket
    if causal:
        bias += (tq < tk).astype(f32) * (-1e9)

    # duplicate-attention penalty: -log(dup_counts)
    locs_c = locs_c_ref[0]                  # (G, 2H, C)
    locs_p = locs_p_ref[0]                  # (1, 2H, C)
    locs_kv = _look_back(locs_c, locs_p, axis=2)    # (G, 2H, 2C)
    dup = jnp.zeros(dots.shape, f32)
    for h in range(2 * n_hashes):
        lq = locs_c[:, h % n_hashes, :]     # (G, C)
        lk = locs_kv[:, h, :]               # (G, 2C)
        dup += (lq[:, :, None] == lk[:, None, :]).astype(f32)
    bias -= jnp.log(dup + 1e-9)

    dots = dots + bias

    # softmax / LSE in f32; value mix back on the MXU
    m = jnp.max(dots, axis=-1, keepdims=True)
    e = jnp.exp(dots - m)
    s = jnp.sum(e, axis=-1, keepdims=True)
    probs = e * pl.reciprocal(s, approx=True)
    o = jnp.einsum('gqk,gkd->gqd', probs.astype(v_all.dtype), v_all,
                   preferred_element_type=f32)
    o_ref[0] = o.astype(o_ref.dtype)
    lse = m[..., 0] + jnp.log(s[..., 0])    # (G, C) == logsumexp(dots, -1)
    lse_ref[0] = lse[:, None, :]


def _pick_group(n_chunks):
    for g in (32, 16, 8, 4, 2):
        if g <= n_chunks and n_chunks % g == 0:
            return g
    return n_chunks


def lsh_chunk_attention_pallas(bqk, bv, bq_t, bq_buckets, b_locs, n_hashes, causal):
    """Bucketed LSH attention core.

    bqk, bv:    (B, n_chunks, C, d)   bf16   sorted shared-QK / V chunks
    bq_t:       (B, n_chunks, 1, C)   int32  original positions
    bq_buckets: (B, n_chunks, 1, C)   int32
    b_locs:     (B, n_chunks, 2H, C)  int32  duplicate-attention locations
    """
    B, n_chunks, C, d = bqk.shape
    G = _pick_group(n_chunks)
    n_groups = n_chunks // G
    two_h = 2 * n_hashes

    cur = lambda b, g: (b, g, 0, 0)                                     # noqa: E731
    prev = lambda b, g: (b, (g * G + n_chunks - 1) % n_chunks, 0, 0)    # noqa: E731

    kern = functools.partial(_lsh_attn_kernel, scale=d ** (-0.5),
                             n_hashes=n_hashes, causal=causal)
    o, lse = pl.pallas_call(
        kern,
        out_shape=(jax.ShapeDtypeStruct((B, n_chunks, C, d), bqk.dtype),
                   jax.ShapeDtypeStruct((B, n_chunks, 1, C), jnp.float32)),
        grid=(B, n_groups),
        in_specs=[pl.BlockSpec((1, G, C, d), cur),        # qk (current chunks)
                  pl.BlockSpec((1, 1, C, d), prev),       # qk (previous chunk)
                  pl.BlockSpec((1, G, C, d), cur),        # v
                  pl.BlockSpec((1, 1, C, d), prev),
                  pl.BlockSpec((1, G, 1, C), cur),        # positions
                  pl.BlockSpec((1, 1, 1, C), prev),
                  pl.BlockSpec((1, G, 1, C), cur),        # buckets
                  pl.BlockSpec((1, 1, 1, C), prev),
                  pl.BlockSpec((1, G, two_h, C), cur),    # dup-attn locs
                  pl.BlockSpec((1, 1, two_h, C), prev)],
        out_specs=(pl.BlockSpec((1, G, C, d), cur),
                   pl.BlockSpec((1, G, 1, C), cur)),
        compiler_params=pltpu.CompilerParams(
            dimension_semantics=("parallel", "parallel")),
    )(bqk, bqk, bv, bv, bq_t, bq_t, bq_buckets, bq_buckets, b_locs, b_locs)
    return o, lse


# ------------------------------- LSH attention --------------------------------

def lsh_attention(qk, v, rot_key, bucket_size, n_hashes, causal=False):
    B, seqlen, dim = qk.shape
    n_buckets = seqlen // bucket_size
    assert n_buckets % 2 == 0
    n_bins = n_buckets
    n_chunks = n_hashes * n_bins
    chunk = seqlen // n_bins          # == bucket_size

    # --- hash_vectors (rehash_each_round=True branch) ---
    rot_half = n_buckets // 2
    rotations = jax.random.normal(rot_key, (dim, n_hashes, rot_half), jnp.float32)
    rv = linear_pallas(qk.reshape(B * seqlen, dim),
                       rotations.reshape(dim, n_hashes * rot_half).astype(jnp.bfloat16),
                       out_dtype=jnp.float32)
    rv = rv.reshape(B, seqlen, n_hashes, rot_half).transpose(0, 2, 1, 3)
    rv = jnp.concatenate([rv, -rv], axis=-1)
    buckets = jnp.argmax(rv, axis=-1).astype(jnp.int32)            # (B, h, t)
    offsets = (jnp.arange(n_hashes, dtype=jnp.int32) * n_buckets).reshape(1, -1, 1)
    buckets = (buckets + offsets).reshape(B, n_hashes * seqlen)

    # --- sort by (bucket, position); data-dependent glue stays in XLA ---
    ticker = jnp.arange(n_hashes * seqlen, dtype=jnp.int32)[None, :]
    buckets_and_t = seqlen * buckets + (ticker % seqlen)
    sticker = jnp.argsort(buckets_and_t, axis=-1).astype(jnp.int32)
    sbuckets_and_t = jnp.take_along_axis(buckets_and_t, sticker, axis=-1)
    undo_sort = jnp.argsort(sticker, axis=-1).astype(jnp.int32)
    st = sticker % seqlen

    sqk = jnp.take_along_axis(qk, st[:, :, None], axis=1)
    sv = jnp.take_along_axis(v, st[:, :, None], axis=1)

    bqk = sqk.reshape(B, n_chunks, chunk, dim)
    bv = sv.reshape(B, n_chunks, chunk, dim)
    bq_t = st.reshape(B, n_chunks, 1, chunk)
    bq_buckets = (sbuckets_and_t // seqlen).astype(jnp.int32).reshape(B, n_chunks, 1, chunk)

    # duplicate-attention bookkeeping (small int32; penalties applied in-kernel)
    locs1 = undo_sort // chunk
    locs2 = (locs1 + 1) % n_chunks
    locs1 = buckets * n_chunks + locs1
    locs2 = buckets * n_chunks + locs2
    locs = jnp.concatenate([locs1.reshape(B, n_hashes, seqlen),
                            locs2.reshape(B, n_hashes, seqlen)], axis=1).transpose(0, 2, 1)
    slocs = jnp.take_along_axis(locs, st[:, :, None], axis=1)
    b_locs = slocs.reshape(B, n_chunks, chunk, 2 * n_hashes).transpose(0, 1, 3, 2)

    # --- hot path: grouped bucketed attention (look-one-back + masks in-kernel) ---
    bo, lse = lsh_chunk_attention_pallas(bqk, bv, bq_t, bq_buckets, b_locs,
                                         n_hashes, causal)

    so = bo.reshape(B, n_hashes * seqlen, dim)
    slogits = lse.reshape(B, n_hashes * seqlen)
    o = jnp.take_along_axis(so, undo_sort[:, :, None], axis=1)
    logits = jnp.take_along_axis(slogits, undo_sort, axis=-1)
    if n_hashes == 1:
        return o
    o = o.reshape(B, n_hashes, seqlen, dim).astype(jnp.float32)
    logits = logits.reshape(B, n_hashes, seqlen, 1)
    m = jnp.max(logits, axis=1, keepdims=True)
    lse_h = m + jnp.log(jnp.sum(jnp.exp(logits - m), axis=1, keepdims=True))
    probs = jnp.exp(logits - lse_h)
    return jnp.sum(o * probs, axis=1).astype(qk.dtype)


# ------------------------------ module wrappers -------------------------------

def lsh_self_attention(x, p, heads, bucket_size, n_hashes, causal=False):
    b, t, e = x.shape
    x2 = x.reshape(b * t, e)
    # fused LayerNorm + [QK | V] projection: one HBM read of x, one matmul
    qkv = ln_linear_pallas(x2, p['ln_g'], p['ln_b'], p['w_qkv'], p['b_qkv'])
    qk, v = jnp.split(qkv, 2, axis=-1)
    # TODO(synk): head-merge relayouts left to XLA (could be folded into BlockSpecs).
    qk = qk.reshape(b, t, heads, e).transpose(0, 2, 1, 3).reshape(b * heads, t, e)
    v = v.reshape(b, t, heads, e).transpose(0, 2, 1, 3).reshape(b * heads, t, e)
    attn = lsh_attention(qk, v, p['rot_key'], bucket_size, n_hashes, causal)
    out = attn.reshape(b, heads, t, e).transpose(0, 2, 1, 3).reshape(b * t, heads * e)
    return linear_pallas(out, p['w_u'], p['b_u']).reshape(b, t, e)


def block_f(x, p, heads, bucket_size, n_hashes, causal):
    # WithLayerNorm(attn): LayerNorm is fused into the QKV projection kernel.
    return lsh_self_attention(x, p, heads, bucket_size, n_hashes, causal)


def block_g(x, p):
    # WithLayerNorm(FeedForward); Chunk(ff_chunks) along seq is a mathematical
    # no-op for row-wise LN/Linear/GELU -- the kernels already tile over rows.
    b, t, e = x.shape
    x2 = x.reshape(b * t, e)
    h = ln_linear_pallas(x2, p['ln_g'], p['ln_b'], p['w_in'], p['b_in'])
    # exact (erf) GELU to match torch F.gelu default; cheap elementwise glue
    h = jax.nn.gelu(h.astype(jnp.float32), approximate=False).astype(jnp.bfloat16)
    return linear_pallas(h, p['w_out'], p['b_out']).reshape(b, t, e)


def reformer_forward(params, tokens, *, heads, bucket_size, n_hashes, ff_chunks,
                     causal=False):
    del ff_chunks  # row-tiled kernels already bound the working set
    b, t = tokens.shape
    emb = params['token_emb'].shape[1]
    x = (params['token_emb'][tokens] + params['pos_emb'][:t][None, :, :]).astype(jnp.bfloat16)
    x = jnp.concatenate([x, x], axis=-1)
    # ReversibleBlock semantics (revtorch): y1 = x1 + f(x2); y2 = x2 + g(y1)
    for lp in params['layers']:
        x1, x2 = jnp.split(x, 2, axis=-1)
        y1 = x1 + block_f(x2, lp['attn'], heads, bucket_size, n_hashes, causal)
        y2 = x2 + block_g(y1, lp['ff'])
        x = jnp.concatenate([y1, y2], axis=-1)
    x1, x2 = jnp.split(x, 2, axis=-1)
    x = x1 + x2
    logits = linear_pallas(x.reshape(b * t, emb), params['w_logits'],
                           params['b_logits'], out_dtype=jnp.float32)
    return logits.reshape(b, t, -1)


# ------------------------------ parameter init --------------------------------

def _init_linear(key, fan_in, fan_out):
    kw, kb = jax.random.split(key)
    bound = 1.0 / math.sqrt(fan_in)
    w = jax.random.uniform(kw, (fan_in, fan_out), jnp.float32, -bound, bound)
    b = jax.random.uniform(kb, (fan_out,), jnp.float32, -bound, bound)
    return w, b


def init_reformer_params(key, *, emb, depth, max_seq_len, num_tokens, heads):
    bf16 = jnp.bfloat16
    keys = jax.random.split(key, 3 + depth)
    params = {
        'token_emb': (0.02 * jax.random.normal(keys[0], (num_tokens, emb), jnp.float32)).astype(bf16),
        'pos_emb': (0.02 * jax.random.normal(keys[1], (max_seq_len, emb), jnp.float32)).astype(bf16),
    }
    w_log, b_log = _init_linear(keys[2], emb, num_tokens)
    params['w_logits'] = w_log.astype(bf16)
    params['b_logits'] = b_log
    layers = []
    for d in range(depth):
        lk = jax.random.split(keys[3 + d], 8)
        w_qk, b_qk = _init_linear(lk[0], emb, emb * heads)
        w_v, b_v = _init_linear(lk[1], emb, emb * heads)
        w_u, b_u = _init_linear(lk[2], emb * heads, emb)
        attn = dict(
            ln_g=jnp.ones((emb,), jnp.float32), ln_b=jnp.zeros((emb,), jnp.float32),
            # fused QK|V projection weight (one matmul, split after)
            w_qkv=jnp.concatenate([w_qk, w_v], axis=1).astype(bf16),
            b_qkv=jnp.concatenate([b_qk, b_v], axis=0),
            w_u=w_u.astype(bf16), b_u=b_u,
            rot_key=lk[3])  # per-layer key for forward-time random rotations
        w_in, b_in = _init_linear(lk[4], emb, emb * 4)
        w_out, b_out = _init_linear(lk[5], emb * 4, emb)
        ff = dict(ln_g=jnp.ones((emb,), jnp.float32), ln_b=jnp.zeros((emb,), jnp.float32),
                  w_in=w_in.astype(bf16), b_in=b_in,
                  w_out=w_out.astype(bf16), b_out=b_out)
        layers.append(dict(attn=attn, ff=ff))
    params['layers'] = layers
    return params


# ----------------------------------- main --------------------------------------

if __name__ == "__main__":
    emb = 16
    depth = 2
    max_seq_len = 64
    num_tokens = 100
    heads = 2
    bucket_size = 8       # seqlen % bucket_size == 0, n_buckets even
    n_hashes = 2
    ff_chunks = 2
    batch = 2
    seqlen = 32

    root = jax.random.PRNGKey(0)
    pkey, dkey = jax.random.split(root)
    params = init_reformer_params(pkey, emb=emb, depth=depth, max_seq_len=max_seq_len,
                                  num_tokens=num_tokens, heads=heads)
    tokens = jax.random.randint(dkey, (batch, seqlen), 0, num_tokens, dtype=jnp.int32)

    fwd = functools.partial(reformer_forward, heads=heads, bucket_size=bucket_size,
                            n_hashes=n_hashes, ff_chunks=ff_chunks, causal=False)
    logits = jax.jit(fwd)(params, tokens)
    logits = jax.block_until_ready(logits)

    assert logits.shape == (batch, seqlen, num_tokens), logits.shape
    assert bool(jnp.all(jnp.isfinite(logits)))
    print("KERNEL_OK")
</pallas_src>

<mosaic_0001>
module attributes {stable_mosaic.version = 11 : i64} {
  func.func @_ln_linear_kernel(%arg0: i32, %arg1: i32, %arg2: memref<64x16xbf16, #tpu.memory_space<vmem>>, %arg3: memref<1x16xf32, #tpu.memory_space<vmem>>, %arg4: memref<1x16xf32, #tpu.memory_space<vmem>>, %arg5: memref<16x64xbf16, #tpu.memory_space<vmem>>, %arg6: memref<1x64xf32, #tpu.memory_space<vmem>>, %arg7: memref<64x64xbf16, #tpu.memory_space<vmem>>) attributes {dimension_semantics = [#tpu.dimension_semantics<parallel>, #tpu.dimension_semantics<parallel>], iteration_bounds = array<i64: 1, 1>, scalar_prefetch = 0 : i64, scratch_operands = 0 : i64, tpu.core_type = #tpu.core_type<tc>, window_params = [{transform_indices = @transform_0, window_bounds = array<i64: 64, 16>}, {pipeline_mode = #tpu.pipeline_mode<synchronous>, transform_indices = @transform_1, window_bounds = array<i64: 1, 16>}, {pipeline_mode = #tpu.pipeline_mode<synchronous>, transform_indices = @transform_2, window_bounds = array<i64: 1, 16>}, {transform_indices = @transform_3, window_bounds = array<i64: 16, 64>}, {transform_indices = @transform_4, window_bounds = array<i64: 1, 64>}, {transform_indices = @transform_5, window_bounds = array<i64: 64, 64>}]} {
    %c0 = arith.constant 0 : index
    %c0_0 = arith.constant 0 : index
    %0 = vector.load %arg2[%c0, %c0_0] : memref<64x16xbf16, #tpu.memory_space<vmem>>, vector<64x16xbf16>
    %1 = arith.extf %0 : vector<64x16xbf16> to vector<64x16xf32>
    %cst = arith.constant dense<0.000000e+00> : vector<64xf32>
    %2 = vector.multi_reduction <add>, %1, %cst [1] : vector<64x16xf32> to vector<64xf32>
    %3 = vector.shape_cast %2 : vector<64xf32> to vector<64x1xf32>
    %cst_1 = arith.constant 1.600000e+01 : f32
    %4 = vector.broadcast %cst_1 : f32 to vector<64x1xf32>
    %5 = arith.divf %3, %4 : vector<64x1xf32>
    %6 = vector.broadcast %5 : vector<64x1xf32> to vector<64x16xf32>
    %7 = arith.subf %1, %6 : vector<64x16xf32>
    %8 = arith.mulf %7, %7 : vector<64x16xf32>
    %cst_2 = arith.constant dense<0.000000e+00> : vector<64xf32>
    %9 = vector.multi_reduction <add>, %8, %cst_2 [1] : vector<64x16xf32> to vector<64xf32>
    %10 = vector.shape_cast %9 : vector<64xf32> to vector<64x1xf32>
    %cst_3 = arith.constant 1.600000e+01 : f32
    %11 = vector.broadcast %cst_3 : f32 to vector<64x1xf32>
    %12 = arith.divf %10, %11 : vector<64x1xf32>
    %cst_4 = arith.constant 9.99999974E-6 : f32
    %13 = vector.broadcast %cst_4 : f32 to vector<64x1xf32>
    %14 = arith.addf %12, %13 : vector<64x1xf32>
    %15 = math.rsqrt %14 : vector<64x1xf32>
    %16 = vector.broadcast %15 : vector<64x1xf32> to vector<64x16xf32>
    %17 = arith.mulf %7, %16 : vector<64x16xf32>
    %c0_5 = arith.constant 0 : index
    %c0_6 = arith.constant 0 : index
    %18 = vector.load %arg3[%c0_5, %c0_6] : memref<1x16xf32, #tpu.memory_space<vmem>>, vector<1x16xf32>
    %19 = vector.broadcast %18 : vector<1x16xf32> to vector<64x16xf32>
    %20 = arith.mulf %17, %19 : vector<64x16xf32>
    %c0_7 = arith.constant 0 : index
    %c0_8 = arith.constant 0 : index
    %21 = vector.load %arg4[%c0_7, %c0_8] : memref<1x16xf32, #tpu.memory_space<vmem>>, vector<1x16xf32>
    %22 = vector.broadcast %21 : vector<1x16xf32> to vector<64x16xf32>
    %23 = arith.addf %20, %22 : vector<64x16xf32>
    %24 = arith.truncf %23 : vector<64x16xf32> to vector<64x16xbf16>
    %c0_9 = arith.constant 0 : index
    %c0_10 = arith.constant 0 : index
    %25 = vector.load %arg5[%c0_9, %c0_10] : memref<16x64xbf16, #tpu.memory_space<vmem>>, vector<16x64xbf16>
    %cst_11 = arith.constant dense<0.000000e+00> : vector<64x64xf32>
    %26 = tpu.matmul %24, %25, %cst_11 {dimension_numbers = #tpu.dot_dimension_numbers<[1], [0], [0], [1], [0, 0, 1, 1], [], []>} : vector<64x16xbf16>, vector<16x64xbf16>, vector<64x64xf32> -> vector<64x64xf32>
    %c0_12 = arith.constant 0 : index
    %c0_13 = arith.constant 0 : index
    %27 = vector.load %arg6[%c0_12, %c0_13] : memref<1x64xf32, #tpu.memory_space<vmem>>, vector<1x64xf32>
    %28 = vector.broadcast %27 : vector<1x64xf32> to vector<64x64xf32>
    %29 = arith.addf %26, %28 : vector<64x64xf32>
    %30 = arith.truncf %29 : vector<64x64xf32> to vector<64x64xbf16>
    %c0_14 = arith.constant 0 : index
    %c0_15 = arith.constant 0 : index
    %31 = vector.load %arg7[%c0_14, %c0_15] : memref<64x64xbf16, #tpu.memory_space<vmem>>, vector<64x64xbf16>
    tpu.vector_store %arg7[%c0_14, %c0_15], %30 {strides = array<i32>} : memref<64x64xbf16, #tpu.memory_space<vmem>>, vector<64x64xbf16>,
    return
  }
  func.func @transform_0(%arg0: i32, %arg1: i32) -> (i32, i32) {
    %c0_i32 = arith.constant 0 : i32
    %c0_i32_0 = arith.constant 0 : i32
    return %arg0, %c0_i32 : i32, i32
  }
  func.func @transform_1(%arg0: i32, %arg1: i32) -> (i32, i32) {
    %c0_i32 = arith.constant 0 : i32
    %c0_i32_0 = arith.constant 0 : i32
    %c0_i32_1 = arith.constant 0 : i32
    return %c0_i32, %c0_i32_0 : i32, i32
  }
  func.func @transform_2(%arg0: i32, %arg1: i32) -> (i32, i32) {
    %c0_i32 = arith.constant 0 : i32
    %c0_i32_0 = arith.constant 0 : i32
    %c0_i32_1 = arith.constant 0 : i32
    return %c0_i32, %c0_i32_0 : i32, i32
  }
  func.func @transform_3(%arg0: i32, %arg1: i32) -> (i32, i32) {
    %c0_i32 = arith.constant 0 : i32
    %c0_i32_0 = arith.constant 0 : i32
    return %c0_i32, %arg1 : i32, i32
  }
  func.func @transform_4(%arg0: i32, %arg1: i32) -> (i32, i32) {
    %c0_i32 = arith.constant 0 : i32
    %c0_i32_0 = arith.constant 0 : i32
    return %c0_i32, %arg1 : i32, i32
  }
  func.func @transform_5(%arg0: i32, %arg1: i32) -> (i32, i32) {
    %c0_i32 = arith.constant 0 : i32
    return %arg0, %arg1 : i32, i32
  }
}

module attributes {stable_mosaic.version = 11 : i64} {
  func.func @_linear_kernel(%arg0: i32, %arg1: i32, %arg2: memref<128x16xbf16, #tpu.memory_space<vmem>>, %arg3: memref<16x4xbf16, #tpu.memory_space<vmem>>, %arg4: memref<1x4xf32, #tpu.memory_space<vmem>>, %arg5: memref<128x4xf32, #tpu.memory_space<vmem>>) attributes {dimension_semantics = [#tpu.dimension_semantics<parallel>, #tpu.dimension_semantics<parallel>], iteration_bounds = array<i64: 1, 1>, scalar_prefetch = 0 : i64, scratch_operands = 0 : i64, tpu.core_type = #tpu.core_type<tc>, window_params = [{transform_indices = @transform_0, window_bounds = array<i64: 128, 16>}, {transform_indices = @transform_1, window_bounds = array<i64: 16, 4>}, {transform_indices = @transform_2, window_bounds = array<i64: 1, 4>}, {transform_indices = @transform_3, window_bounds = array<i64: 128, 4>}]} {
    %c0 = arith.constant 0 : index
    %c0_0 = arith.constant 0 : index
    %0 = vector.load %arg2[%c0, %c0_0] : memref<128x16xbf16, #tpu.memory_space<vmem>>, vector<128x16xbf16>
    %c0_1 = arith.constant 0 : index
    %c0_2 = arith.constant 0 : index
    %1 = vector.load %arg3[%c0_1, %c0_2] : memref<16x4xbf16, #tpu.memory_space<vmem>>, vector<16x4xbf16>
    %cst = arith.constant dense<0.000000e+00> : vector<128x4xf32>
    %2 = tpu.matmul %0, %1, %cst {dimension_numbers = #tpu.dot_dimension_numbers<[1], [0], [0], [1], [0, 0, 1, 1], [], []>} : vector<128x16xbf16>, vector<16x4xbf16>, vector<128x4xf32> -> vector<128x4xf32>
    %c0_3 = arith.constant 0 : index
    %c0_4 = arith.constant 0 : index
    %3 = vector.load %arg4[%c0_3, %c0_4] : memref<1x4xf32, #tpu.memory_space<vmem>>, vector<1x4xf32>
    %4 = vector.broadcast %3 : vector<1x4xf32> to vector<128x4xf32>
    %5 = arith.addf %2, %4 : vector<128x4xf32>
    %c0_5 = arith.constant 0 : index
    %c0_6 = arith.constant 0 : index
    %6 = vector.load %arg5[%c0_5, %c0_6] : memref<128x4xf32, #tpu.memory_space<vmem>>, vector<128x4xf32>
    tpu.vector_store %arg5[%c0_5, %c0_6], %5 {strides = array<i32>} : memref<128x4xf32, #tpu.memory_space<vmem>>, vector<128x4xf32>,
    return
  }
  func.func @transform_0(%arg0: i32, %arg1: i32) -> (i32, i32) {
    %c0_i32 = arith.constant 0 : i32
    %c0_i32_0 = arith.constant 0 : i32
    return %arg0, %c0_i32 : i32, i32
  }
  func.func @transform_1(%arg0: i32, %arg1: i32) -> (i32, i32) {
    %c0_i32 = arith.constant 0 : i32
    %c0_i32_0 = arith.constant 0 : i32
    return %c0_i32, %arg1 : i32, i32
  }
  func.func @transform_2(%arg0: i32, %arg1: i32) -> (i32, i32) {
    %c0_i32 = arith.constant 0 : i32
    %c0_i32_0 = arith.constant 0 : i32
    return %c0_i32, %arg1 : i32, i32
  }
  func.func @transform_3(%arg0: i32, %arg1: i32) -> (i32, i32) {
    %c0_i32 = arith.constant 0 : i32
    return %arg0, %arg1 : i32, i32
  }
}

module attributes {stable_mosaic.version = 11 : i64} {
  func.func @_lsh_attn_kernel(%arg0: i32, %arg1: i32, %arg2: memref<1x8x8x16xbf16, #tpu.memory_space<vmem>>, %arg3: memref<1x1x8x16xbf16, #tpu.memory_space<vmem>>, %arg4: memref<1x8x8x16xbf16, #tpu.memory_space<vmem>>, %arg5: memref<1x1x8x16xbf16, #tpu.memory_space<vmem>>, %arg6: memref<1x8x1x8xi32, #tpu.memory_space<vmem>>, %arg7: memref<1x1x1x8xi32, #tpu.memory_space<vmem>>, %arg8: memref<1x8x1x8xi32, #tpu.memory_space<vmem>>, %arg9: memref<1x1x1x8xi32, #tpu.memory_space<vmem>>, %arg10: memref<1x8x4x8xi32, #tpu.memory_space<vmem>>, %arg11: memref<1x1x4x8xi32, #tpu.memory_space<vmem>>, %arg12: memref<1x8x8x16xbf16, #tpu.memory_space<vmem>>, %arg13: memref<1x8x1x8xf32, #tpu.memory_space<vmem>>) attributes {dimension_semantics = [#tpu.dimension_semantics<parallel>, #tpu.dimension_semantics<parallel>], iteration_bounds = array<i64: 4, 1>, scalar_prefetch = 0 : i64, scratch_operands = 0 : i64, tpu.core_type = #tpu.core_type<tc>, window_params = [{transform_indices = @transform_0, window_bounds = array<i64: 1, 8, 8, 16>}, {transform_indices = @transform_1, window_bounds = array<i64: 1, 1, 8, 16>}, {transform_indices = @transform_2, window_bounds = array<i64: 1, 8, 8, 16>}, {transform_indices = @transform_3, window_bounds = array<i64: 1, 1, 8, 16>}, {transform_indices = @transform_4, window_bounds = array<i64: 1, 8, 1, 8>}, {transform_indices = @transform_5, window_bounds = array<i64: 1, 1, 1, 8>}, {transform_indices = @transform_6, window_bounds = array<i64: 1, 8, 1, 8>}, {transform_indices = @transform_7, window_bounds = array<i64: 1, 1, 1, 8>}, {transform_indices = @transform_8, window_bounds = array<i64: 1, 8, 4, 8>}, {transform_indices = @transform_9, window_bounds = array<i64: 1, 1, 4, 8>}, {transform_indices = @transform_10, window_bounds = array<i64: 1, 8, 8, 16>}, {transform_indices = @transform_11, window_bounds = array<i64: 1, 8, 1, 8>}]} {
    %c0 = arith.constant 0 : index
    %c0_0 = arith.constant 0 : index
    %c0_1 = arith.constant 0 : index
    %c0_2 = arith.constant 0 : index
    %0 = vector.load %arg2[%c0, %c0_0, %c0_1, %c0_2] : memref<1x8x8x16xbf16, #tpu.memory_space<vmem>>, vector<1x8x8x16xbf16>
    %1 = vector.shape_cast %0 : vector<1x8x8x16xbf16> to vector<8x8x16xbf16>
    %c0_3 = arith.constant 0 : index
    %c0_4 = arith.constant 0 : index
    %c0_5 = arith.constant 0 : index
    %c0_6 = arith.constant 0 : index
    %2 = vector.load %arg3[%c0_3, %c0_4, %c0_5, %c0_6] : memref<1x1x8x16xbf16, #tpu.memory_space<vmem>>, vector<1x1x8x16xbf16>
    %3 = vector.shape_cast %2 : vector<1x1x8x16xbf16> to vector<1x8x16xbf16>
    %c0_7 = arith.constant 0 : index
    %c0_8 = arith.constant 0 : index
    %c0_9 = arith.constant 0 : index
    %c0_10 = arith.constant 0 : index
    %4 = vector.load %arg4[%c0_7, %c0_8, %c0_9, %c0_10] : memref<1x8x8x16xbf16, #tpu.memory_space<vmem>>, vector<1x8x8x16xbf16>
    %5 = vector.shape_cast %4 : vector<1x8x8x16xbf16> to vector<8x8x16xbf16>
    %c0_11 = arith.constant 0 : index
    %c0_12 = arith.constant 0 : index
    %c0_13 = arith.constant 0 : index
    %c0_14 = arith.constant 0 : index
    %6 = vector.load %arg5[%c0_11, %c0_12, %c0_13, %c0_14] : memref<1x1x8x16xbf16, #tpu.memory_space<vmem>>, vector<1x1x8x16xbf16>
    %7 = vector.shape_cast %6 : vector<1x1x8x16xbf16> to vector<1x8x16xbf16>
    %8 = vector.extract_strided_slice %1 {offsets = [0, 0, 0], sizes = [7, 8, 16], strides = [1, 1, 1]} : vector<8x8x16xbf16> to vector<7x8x16xbf16>
    %9 = tpu.concatenate %3, %8 in 0 : vector<1x8x16xbf16>, vector<7x8x16xbf16> -> vector<8x8x16xbf16>
    %10 = tpu.concatenate %1, %9 in 1 : vector<8x8x16xbf16>, vector<8x8x16xbf16> -> vector<8x16x16xbf16>
    %11 = arith.extf %10 : vector<8x16x16xbf16> to vector<8x16x16xf32>
    %12 = arith.mulf %11, %11 : vector<8x16x16xf32>
    %cst = arith.constant dense<0.000000e+00> : vector<8x16xf32>
    %13 = vector.multi_reduction <add>, %12, %cst [2] : vector<8x16x16xf32> to vector<8x16xf32>
    %14 = vector.shape_cast %13 : vector<8x16xf32> to vector<8x16x1xf32>
    %15 = math.sqrt %14 : vector<8x16x1xf32>
    %cst_15 = arith.constant 9.99999997E-7 : f32
    %16 = vector.broadcast %cst_15 : f32 to vector<8x16x1xf32>
    %17 = arith.addf %15, %16 : vector<8x16x1xf32>
    %18 = vector.broadcast %17 : vector<8x16x1xf32> to vector<8x16x16xf32>
    %19 = arith.divf %11, %18 : vector<8x16x16xf32>
    %20 = arith.truncf %19 : vector<8x16x16xf32> to vector<8x16x16xbf16>
    %21 = vector.extract_strided_slice %5 {offsets = [0, 0, 0], sizes = [7, 8, 16], strides = [1, 1, 1]} : vector<8x8x16xbf16> to vector<7x8x16xbf16>
    %22 = tpu.concatenate %7, %21 in 0 : vector<1x8x16xbf16>, vector<7x8x16xbf16> -> vector<8x8x16xbf16>
    %23 = tpu.concatenate %5, %22 in 1 : vector<8x8x16xbf16>, vector<8x8x16xbf16> -> vector<8x16x16xbf16>
    "tpu.trace_start"() <{level = 10 : i32, message = "gqd,gkd->gqk"}> : () -> ()
    %cst_16 = arith.constant dense<0.000000e+00> : vector<8x8x16xf32>
    %24 = tpu.matmul %1, %20, %cst_16 {dimension_numbers = #tpu.dot_dimension_numbers<[2], [2], [1], [1], [0, 0, 0, 1, 1, 1], [0], [0]>} : vector<8x8x16xbf16>, vector<8x16x16xbf16>, vector<8x8x16xf32> -> vector<8x8x16xf32>
    "tpu.trace_stop"() : () -> ()
    %cst_17 = arith.constant 2.500000e-01 : f32
    %25 = vector.broadcast %cst_17 : f32 to vector<8x8x16xf32>
    %26 = arith.mulf %24, %25 : vector<8x8x16xf32>
    %c0_18 = arith.constant 0 : index
    %c0_19 = arith.constant 0 : index
    %c0_20 = arith.constant 0 : index
    %c0_21 = arith.constant 0 : index
    %27 = vector.load %arg6[%c0_18, %c0_19, %c0_20, %c0_21] : memref<1x8x1x8xi32, #tpu.memory_space<vmem>>, vector<1x8x1x8xi32>
    %28 = vector.shape_cast %27 : vector<1x8x1x8xi32> to vector<8x1x8xi32>
    %29 = vector.shape_cast %28 : vector<8x1x8xi32> to vector<8x8xi32>
    %c0_22 = arith.constant 0 : index
    %c0_23 = arith.constant 0 : index
    %c0_24 = arith.constant 0 : index
    %c0_25 = arith.constant 0 : index
    %30 = vector.load %arg7[%c0_22, %c0_23, %c0_24, %c0_25] : memref<1x1x1x8xi32, #tpu.memory_space<vmem>>, vector<1x1x1x8xi32>
    %31 = vector.shape_cast %30 : vector<1x1x1x8xi32> to vector<1x1x8xi32>
    %32 = vector.shape_cast %31 : vector<1x1x8xi32> to vector<1x8xi32>
    %33 = vector.extract_strided_slice %29 {offsets = [0, 0], sizes = [7, 8], strides = [1, 1]} : vector<8x8xi32> to vector<7x8xi32>
    %34 = tpu.concatenate %32, %33 in 0 : vector<1x8xi32>, vector<7x8xi32> -> vector<8x8xi32>
    %35 = tpu.concatenate %29, %34 in 1 : vector<8x8xi32>, vector<8x8xi32> -> vector<8x16xi32>
    %c0_26 = arith.constant 0 : index
    %c0_27 = arith.constant 0 : index
    %c0_28 = arith.constant 0 : index
    %c0_29 = arith.constant 0 : index
    %36 = vector.load %arg8[%c0_26, %c0_27, %c0_28, %c0_29] : memref<1x8x1x8xi32, #tpu.memory_space<vmem>>, vector<1x8x1x8xi32>
    %37 = vector.shape_cast %36 : vector<1x8x1x8xi32> to vector<8x1x8xi32>
    %38 = vector.shape_cast %37 : vector<8x1x8xi32> to vector<8x8xi32>
    %c0_30 = arith.constant 0 : index
    %c0_31 = arith.constant 0 : index
    %c0_32 = arith.constant 0 : index
    %c0_33 = arith.constant 0 : index
    %39 = vector.load %arg9[%c0_30, %c0_31, %c0_32, %c0_33] : memref<1x1x1x8xi32, #tpu.memory_space<vmem>>, vector<1x1x1x8xi32>
    %40 = vector.shape_cast %39 : vector<1x1x1x8xi32> to vector<1x1x8xi32>
    %41 = vector.shape_cast %40 : vector<1x1x8xi32> to vector<1x8xi32>
    %42 = vector.extract_strided_slice %38 {offsets = [0, 0], sizes = [7, 8], strides = [1, 1]} : vector<8x8xi32> to vector<7x8xi32>
    %43 = tpu.concatenate %41, %42 in 0 : vector<1x8xi32>, vector<7x8xi32> -> vector<8x8xi32>
    %44 = tpu.concatenate %38, %43 in 1 : vector<8x8xi32>, vector<8x8xi32> -> vector<8x16xi32>
    %45 = vector.shape_cast %29 : vector<8x8xi32> to vector<8x8x1xi32>
    %46 = vector.shape_cast %35 : vector<8x16xi32> to vector<8x1x16xi32>
    %47 = vector.broadcast %45 : vector<8x8x1xi32> to vector<8x8x16xi32>
    %48 = vector.broadcast %46 : vector<8x1x16xi32> to vector<8x8x16xi32>
    %49 = arith.cmpi eq, %47, %48 : vector<8x8x16xi32>
    %50 = arith.extui %49 : vector<8x8x16xi1> to vector<8x8x16xi32>
    %51 = arith.sitofp %50 : vector<8x8x16xi32> to vector<8x8x16xf32>
    %cst_34 = arith.constant -1.000000e+05 : f32
    %52 = vector.broadcast %cst_34 : f32 to vector<8x8x16xf32>
    %53 = arith.mulf %51, %52 : vector<8x8x16xf32>
    %54 = vector.shape_cast %38 : vector<8x8xi32> to vector<8x8x1xi32>
    %55 = vector.shape_cast %44 : vector<8x16xi32> to vector<8x1x16xi32>
    %56 = vector.broadcast %54 : vector<8x8x1xi32> to vector<8x8x16xi32>
    %57 = vector.broadcast %55 : vector<8x1x16xi32> to vector<8x8x16xi32>
    %58 = arith.cmpi ne, %56, %57 : vector<8x8x16xi32>
    %59 = arith.extui %58 : vector<8x8x16xi1> to vector<8x8x16xi32>
    %60 = arith.sitofp %59 : vector<8x8x16xi32> to vector<8x8x16xf32>
    %cst_35 = arith.constant -1.000000e+07 : f32
    %61 = vector.broadcast %cst_35 : f32 to vector<8x8x16xf32>
    %62 = arith.mulf %60, %61 : vector<8x8x16xf32>
    %63 = arith.addf %53, %62 : vector<8x8x16xf32>
    %c0_36 = arith.constant 0 : index
    %c0_37 = arith.constant 0 : index
    %c0_38 = arith.constant 0 : index
    %c0_39 = arith.constant 0 : index
    %64 = vector.load %arg10[%c0_36, %c0_37, %c0_38, %c0_39] : memref<1x8x4x8xi32, #tpu.memory_space<vmem>>, vector<1x8x4x8xi32>
    %65 = vector.shape_cast %64 : vector<1x8x4x8xi32> to vector<8x4x8xi32>
    %c0_40 = arith.constant 0 : index
    %c0_41 = arith.constant 0 : index
    %c0_42 = arith.constant 0 : index
    %c0_43 = arith.constant 0 : index
    %66 = vector.load %arg11[%c0_40, %c0_41, %c0_42, %c0_43] : memref<1x1x4x8xi32, #tpu.memory_space<vmem>>, vector<1x1x4x8xi32>
    %67 = vector.shape_cast %66 : vector<1x1x4x8xi32> to vector<1x4x8xi32>
    %68 = vector.extract_strided_slice %65 {offsets = [0, 0, 0], sizes = [7, 4, 8], strides = [1, 1, 1]} : vector<8x4x8xi32> to vector<7x4x8xi32>
    %69 = tpu.concatenate %67, %68 in 0 : vector<1x4x8xi32>, vector<7x4x8xi32> -> vector<8x4x8xi32>
    %70 = tpu.concatenate %65, %69 in 2 : vector<8x4x8xi32>, vector<8x4x8xi32> -> vector<8x4x16xi32>
    %cst_44 = arith.constant 0.000000e+00 : f32
    %71 = vector.broadcast %cst_44 : f32 to vector<8x8x16xf32>
    %72 = vector.extract_strided_slice %65 {offsets = [0, 0, 0], sizes = [8, 1, 8], strides = [1, 1, 1]} : vector<8x4x8xi32> to vector<8x1x8xi32>
    %73 = vector.shape_cast %72 : vector<8x1x8xi32> to vector<8x8xi32>
    %74 = vector.extract_strided_slice %70 {offsets = [0, 0, 0], sizes = [8, 1, 16], strides = [1, 1, 1]} : vector<8x4x16xi32> to vector<8x1x16xi32>
    %75 = vector.shape_cast %74 : vector<8x1x16xi32> to vector<8x16xi32>
    %76 = vector.shape_cast %73 : vector<8x8xi32> to vector<8x8x1xi32>
    %77 = vector.shape_cast %75 : vector<8x16xi32> to vector<8x1x16xi32>
    %78 = vector.broadcast %76 : vector<8x8x1xi32> to vector<8x8x16xi32>
    %79 = vector.broadcast %77 : vector<8x1x16xi32> to vector<8x8x16xi32>
    %80 = arith.cmpi eq, %78, %79 : vector<8x8x16xi32>
    %81 = arith.extui %80 : vector<8x8x16xi1> to vector<8x8x16xi32>
    %82 = arith.sitofp %81 : vector<8x8x16xi32> to vector<8x8x16xf32>
    %83 = arith.addf %71, %82 : vector<8x8x16xf32>
    %84 = vector.extract_strided_slice %65 {offsets = [0, 1, 0], sizes = [8, 1, 8], strides = [1, 1, 1]} : vector<8x4x8xi32> to vector<8x1x8xi32>
    %85 = vector.shape_cast %84 : vector<8x1x8xi32> to vector<8x8xi32>
    %86 = vector.extract_strided_slice %70 {offsets = [0, 1, 0], sizes = [8, 1, 16], strides = [1, 1, 1]} : vector<8x4x16xi32> to vector<8x1x16xi32>
    %87 = vector.shape_cast %86 : vector<8x1x16xi32> to vector<8x16xi32>
    %88 = vector.shape_cast %85 : vector<8x8xi32> to vector<8x8x1xi32>
    %89 = vector.shape_cast %87 : vector<8x16xi32> to vector<8x1x16xi32>
    %90 = vector.broadcast %88 : vector<8x8x1xi32> to vector<8x8x16xi32>
    %91 = vector.broadcast %89 : vector<8x1x16xi32> to vector<8x8x16xi32>
    %92 = arith.cmpi eq, %90, %91 : vector<8x8x16xi32>
    %93 = arith.extui %92 : vector<8x8x16xi1> to vector<8x8x16xi32>
    %94 = arith.sitofp %93 : vector<8x8x16xi32> to vector<8x8x16xf32>
    %95 = arith.addf %83, %94 : vector<8x8x16xf32>
    %96 = vector.extract_strided_slice %65 {offsets = [0, 0, 0], sizes = [8, 1, 8], strides = [1, 1, 1]} : vector<8x4x8xi32> to vector<8x1x8xi32>
    %97 = vector.shape_cast %96 : vector<8x1x8xi32> to vector<8x8xi32>
    %98 = vector.extract_strided_slice %70 {offsets = [0, 2, 0], sizes = [8, 1, 16], strides = [1, 1, 1]} : vector<8x4x16xi32> to vector<8x1x16xi32>
    %99 = vector.shape_cast %98 : vector<8x1x16xi32> to vector<8x16xi32>
    %100 = vector.shape_cast %97 : vector<8x8xi32> to vector<8x8x1xi32>
    %101 = vector.shape_cast %99 : vector<8x16xi32> to vector<8x1x16xi32>
    %102 = vector.broadcast %100 : vector<8x8x1xi32> to vector<8x8x16xi32>
    %103 = vector.broadcast %101 : vector<8x1x16xi32> to vector<8x8x16xi32>
    %104 = arith.cmpi eq, %102, %103 : vector<8x8x16xi32>
    %105 = arith.extui %104 : vector<8x8x16xi1> to vector<8x8x16xi32>
    %106 = arith.sitofp %105 : vector<8x8x16xi32> to vector<8x8x16xf32>
    %107 = arith.addf %95, %106 : vector<8x8x16xf32>
    %108 = vector.extract_strided_slice %65 {offsets = [0, 1, 0], sizes = [8, 1, 8], strides = [1, 1, 1]} : vector<8x4x8xi32> to vector<8x1x8xi32>
    %109 = vector.shape_cast %108 : vector<8x1x8xi32> to vector<8x8xi32>
    %110 = vector.extract_strided_slice %70 {offsets = [0, 3, 0], sizes = [8, 1, 16], strides = [1, 1, 1]} : vector<8x4x16xi32> to vector<8x1x16xi32>
    %111 = vector.shape_cast %110 : vector<8x1x16xi32> to vector<8x16xi32>
    %112 = vector.shape_cast %109 : vector<8x8xi32> to vector<8x8x1xi32>
    %113 = vector.shape_cast %111 : vector<8x16xi32> to vector<8x1x16xi32>
    %114 = vector.broadcast %112 : vector<8x8x1xi32> to vector<8x8x16xi32>
    %115 = vector.broadcast %113 : vector<8x1x16xi32> to vector<8x8x16xi32>
    %116 = arith.cmpi eq, %114, %115 : vector<8x8x16xi32>
    %117 = arith.extui %116 : vector<8x8x16xi1> to vector<8x8x16xi32>
    %118 = arith.sitofp %117 : vector<8x8x16xi32> to vector<8x8x16xf32>
    %119 = arith.addf %107, %118 : vector<8x8x16xf32>
    %cst_45 = arith.constant 9.99999971E-10 : f32
    %120 = vector.broadcast %cst_45 : f32 to vector<8x8x16xf32>
    %121 = arith.addf %119, %120 : vector<8x8x16xf32>
    %122 = math.log %121 : vector<8x8x16xf32>
    %123 = arith.subf %63, %122 : vector<8x8x16xf32>
    %124 = arith.addf %26, %123 : vector<8x8x16xf32>
    %cst_46 = arith.constant dense<0xFF800000> : vector<8x8xf32>
    %125 = vector.multi_reduction <maximumf>, %124, %cst_46 [2] : vector<8x8x16xf32> to vector<8x8xf32>
    %126 = vector.shape_cast %125 : vector<8x8xf32> to vector<8x8x1xf32>
    %127 = vector.broadcast %126 : vector<8x8x1xf32> to vector<8x8x16xf32>
    %128 = arith.subf %124, %127 : vector<8x8x16xf32>
    %129 = math.exp %128 : vector<8x8x16xf32>
    %cst_47 = arith.constant dense<0.000000e+00> : vector<8x8xf32>
    %130 = vector.multi_reduction <add>, %129, %cst_47 [2] : vector<8x8x16xf32> to vector<8x8xf32>
    %131 = vector.shape_cast %130 : vector<8x8xf32> to vector<8x8x1xf32>
    %132 = tpu.reciprocal %131 {approx = true} : vector<8x8x1xf32> -> vector<8x8x1xf32>
    %133 = vector.broadcast %132 : vector<8x8x1xf32> to vector<8x8x16xf32>
    %134 = arith.mulf %129, %133 : vector<8x8x16xf32>
    %135 = arith.truncf %134 : vector<8x8x16xf32> to vector<8x8x16xbf16>
    "tpu.trace_start"() <{level = 10 : i32, message = "gqk,gkd->gqd"}> : () -> ()
    %cst_48 = arith.constant dense<0.000000e+00> : vector<8x8x16xf32>
    %136 = tpu.matmul %135, %23, %cst_48 {dimension_numbers = #tpu.dot_dimension_numbers<[2], [1], [1], [2], [0, 0, 0, 1, 1, 2], [0], [0]>} : vector<8x8x16xbf16>, vector<8x16x16xbf16>, vector<8x8x16xf32> -> vector<8x8x16xf32>
    "tpu.trace_stop"() : () -> ()
    %137 = arith.truncf %136 : vector<8x8x16xf32> to vector<8x8x16xbf16>
    %c0_49 = arith.constant 0 : index
    %c0_50 = arith.constant 0 : index
    %c0_51 = arith.constant 0 : index
    %c0_52 = arith.constant 0 : index
    %138 = vector.load %arg12[%c0_49, %c0_50, %c0_51, %c0_52] : memref<1x8x8x16xbf16, #tpu.memory_space<vmem>>, vector<1x8x8x16xbf16>
    %139 = vector.shape_cast %138 : vector<1x8x8x16xbf16> to vector<8x8x16xbf16>
    %140 = vector.shape_cast %137 : vector<8x8x16xbf16> to vector<1x8x8x16xbf16>
    tpu.vector_store %arg12[%c0_49, %c0_50, %c0_51, %c0_52], %140 {strides = array<i32>} : memref<1x8x8x16xbf16, #tpu.memory_space<vmem>>, vector<1x8x8x16xbf16>,
    %141 = vector.shape_cast %126 : vector<8x8x1xf32> to vector<8x8xf32>
    %142 = vector.shape_cast %131 : vector<8x8x1xf32> to vector<8x8xf32>
    %143 = math.log %142 : vector<8x8xf32>
    %144 = arith.addf %141, %143 : vector<8x8xf32>
    %145 = vector.shape_cast %144 : vector<8x8xf32> to vector<8x1x8xf32>
    %c0_53 = arith.constant 0 : index
    %c0_54 = arith.constant 0 : index
    %c0_55 = arith.constant 0 : index
    %c0_56 = arith.constant 0 : index
    %146 = vector.load %arg13[%c0_53, %c0_54, %c0_55, %c0_56] : memref<1x8x1x8xf32, #tpu.memory_space<vmem>>, vector<1x8x1x8xf32>
    %147 = vector.shape_cast %146 : vector<1x8x1x8xf32> to vector<8x1x8xf32>
    %148 = vector.shape_cast %145 : vector<8x1x8xf32> to vector<1x8x1x8xf32>
    tpu.vector_store %arg13[%c0_53, %c0_54, %c0_55, %c0_56], %148 {strides = array<i32>} : memref<1x8x1x8xf32, #tpu.memory_space<vmem>>, vector<1x8x1x8xf32>,
    return
  }
  func.func @transform_0(%arg0: i32, %arg1: i32) -> (i32, i32, i32, i32) {
    %c0_i32 = arith.constant 0 : i32
    %c0_i32_0 = arith.constant 0 : i32
    %c0_i32_1 = arith.constant 0 : i32
    return %arg0, %arg1, %c0_i32, %c0_i32_0 : i32, i32, i32, i32
  }
  func.func @transform_1(%arg0: i32, %arg1: i32) -> (i32, i32, i32, i32) {
    %c8_i32 = arith.constant 8 : i32
    %0 = arith.muli %arg1, %c8_i32 : i32
    %c8_i32_0 = arith.constant 8 : i32
    %1 = arith.addi %0, %c8_i32_0 : i32
    %c1_i32 = arith.constant 1 : i32
    %2 = arith.subi %1, %c1_i32 : i32
    %c8_i32_1 = arith.constant 8 : i32
    %c0_i32 = arith.constant 0 : i32
    %3 = arith.cmpi eq, %c8_i32_1, %c0_i32 : i32
    %c1_i32_2 = arith.constant 1 : i32
    %4 = arith.select %3, %c1_i32_2, %c8_i32_1 : i32
    %5 = arith.remsi %2, %4 : i32
    %c0_i32_3 = arith.constant 0 : i32
    %6 = arith.cmpi ne, %5, %c0_i32_3 : i32
    %c0_i32_4 = arith.constant 0 : i32
    %7 = arith.cmpi slt, %5, %c0_i32_4 : i32
    %c0_i32_5 = arith.constant 0 : i32
    %8 = arith.cmpi slt, %4, %c0_i32_5 : i32
    %9 = arith.xori %7, %8 : i1
    %10 = arith.andi %9, %6 : i1
    %11 = arith.addi %5, %4 : i32
    %12 = arith.select %10, %11, %5 : i32
    %c0_i32_6 = arith.constant 0 : i32
    %c0_i32_7 = arith.constant 0 : i32
    %c0_i32_8 = arith.constant 0 : i32
    return %arg0, %12, %c0_i32_6, %c0_i32_7 : i32, i32, i32, i32
  }
  func.func @transform_2(%arg0: i32, %arg1: i32) -> (i32, i32, i32, i32) {
    %c0_i32 = arith.constant 0 : i32
    %c0_i32_0 = arith.constant 0 : i32
    %c0_i32_1 = arith.constant 0 : i32
    return %arg0, %arg1, %c0_i32, %c0_i32_0 : i32, i32, i32, i32
  }
  func.func @transform_3(%arg0: i32, %arg1: i32) -> (i32, i32, i32, i32) {
    %c8_i32 = arith.constant 8 : i32
    %0 = arith.muli %arg1, %c8_i32 : i32
    %c8_i32_0 = arith.constant 8 : i32
    %1 = arith.addi %0, %c8_i32_0 : i32
    %c1_i32 = arith.constant 1 : i32
    %2 = arith.subi %1, %c1_i32 : i32
    %c8_i32_1 = arith.constant 8 : i32
    %c0_i32 = arith.constant 0 : i32
    %3 = arith.cmpi eq, %c8_i32_1, %c0_i32 : i32
    %c1_i32_2 = arith.constant 1 : i32
    %4 = arith.select %3, %c1_i32_2, %c8_i32_1 : i32
    %5 = arith.remsi %2, %4 : i32
    %c0_i32_3 = arith.constant 0 : i32
    %6 = arith.cmpi ne, %5, %c0_i32_3 : i32
    %c0_i32_4 = arith.constant 0 : i32
    %7 = arith.cmpi slt, %5, %c0_i32_4 : i32
    %c0_i32_5 = arith.constant 0 : i32
    %8 = arith.cmpi slt, %4, %c0_i32_5 : i32
    %9 = arith.xori %7, %8 : i1
    %10 = arith.andi %9, %6 : i1
    %11 = arith.addi %5, %4 : i32
    %12 = arith.select %10, %11, %5 : i32
    %c0_i32_6 = arith.constant 0 : i32
    %c0_i32_7 = arith.constant 0 : i32
    %c0_i32_8 = arith.constant 0 : i32
    return %arg0, %12, %c0_i32_6, %c0_i32_7 : i32, i32, i32, i32
  }
  func.func @transform_4(%arg0: i32, %arg1: i32) -> (i32, i32, i32, i32) {
    %c0_i32 = arith.constant 0 : i32
    %c0_i32_0 = arith.constant 0 : i32
    %c0_i32_1 = arith.constant 0 : i32
    return %arg0, %arg1, %c0_i32, %c0_i32_0 : i32, i32, i32, i32
  }
  func.func @transform_5(%arg0: i32, %arg1: i32) -> (i32, i32, i32, i32) {
    %c8_i32 = arith.constant 8 : i32
    %0 = arith.muli %arg1, %c8_i32 : i32
    %c8_i32_0 = arith.constant 8 : i32
    %1 = arith.addi %0, %c8_i32_0 : i32
    %c1_i32 = arith.constant 1 : i32
    %2 = arith.subi %1, %c1_i32 : i32
    %c8_i32_1 = arith.constant 8 : i32
    %c0_i32 = arith.constant 0 : i32
    %3 = arith.cmpi eq, %c8_i32_1, %c0_i32 : i32
    %c1_i32_2 = arith.constant 1 : i32
    %4 = arith.select %3, %c1_i32_2, %c8_i32_1 : i32
    %5 = arith.remsi %2, %4 : i32
    %c0_i32_3 = arith.constant 0 : i32
    %6 = arith.cmpi ne, %5, %c0_i32_3 : i32
    %c0_i32_4 = arith.constant 0 : i32
    %7 = arith.cmpi slt, %5, %c0_i32_4 : i32
    %c0_i32_5 = arith.constant 0 : i32
    %8 = arith.cmpi slt, %4, %c0_i32_5 : i32
    %9 = arith.xori %7, %8 : i1
    %10 = arith.andi %9, %6 : i1
    %11 = arith.addi %5, %4 : i32
    %12 = arith.select %10, %11, %5 : i32
    %c0_i32_6 = arith.constant 0 : i32
    %c0_i32_7 = arith.constant 0 : i32
    %c0_i32_8 = arith.constant 0 : i32
    return %arg0, %12, %c0_i32_6, %c0_i32_7 : i32, i32, i32, i32
  }
  func.func @transform_6(%arg0: i32, %arg1: i32) -> (i32, i32, i32, i32) {
    %c0_i32 = arith.constant 0 : i32
    %c0_i32_0 = arith.constant 0 : i32
    %c0_i32_1 = arith.constant 0 : i32
    return %arg0, %arg1, %c0_i32, %c0_i32_0 : i32, i32, i32, i32
  }
  func.func @transform_7(%arg0: i32, %arg1: i32) -> (i32, i32, i32, i32) {
    %c8_i32 = arith.constant 8 : i32
    %0 = arith.muli %arg1, %c8_i32 : i32
    %c8_i32_0 = arith.constant 8 : i32
    %1 = arith.addi %0, %c8_i32_0 : i32
    %c1_i32 = arith.constant 1 : i32
    %2 = arith.subi %1, %c1_i32 : i32
    %c8_i32_1 = arith.constant 8 : i32
    %c0_i32 = arith.constant 0 : i32
    %3 = arith.cmpi eq, %c8_i32_1, %c0_i32 : i32
    %c1_i32_2 = arith.constant 1 : i32
    %4 = arith.select %3, %c1_i32_2, %c8_i32_1 : i32
    %5 = arith.remsi %2, %4 : i32
    %c0_i32_3 = arith.constant 0 : i32
    %6 = arith.cmpi ne, %5, %c0_i32_3 : i32
    %c0_i32_4 = arith.constant 0 : i32
    %7 = arith.cmpi slt, %5, %c0_i32_4 : i32
    %c0_i32_5 = arith.constant 0 : i32
    %8 = arith.cmpi slt, %4, %c0_i32_5 : i32
    %9 = arith.xori %7, %8 : i1
    %10 = arith.andi %9, %6 : i1
    %11 = arith.addi %5, %4 : i32
    %12 = arith.select %10, %11, %5 : i32
    %c0_i32_6 = arith.constant 0 : i32
    %c0_i32_7 = arith.constant 0 : i32
    %c0_i32_8 = arith.constant 0 : i32
    return %arg0, %12, %c0_i32_6, %c0_i32_7 : i32, i32, i32, i32
  }
  func.func @transform_8(%arg0: i32, %arg1: i32) -> (i32, i32, i32, i32) {
    %c0_i32 = arith.constant 0 : i32
    %c0_i32_0 = arith.constant 0 : i32
    %c0_i32_1 = arith.constant 0 : i32
    return %arg0, %arg1, %c0_i32, %c0_i32_0 : i32, i32, i32, i32
  }
  func.func @transform_9(%arg0: i32, %arg1: i32) -> (i32, i32, i32, i32) {
    %c8_i32 = arith.constant 8 : i32
    %0 = arith.muli %arg1, %c8_i32 : i32
    %c8_i32_0 = arith.constant 8 : i32
    %1 = arith.addi %0, %c8_i32_0 : i32
    %c1_i32 = arith.constant 1 : i32
    %2 = arith.subi %1, %c1_i32 : i32
    %c8_i32_1 = arith.constant 8 : i32
    %c0_i32 = arith.constant 0 : i32
    %3 = arith.cmpi eq, %c8_i32_1, %c0_i32 : i32
    %c1_i32_2 = arith.constant 1 : i32
    %4 = arith.select %3, %c1_i32_2, %c8_i32_1 : i32
    %5 = arith.remsi %2, %4 : i32
    %c0_i32_3 = arith.constant 0 : i32
    %6 = arith.cmpi ne, %5, %c0_i32_3 : i32
    %c0_i32_4 = arith.constant 0 : i32
    %7 = arith.cmpi slt, %5, %c0_i32_4 : i32
    %c0_i32_5 = arith.constant 0 : i32
    %8 = arith.cmpi slt, %4, %c0_i32_5 : i32
    %9 = arith.xori %7, %8 : i1
    %10 = arith.andi %9, %6 : i1
    %11 = arith.addi %5, %4 : i32
    %12 = arith.select %10, %11, %5 : i32
    %c0_i32_6 = arith.constant 0 : i32
    %c0_i32_7 = arith.constant 0 : i32
    %c0_i32_8 = arith.constant 0 : i32
    return %arg0, %12, %c0_i32_6, %c0_i32_7 : i32, i32, i32, i32
  }
  func.func @transform_10(%arg0: i32, %arg1: i32) -> (i32, i32, i32, i32) {
    %c0_i32 = arith.constant 0 : i32
    %c0_i32_0 = arith.constant 0 : i32
    %c0_i32_1 = arith.constant 0 : i32
    return %arg0, %arg1, %c0_i32, %c0_i32_0 : i32, i32, i32, i32
  }
  func.func @transform_11(%arg0: i32, %arg1: i32) -> (i32, i32, i32, i32) {
    %c0_i32 = arith.constant 0 : i32
    %c0_i32_0 = arith.constant 0 : i32
    %c0_i32_1 = arith.constant 0 : i32
    return %arg0, %arg1, %c0_i32, %c0_i32_0 : i32, i32, i32, i32
  }
}

module attributes {stable_mosaic.version = 11 : i64} {
  func.func @_linear_kernel(%arg0: i32, %arg1: i32, %arg2: memref<64x32xbf16, #tpu.memory_space<vmem>>, %arg3: memref<32x16xbf16, #tpu.memory_space<vmem>>, %arg4: memref<1x16xf32, #tpu.memory_space<vmem>>, %arg5: memref<64x16xbf16, #tpu.memory_space<vmem>>) attributes {dimension_semantics = [#tpu.dimension_semantics<parallel>, #tpu.dimension_semantics<parallel>], iteration_bounds = array<i64: 1, 1>, scalar_prefetch = 0 : i64, scratch_operands = 0 : i64, tpu.core_type = #tpu.core_type<tc>, window_params = [{transform_indices = @transform_0, window_bounds = array<i64: 64, 32>}, {transform_indices = @transform_1, window_bounds = array<i64: 32, 16>}, {transform_indices = @transform_2, window_bounds = array<i64: 1, 16>}, {transform_indices = @transform_3, window_bounds = array<i64: 64, 16>}]} {
    %c0 = arith.constant 0 : index
    %c0_0 = arith.constant 0 : index
    %0 = vector.load %arg2[%c0, %c0_0] : memref<64x32xbf16, #tpu.memory_space<vmem>>, vector<64x32xbf16>
    %c0_1 = arith.constant 0 : index
    %c0_2 = arith.constant 0 : index
    %1 = vector.load %arg3[%c0_1, %c0_2] : memref<32x16xbf16, #tpu.memory_space<vmem>>, vector<32x16xbf16>
    %cst = arith.constant dense<0.000000e+00> : vector<64x16xf32>
    %2 = tpu.matmul %0, %1, %cst {dimension_numbers = #tpu.dot_dimension_numbers<[1], [0], [0], [1], [0, 0, 1, 1], [], []>} : vector<64x32xbf16>, vector<32x16xbf16>, vector<64x16xf32> -> vector<64x16xf32>
    %c0_3 = arith.constant 0 : index
    %c0_4 = arith.constant 0 : index
    %3 = vector.load %arg4[%c0_3, %c0_4] : memref<1x16xf32, #tpu.memory_space<vmem>>, vector<1x16xf32>
    %4 = vector.broadcast %3 : vector<1x16xf32> to vector<64x16xf32>
    %5 = arith.addf %2, %4 : vector<64x16xf32>
    %6 = arith.truncf %5 : vector<64x16xf32> to vector<64x16xbf16>
    %c0_5 = arith.constant 0 : index
    %c0_6 = arith.constant 0 : index
    %7 = vector.load %arg5[%c0_5, %c0_6] : memref<64x16xbf16, #tpu.memory_space<vmem>>, vector<64x16xbf16>
    tpu.vector_store %arg5[%c0_5, %c0_6], %6 {strides = array<i32>} : memref<64x16xbf16, #tpu.memory_space<vmem>>, vector<64x16xbf16>,
    return
  }
  func.func @transform_0(%arg0: i32, %arg1: i32) -> (i32, i32) {
    %c0_i32 = arith.constant 0 : i32
    %c0_i32_0 = arith.constant 0 : i32
    return %arg0, %c0_i32 : i32, i32
  }
  func.func @transform_1(%arg0: i32, %arg1: i32) -> (i32, i32) {
    %c0_i32 = arith.constant 0 : i32
    %c0_i32_0 = arith.constant 0 : i32
    return %c0_i32, %arg1 : i32, i32
  }
  func.func @transform_2(%arg0: i32, %arg1: i32) -> (i32, i32) {
    %c0_i32 = arith.constant 0 : i32
    %c0_i32_0 = arith.constant 0 : i32
    return %c0_i32, %arg1 : i32, i32
  }
  func.func @transform_3(%arg0: i32, %arg1: i32) -> (i32, i32) {
    %c0_i32 = arith.constant 0 : i32
    return %arg0, %arg1 : i32, i32
  }
}

module attributes {stable_mosaic.version = 11 : i64} {
  func.func @_linear_kernel(%arg0: i32, %arg1: i32, %arg2: memref<64x64xbf16, #tpu.memory_space<vmem>>, %arg3: memref<64x16xbf16, #tpu.memory_space<vmem>>, %arg4: memref<1x16xf32, #tpu.memory_space<vmem>>, %arg5: memref<64x16xbf16, #tpu.memory_space<vmem>>) attributes {dimension_semantics = [#tpu.dimension_semantics<parallel>, #tpu.dimension_semantics<parallel>], iteration_bounds = array<i64: 1, 1>, scalar_prefetch = 0 : i64, scratch_operands = 0 : i64, tpu.core_type = #tpu.core_type<tc>, window_params = [{transform_indices = @transform_0, window_bounds = array<i64: 64, 64>}, {transform_indices = @transform_1, window_bounds = array<i64: 64, 16>}, {transform_indices = @transform_2, window_bounds = array<i64: 1, 16>}, {transform_indices = @transform_3, window_bounds = array<i64: 64, 16>}]} {
    %c0 = arith.constant 0 : index
    %c0_0 = arith.constant 0 : index
    %0 = vector.load %arg2[%c0, %c0_0] : memref<64x64xbf16, #tpu.memory_space<vmem>>, vector<64x64xbf16>
    %c0_1 = arith.constant 0 : index
    %c0_2 = arith.constant 0 : index
    %1 = vector.load %arg3[%c0_1, %c0_2] : memref<64x16xbf16, #tpu.memory_space<vmem>>, vector<64x16xbf16>
    %cst = arith.constant dense<0.000000e+00> : vector<64x16xf32>
    %2 = tpu.matmul %0, %1, %cst {dimension_numbers = #tpu.dot_dimension_numbers<[1], [0], [0], [1], [0, 0, 1, 1], [], []>} : vector<64x64xbf16>, vector<64x16xbf16>, vector<64x16xf32> -> vector<64x16xf32>
    %c0_3 = arith.constant 0 : index
    %c0_4 = arith.constant 0 : index
    %3 = vector.load %arg4[%c0_3, %c0_4] : memref<1x16xf32, #tpu.memory_space<vmem>>, vector<1x16xf32>
    %4 = vector.broadcast %3 : vector<1x16xf32> to vector<64x16xf32>
    %5 = arith.addf %2, %4 : vector<64x16xf32>
    %6 = arith.truncf %5 : vector<64x16xf32> to vector<64x16xbf16>
    %c0_5 = arith.constant 0 : index
    %c0_6 = arith.constant 0 : index
    %7 = vector.load %arg5[%c0_5, %c0_6] : memref<64x16xbf16, #tpu.memory_space<vmem>>, vector<64x16xbf16>
    tpu.vector_store %arg5[%c0_5, %c0_6], %6 {strides = array<i32>} : memref<64x16xbf16, #tpu.memory_space<vmem>>, vector<64x16xbf16>,
    return
  }
  func.func @transform_0(%arg0: i32, %arg1: i32) -> (i32, i32) {
    %c0_i32 = arith.constant 0 : i32
    %c0_i32_0 = arith.constant 0 : i32
    return %arg0, %c0_i32 : i32, i32
  }
  func.func @transform_1(%arg0: i32, %arg1: i32) -> (i32, i32) {
    %c0_i32 = arith.constant 0 : i32
    %c0_i32_0 = arith.constant 0 : i32
    return %c0_i32, %arg1 : i32, i32
  }
  func.func @transform_2(%arg0: i32, %arg1: i32) -> (i32, i32) {
    %c0_i32 = arith.constant 0 : i32
    %c0_i32_0 = arith.constant 0 : i32
    return %c0_i32, %arg1 : i32, i32
  }
  func.func @transform_3(%arg0: i32, %arg1: i32) -> (i32, i32) {
    %c0_i32 = arith.constant 0 : i32
    return %arg0, %arg1 : i32, i32
  }
}

module attributes {stable_mosaic.version = 11 : i64} {
  func.func @_linear_kernel(%arg0: i32, %arg1: i32, %arg2: memref<64x16xbf16, #tpu.memory_space<vmem>>, %arg3: memref<16x100xbf16, #tpu.memory_space<vmem>>, %arg4: memref<1x100xf32, #tpu.memory_space<vmem>>, %arg5: memref<64x100xf32, #tpu.memory_space<vmem>>) attributes {dimension_semantics = [#tpu.dimension_semantics<parallel>, #tpu.dimension_semantics<parallel>], iteration_bounds = array<i64: 1, 1>, scalar_prefetch = 0 : i64, scratch_operands = 0 : i64, tpu.core_type = #tpu.core_type<tc>, window_params = [{transform_indices = @transform_0, window_bounds = array<i64: 64, 16>}, {transform_indices = @transform_1, window_bounds = array<i64: 16, 100>}, {transform_indices = @transform_2, window_bounds = array<i64: 1, 100>}, {transform_indices = @transform_3, window_bounds = array<i64: 64, 100>}]} {
    %c0 = arith.constant 0 : index
    %c0_0 = arith.constant 0 : index
    %0 = vector.load %arg2[%c0, %c0_0] : memref<64x16xbf16, #tpu.memory_space<vmem>>, vector<64x16xbf16>
    %c0_1 = arith.constant 0 : index
    %c0_2 = arith.constant 0 : index
    %1 = vector.load %arg3[%c0_1, %c0_2] : memref<16x100xbf16, #tpu.memory_space<vmem>>, vector<16x100xbf16>
    %cst = arith.constant dense<0.000000e+00> : vector<64x100xf32>
    %2 = tpu.matmul %0, %1, %cst {dimension_numbers = #tpu.dot_dimension_numbers<[1], [0], [0], [1], [0, 0, 1, 1], [], []>} : vector<64x16xbf16>, vector<16x100xbf16>, vector<64x100xf32> -> vector<64x100xf32>
    %c0_3 = arith.constant 0 : index
    %c0_4 = arith.constant 0 : index
    %3 = vector.load %arg4[%c0_3, %c0_4] : memref<1x100xf32, #tpu.memory_space<vmem>>, vector<1x100xf32>
    %4 = vector.broadcast %3 : vector<1x100xf32> to vector<64x100xf32>
    %5 = arith.addf %2, %4 : vector<64x100xf32>
    %c0_5 = arith.constant 0 : index
    %c0_6 = arith.constant 0 : index
    %6 = vector.load %arg5[%c0_5, %c0_6] : memref<64x100xf32, #tpu.memory_space<vmem>>, vector<64x100xf32>
    tpu.vector_store %arg5[%c0_5, %c0_6], %5 {strides = array<i32>} : memref<64x100xf32, #tpu.memory_space<vmem>>, vector<64x100xf32>,
    return
  }
  func.func @transform_0(%arg0: i32, %arg1: i32) -> (i32, i32) {
    %c0_i32 = arith.constant 0 : i32
    %c0_i32_0 = arith.constant 0 : i32
    return %arg0, %c0_i32 : i32, i32
  }
  func.func @transform_1(%arg0: i32, %arg1: i32) -> (i32, i32) {
    %c0_i32 = arith.constant 0 : i32
    %c0_i32_0 = arith.constant 0 : i32
    return %c0_i32, %arg1 : i32, i32
  }
  func.func @transform_2(%arg0: i32, %arg1: i32) -> (i32, i32) {
    %c0_i32 = arith.constant 0 : i32
    %c0_i32_0 = arith.constant 0 : i32
    return %c0_i32, %arg1 : i32, i32
  }
  func.func @transform_3(%arg0: i32, %arg1: i32) -> (i32, i32) {
    %c0_i32 = arith.constant 0 : i32
    return %arg0, %arg1 : i32, i32
  }
}

</mosaic_0001>

<bundles_post_ra>
// kernel: reformer_forward.13
= control target key start
LH: loop header
LB: loop body
LE: loop exit
PB: predicated region body
PF: predicated region fallthrough
CT: control target
= control target key end

     0   :  { %vm37_vm0 = vcmask 130048   ;;  %vm301_vm1 = vcmask 519168   ;;  %s537_s0 = inlined_call_operand.vmem [shape: bf16[64,16], index: 0, kind: input, shape index: {}]   ;;  %s538_s3 = inlined_call_operand.vmem [shape: bf16[16,64], index: 3, kind: input, shape index: {}]   ;;  %s539_s1 = inlined_call_operand.vmem [shape: f32[1,16], index: 1, kind: input, shape index: {}]   ;;  %s540_s2 = inlined_call_operand.vmem [shape: f32[1,16], index: 2, kind: input, shape index: {}]   ;;  %s541_s4 = inlined_call_operand.vmem [shape: f32[1,64], index: 4, kind: input, shape index: {}]   ;;  %s542_s5 = inlined_call_operand.vmem [shape: bf16[64,64], index: 5, kind: output, shape index: {}]  }
   0x1   :  { %v339_v0 = vld [vmem:[%s537_s0] sm:$0xff]   ;;  %v355_v1 = vld [vmem:[%s537_s0 + $0x10] sm:$0xff]   ;;  %v354_v6 = vld [vmem:[%s537_s0 + $0x8] sm:$0xff]  }
   0x2   :  { %v340_v2 = vunpack.c.l.bf16 %v339_v0  ;;  %v348_v3 = vunpack.c.l.bf16 %v355_v1  ;;  %v341_v4 = vunpack.c.h.bf16 %v339_v0  ;;  %v349_v5 = vunpack.c.h.bf16 %v355_v1  ;;  %v356_v13 = vld [vmem:[%s537_s0 + $0x18] sm:$0xff]   ;;  %v374_v60 = vld [vmem:[%s538_s3] sm:$0xff]  }
   0x3   :  { %v344_v11 = vunpack.c.l.bf16 %v354_v6  ;;  %v345_v12 = vunpack.c.h.bf16 %v354_v6  ;;  %v352_v16 = vunpack.c.l.bf16 %v356_v13  ;;  %v353_v17 = vunpack.c.h.bf16 %v356_v13  ;;  %362 = vmatprep.subr.bf16.mxu0 %v374_v60  ;;  %372 = vmatprep.subr.bf16.mxu1 %v374_v60 }
   0x4   :  { %v38_v7 = vsel %vm37_vm0, %v340_v2, 0.0  ;;  %v50_v8 = vsel %vm37_vm0, %v348_v3, 0.0  ;;  %v41_v9 = vsel %vm37_vm0, %v341_v4, 0.0  ;;  %v53_v10 = vsel %vm37_vm0, %v349_v5, 0.0  ;;  %363 = vmatpush3.bf16.msra.mxu0 %v374_v60  ;;  %373 = vmatpush3.bf16.msra.mxu1 %v374_v60 }
   0x5   :  { %39 = vadd.xlane.f32.xlu0 %v38_v7  ;;  %51 = vadd.xlane.f32.xlu1 %v50_v8  ;;  %v44_v14 = vsel %vm37_vm0, %v344_v11, 0.0  ;;  %v47_v15 = vsel %vm37_vm0, %v345_v12, 0.0  ;;  %v56_v18 = vsel %vm37_vm0, %v352_v16, 0.0  ;;  %v59_v19 = vsel %vm37_vm0, %v353_v17, 0.0 }
   0x9   :  { %42 = vadd.xlane.f32.xlu0 %v41_v9  ;;  %54 = vadd.xlane.f32.xlu1 %v53_v10 }
   0xd   :  { %45 = vadd.xlane.f32.xlu0 %v44_v14  ;;  %48 = vadd.xlane.f32.xlu1 %v47_v15 }
  0x11   :  { %57 = vadd.xlane.f32.xlu0 %v56_v18  ;;  %60 = vadd.xlane.f32.xlu1 %v59_v19 }
  0x8e   :  { %v40_v20 = vpop.xlane.xlu0 %39  ;;  %v52_v21 = vpop.xlane.xlu1 %51 }
  0x8f   :  { %v63_v22 = vmul.f32 0.0625, %v40_v20  ;;  %v67_v23 = vmul.f32 0.0625, %v52_v21 }
  0x91   :  { %v441_v24 = vsub.f32 %v340_v2, %v63_v22  ;;  %v443_v25 = vsub.f32 %v348_v3, %v67_v23  ;;  %v314_v23 = vld [vmem:[%s539_s1] ss:$0 sm:$0xff] }
  0x92   :  { %v43_v26 = vpop.xlane.xlu0 %42  ;;  %v55_v27 = vpop.xlane.xlu1 %54 }
  0x93   :  { %v64_v28 = vmul.f32 0.0625, %v43_v26  ;;  %v68_v29 = vmul.f32 0.0625, %v55_v27  ;;  %v79_v30 = vmul.f32 %v441_v24, %v441_v24  ;;  %v83_v31 = vmul.f32 %v443_v25, %v443_v25 }
  0x95   :  { %v449_v32 = vsub.f32 %v341_v4, %v64_v28  ;;  %v451_v33 = vsub.f32 %v349_v5, %v68_v29  ;;  %v87_v34 = vsel %vm37_vm0, %v79_v30, 0.0  ;;  %v99_v37 = vsel %vm37_vm0, %v83_v31, 0.0  ;;  %v315_v30 = vld [vmem:[%s540_s2] ss:$0 sm:$0xff] }
  0x96   :  { %88 = vadd.xlane.f32.xlu0 %v87_v34  ;;  %v46_v35 = vpop.xlane.xlu0 %45  ;;  %v49_v36 = vpop.xlane.xlu1 %48 }
  0x97   :  { %v65_v38 = vmul.f32 0.0625, %v46_v35  ;;  %v66_v39 = vmul.f32 0.0625, %v49_v36  ;;  %v80_v40 = vmul.f32 %v449_v32, %v449_v32  ;;  %v84_v41 = vmul.f32 %v451_v33, %v451_v33 }
  0x99   :  { %v459_v42 = vsub.f32 %v344_v11, %v65_v38  ;;  %v461_v43 = vsub.f32 %v345_v12, %v66_v39  ;;  %v90_v44 = vsel %vm37_vm0, %v80_v40, 0.0  ;;  %v102_v47 = vsel %vm37_vm0, %v84_v41, 0.0 }
  0x9a   :  { %100 = vadd.xlane.f32.xlu0 %v99_v37  ;;  %91 = vadd.xlane.f32.xlu1 %v90_v44  ;;  %v58_v45 = vpop.xlane.xlu0 %57  ;;  %v61_v46 = vpop.xlane.xlu1 %60 }
  0x9b   :  { %v69_v48 = vmul.f32 0.0625, %v58_v45  ;;  %v70_v49 = vmul.f32 0.0625, %v61_v46  ;;  %v81_v50 = vmul.f32 %v459_v42, %v459_v42  ;;  %v82_v51 = vmul.f32 %v461_v43, %v461_v43 }
  0x9d   :  { %v469_v52 = vsub.f32 %v352_v16, %v69_v48  ;;  %v471_v53 = vsub.f32 %v353_v17, %v70_v49  ;;  %v93_v54 = vsel %vm37_vm0, %v81_v50, 0.0  ;;  %v96_v55 = vsel %vm37_vm0, %v82_v51, 0.0 }
  0x9e   :  { %103 = vadd.xlane.f32.xlu1 %v102_v47  ;;  %94 = vadd.xlane.f32.xlu0 %v93_v54 }
  0x9f   :  { %v85_v56 = vmul.f32 %v469_v52, %v469_v52  ;;  %v86_v57 = vmul.f32 %v471_v53, %v471_v53 }
  0xa1   :  { %v105_v58 = vsel %vm37_vm0, %v85_v56, 0.0  ;;  %v108_v59 = vsel %vm37_vm0, %v86_v57, 0.0 }
  0xa2   :  { %97 = vadd.xlane.f32.xlu1 %v96_v55  ;;  %106 = vadd.xlane.f32.xlu0 %v105_v58 }
  0xa6   :  { %109 = vadd.xlane.f32.xlu1 %v108_v59 }
 0x11f   :  { %v89_v61 = vpop.xlane.xlu0 %88 }
 0x120   :  { %v111_v62 = vmul.f32 0.0625, %v89_v61 }
 0x122   :  { %v119_v63 = vadd.f32 1e-05, %v111_v62 }
 0x123   :  { %v92_v0 = vpop.xlane.xlu1 %91  ;;  %v101_v1 = vpop.xlane.xlu0 %100 }
 0x124   :  { %375 = vrsqrt.f32 %v119_v63  ;;  %v112_v2 = vmul.f32 0.0625, %v92_v0  ;;  %v115_v3 = vmul.f32 0.0625, %v101_v1 }
 0x126   :  { %v120_v4 = vadd.f32 1e-05, %v112_v2  ;;  %v123_v5 = vadd.f32 1e-05, %v115_v3 }
 0x127   :  { %v104_v6 = vpop.xlane.xlu1 %103  ;;  %v95_v7 = vpop.xlane.xlu0 %94 }
 0x128   :  { %377 = vrsqrt.f32 %v120_v4  ;;  %v116_v8 = vmul.f32 0.0625, %v104_v6  ;;  %v113_v9 = vmul.f32 0.0625, %v95_v7 }
 0x129   :  { %379 = vrsqrt.f32 %v123_v5 }
 0x12a   :  { %v124_v10 = vadd.f32 1e-05, %v116_v8  ;;  %v121_v11 = vadd.f32 1e-05, %v113_v9 }
 0x12b   :  { %v98_v12 = vpop.xlane.xlu1 %97  ;;  %v107_v13 = vpop.xlane.xlu0 %106 }
 0x12c   :  { %381 = vrsqrt.f32 %v124_v10  ;;  %v114_v14 = vmul.f32 0.0625, %v98_v12  ;;  %v117_v15 = vmul.f32 0.0625, %v107_v13 }
 0x12d   :  { %383 = vrsqrt.f32 %v121_v11 }
 0x12e   :  { %v122_v16 = vadd.f32 1e-05, %v114_v14  ;;  %v125_v17 = vadd.f32 1e-05, %v117_v15 }
 0x12f   :  { %v110_v18 = vpop.xlane.xlu1 %109 }
 0x130   :  { %385 = vrsqrt.f32 %v122_v16  ;;  %v118_v19 = vmul.f32 0.0625, %v110_v18 }
 0x131   :  { %v376_v20 = vpop.eup %375  ;;  %387 = vrsqrt.f32 %v125_v17 }
 0x132   :  { %v126_v21 = vadd.f32 1e-05, %v118_v19  ;;  %v135_v22 = vmul.f32 %v376_v20, %v441_v24 }
 0x134   :  { %389 = vrsqrt.f32 %v126_v21  ;;  %v150_v29 = vmul.f32 %v314_v23, %v135_v22 }
 0x135   :  { %v378_v26 = vpop.eup %377 }
 0x136   :  { %v380_v27 = vpop.eup %379  ;;  %v136_v28 = vmul.f32 %v378_v26, %v449_v32  ;;  %v165_v24 = vadd.f32 %v315_v30, %v150_v29 }
 0x137   :  { %v139_v31 = vmul.f32 %v380_v27, %v443_v25 }
 0x138   :  { %v151_v34 = vmul.f32 %v314_v23, %v136_v28 }
 0x139   :  { %v382_v35 = vpop.eup %381  ;;  %v154_v39 = vmul.f32 %v314_v23, %v139_v31 }
 0x13a   :  { %v384_v36 = vpop.eup %383  ;;  %v166_v37 = vadd.f32 %v315_v30, %v151_v34  ;;  %v140_v38 = vmul.f32 %v382_v35, %v451_v33 }
 0x13b   :  { %v137_v40 = vmul.f32 %v384_v36, %v459_v42  ;;  %v169_v46 = vadd.f32 %v315_v30, %v154_v39 }
 0x13c   :  { %v173_v41 = vpack.c.bf16 %v166_v37, %v165_v24  ;;  %v155_v44 = vmul.f32 %v314_v23, %v140_v38 }
 0x13d   :  { %v386_v32 = vpop.eup %385  ;;  %v152_v48 = vmul.f32 %v314_v23, %v137_v40 }
 0x13e   :  { %v388_v45 = vpop.eup %387  ;;  %364 = vmatprep.mubr.msk.bf16.mxu0 %vm37_vm0, %v173_v41  ;;  %v170_v47 = vadd.f32 %v315_v30, %v155_v44  ;;  %v138_v25 = vmul.f32 %v386_v32, %v461_v43 }
 0x13f   :  { %v141_v49 = vmul.f32 %v388_v45, %v469_v52  ;;  %v167_v33 = vadd.f32 %v315_v30, %v152_v48  ;;  %v316_v52 = vld [vmem:[%s541_s4] ss:$0 sm:$0xff] }
 0x140   :  { %v175_v50 = vpack.c.bf16 %v170_v47, %v169_v46  ;;  %v153_v51 = vmul.f32 %v314_v23, %v138_v25 }
 0x141   :  { %v390_v54 = vpop.eup %389  ;;  %v156_v56 = vmul.f32 %v314_v23, %v141_v49 }
 0x142   :  { %368 = vmatprep.mubr.msk.bf16.mxu1 %vm37_vm0, %v175_v50  ;;  %v168_v42 = vadd.f32 %v315_v30, %v153_v51  ;;  %v142_v55 = vmul.f32 %v390_v54, %v471_v53 }
 0x143   :  { %v171_v59 = vadd.f32 %v315_v30, %v156_v56 }
 0x144   :  { %v174_v57 = vpack.c.bf16 %v168_v42, %v167_v33  ;;  %v157_v58 = vmul.f32 %v314_v23, %v142_v55 }
 0x146   :  { %365 = vmatmul.mubr.msk.bf16.vlgmr.msra.gmra.mxu0 %vm37_vm0, %v174_v57  ;;  %v172_v60 = vadd.f32 %v315_v30, %v157_v58 }
 0x148   :  { %v176_v43 = vpack.c.bf16 %v172_v60, %v171_v59 }
 0x14a   :  { %369 = vmatmul.mubr.msk.bf16.vlgmr.msra.gmra.mxu1 %vm37_vm0, %v176_v43 }
 0x206   :  { %v366_v61 = vpop.f32.mrf.mxu0 }
 0x207   :  { %v247_v62 = vadd.f32 %v366_v61, %v316_v52 }
 0x208   :  { %v238_v63 = vpop.f32.mrf.mxu0 }
 0x209   :  { %v332_v0 = vpack.c.bf16 %v247_v62, %v247_v62  ;;  %v239_v53 = vadd.f32 %v316_v52, %v238_v63 }
 0x20a   :  { %v367_v1 = vpop.f32.mrf.mxu0  ;;  %v370_v2 = vpop.f32.mrf.mxu1 }
 0x20b   :  { %304 = vst.msk [vmem:[%s542_s5 + $0x8] sm:$0xf] %vm301_vm1, %v332_v0  ;;  %v330_v3 = vpack.c.bf16 %v239_v53, %v239_v53  ;;  %v250_v4 = vadd.f32 %v367_v1, %v316_v52  ;;  %v263_v5 = vadd.f32 %v370_v2, %v316_v52 }
 0x20c   :  { %v241_v6 = vpop.f32.mrf.mxu0  ;;  %v254_v7 = vpop.f32.mrf.mxu1 }
 0x20d   :  { %302 = vst.msk [vmem:[%s542_s5] sm:$0xf] %vm301_vm1, %v330_v3  ;;  %v333_v8 = vpack.c.bf16 %v250_v4, %v250_v4  ;;  %v336_v9 = vpack.c.bf16 %v263_v5, %v263_v5  ;;  %v242_v10 = vadd.f32 %v316_v52, %v241_v6  ;;  %v255_v11 = vadd.f32 %v316_v52, %v254_v7 }
 0x20e   :  { %v371_v12 = vpop.f32.mrf.mxu1 }
 0x20f   :  { %305 = vst.msk [vmem:[%s542_s5 + $0xc] sm:$0xf] %vm301_vm1, %v333_v8  ;;  %308 = vst.msk [vmem:[%s542_s5 + $0x18] sm:$0xf] %vm301_vm1, %v336_v9  ;;  %v331_v13 = vpack.c.bf16 %v242_v10, %v242_v10  ;;  %v334_v14 = vpack.c.bf16 %v255_v11, %v255_v11  ;;  %v266_v15 = vadd.f32 %v371_v12, %v316_v52 }
 0x210   :  { %v257_v16 = vpop.f32.mrf.mxu1 }
 0x211   :  { %303 = vst.msk [vmem:[%s542_s5 + $0x4] sm:$0xf] %vm301_vm1, %v331_v13  ;;  %306 = vst.msk [vmem:[%s542_s5 + $0x10] sm:$0xf] %vm301_vm1, %v334_v14  ;;  %v337_v17 = vpack.c.bf16 %v266_v15, %v266_v15  ;;  %v258_v18 = vadd.f32 %v316_v52, %v257_v16 }
 0x213   :  { %309 = vst.msk [vmem:[%s542_s5 + $0x1c] sm:$0xf] %vm301_vm1, %v337_v17  ;;  %v335_v19 = vpack.c.bf16 %v258_v18, %v258_v18 }
 0x215   :  { %307 = vst.msk [vmem:[%s542_s5 + $0x14] sm:$0xf] %vm301_vm1, %v335_v19 }

// kernel: reformer_forward.14
= control target key start
LH: loop header
LB: loop body
LE: loop exit
PB: predicated region body
PF: predicated region fallthrough
CT: control target
= control target key end

     0   :  { %vm86_vm0 = vcmask 130048   ;;  %vm208_vm1 = vcmask 31744   ;;  %s407_s1 = inlined_call_operand.vmem [shape: bf16[16,4], index: 1, kind: input, shape index: {}]   ;;  %s408_s0 = inlined_call_operand.vmem [shape: bf16[128,16], index: 0, kind: input, shape index: {}]   ;;  %s409_s2 = inlined_call_operand.vmem [shape: f32[1,4], index: 2, kind: input, shape index: {}]   ;;  %s410_s3 = inlined_call_operand.vmem [shape: f32[128,4], index: 3, kind: output, shape index: {}]  }
   0x1   :  { %v276_v0 = vld [vmem:[%s407_s1] sm:$0xff]   ;;  %v279_v3 = vld [vmem:[%s408_s0 + $0x8] sm:$0xff]   ;;  %v281_v5 = vld [vmem:[%s408_s0 + $0x10] sm:$0xff]  }
   0x2   :  { %v277_v1 = vld [vmem:[%s408_s0] sm:$0xff]   ;;  %256 = vmatprep.subr.bf16.mxu0 %v276_v0  ;;  %274 = vmatprep.subr.bf16.mxu1 %v276_v0  ;;  %v280_v4 = vld [vmem:[%s408_s0 + $0x28] sm:$0xff]   ;;  %v282_v6 = vld [vmem:[%s408_s0 + $0x30] sm:$0xff]  }
   0x3   :  { %v278_v2 = vld [vmem:[%s408_s0 + $0x20] sm:$0xff]   ;;  %257 = vmatpush3.bf16.msra.mxu0 %v276_v0  ;;  %275 = vmatpush3.bf16.msra.mxu1 %v276_v0  ;;  %v283_v7 = vld [vmem:[%s408_s0 + $0x18] sm:$0xff]  }
   0x4   :  { %258 = vmatprep.mubr.msk.bf16.mxu0 %vm86_vm0, %v277_v1  ;;  %266 = vmatprep.mubr.msk.bf16.mxu1 %vm86_vm0, %v278_v2  ;;  %v284_v8 = vld [vmem:[%s408_s0 + $0x38] sm:$0xff]   ;;  %v229_v9 = vld [vmem:[%s409_s2] ss:$0 sm:$0xff] }
   0x6   :  { %259 = vmatmul.mubr.msk.bf16.vlgmr.msra.gmra.mxu0 %vm86_vm0, %v279_v3  ;;  %267 = vmatmul.mubr.msk.bf16.vlgmr.msra.gmra.mxu1 %vm86_vm0, %v280_v4 }
   0x7   :  { %262 = vmatprep.mubr.msk.bf16.mxu0 %vm86_vm0, %v281_v5  ;;  %270 = vmatprep.mubr.msk.bf16.mxu1 %vm86_vm0, %v282_v6 }
   0xe   :  { %263 = vmatmul.mubr.msk.bf16.gmra.mxu0 %vm86_vm0, %v283_v7  ;;  %271 = vmatmul.mubr.msk.bf16.gmra.mxu1 %vm86_vm0, %v284_v8 }
  0xc6   :  { %v260_v10 = vpop.f32.mrf.mxu0  ;;  %v268_v11 = vpop.f32.mrf.mxu1 }
  0xc7   :  { %v154_v12 = vadd.f32 %v260_v10, %v229_v9  ;;  %v186_v13 = vadd.f32 %v268_v11, %v229_v9 }
  0xc8   :  { %v145_v14 = vpop.f32.mrf.mxu0  ;;  %v177_v15 = vpop.f32.mrf.mxu1 }
  0xc9   :  { %211 = vst.msk [vmem:[%s410_s3 + $0x10] sm:$0xff] %vm208_vm1, %v154_v12  ;;  %219 = vst.msk [vmem:[%s410_s3 + $0x50] sm:$0xff] %vm208_vm1, %v186_v13  ;;  %v146_v16 = vadd.f32 %v229_v9, %v145_v14  ;;  %v178_v17 = vadd.f32 %v229_v9, %v177_v15 }
  0xca   :  { %v261_v18 = vpop.f32.mrf.mxu0  ;;  %v269_v19 = vpop.f32.mrf.mxu1 }
  0xcb   :  { %209 = vst.msk [vmem:[%s410_s3] sm:$0xff] %vm208_vm1, %v146_v16  ;;  %217 = vst.msk [vmem:[%s410_s3 + $0x40] sm:$0xff] %vm208_vm1, %v178_v17  ;;  %v157_v20 = vadd.f32 %v261_v18, %v229_v9  ;;  %v189_v21 = vadd.f32 %v269_v19, %v229_v9 }
  0xcc   :  { %v148_v22 = vpop.f32.mrf.mxu0  ;;  %v180_v23 = vpop.f32.mrf.mxu1 }
  0xcd   :  { %212 = vst.msk [vmem:[%s410_s3 + $0x18] sm:$0xff] %vm208_vm1, %v157_v20  ;;  %220 = vst.msk [vmem:[%s410_s3 + $0x58] sm:$0xff] %vm208_vm1, %v189_v21  ;;  %v149_v24 = vadd.f32 %v229_v9, %v148_v22  ;;  %v181_v25 = vadd.f32 %v229_v9, %v180_v23 }
  0xce   :  { %v264_v26 = vpop.f32.mrf.mxu0  ;;  %v272_v27 = vpop.f32.mrf.mxu1 }
  0xcf   :  { %210 = vst.msk [vmem:[%s410_s3 + $0x8] sm:$0xff] %vm208_vm1, %v149_v24  ;;  %218 = vst.msk [vmem:[%s410_s3 + $0x48] sm:$0xff] %vm208_vm1, %v181_v25  ;;  %v170_v28 = vadd.f32 %v264_v26, %v229_v9  ;;  %v202_v29 = vadd.f32 %v272_v27, %v229_v9 }
  0xd0   :  { %v161_v30 = vpop.f32.mrf.mxu0  ;;  %v193_v31 = vpop.f32.mrf.mxu1 }
  0xd1   :  { %215 = vst.msk [vmem:[%s410_s3 + $0x30] sm:$0xff] %vm208_vm1, %v170_v28  ;;  %223 = vst.msk [vmem:[%s410_s3 + $0x70] sm:$0xff] %vm208_vm1, %v202_v29  ;;  %v162_v32 = vadd.f32 %v229_v9, %v161_v30  ;;  %v194_v33 = vadd.f32 %v229_v9, %v193_v31 }
  0xd2   :  { %v265_v34 = vpop.f32.mrf.mxu0  ;;  %v273_v35 = vpop.f32.mrf.mxu1 }
  0xd3   :  { %213 = vst.msk [vmem:[%s410_s3 + $0x20] sm:$0xff] %vm208_vm1, %v162_v32  ;;  %221 = vst.msk [vmem:[%s410_s3 + $0x60] sm:$0xff] %vm208_vm1, %v194_v33  ;;  %v173_v36 = vadd.f32 %v265_v34, %v229_v9  ;;  %v205_v37 = vadd.f32 %v273_v35, %v229_v9 }
  0xd4   :  { %v164_v38 = vpop.f32.mrf.mxu0  ;;  %v196_v39 = vpop.f32.mrf.mxu1 }
  0xd5   :  { %216 = vst.msk [vmem:[%s410_s3 + $0x38] sm:$0xff] %vm208_vm1, %v173_v36  ;;  %224 = vst.msk [vmem:[%s410_s3 + $0x78] sm:$0xff] %vm208_vm1, %v205_v37  ;;  %v165_v40 = vadd.f32 %v229_v9, %v164_v38  ;;  %v197_v41 = vadd.f32 %v229_v9, %v196_v39 }
  0xd7   :  { %214 = vst.msk [vmem:[%s410_s3 + $0x28] sm:$0xff] %vm208_vm1, %v165_v40  ;;  %222 = vst.msk [vmem:[%s410_s3 + $0x68] sm:$0xff] %vm208_vm1, %v197_v41 }

// kernel: reformer_forward.15
= control target key start
LH: loop header
LB: loop body
LE: loop exit
PB: predicated region body
PF: predicated region fallthrough
CT: control target
= control target key end

     0   :  { %s4323_s17 = smov 0   ;;  %s4325_s18 = smov 0   ;;  %s5373_s0 = inlined_call_operand.vmem [shape: bf16[4,8,8,16], index: 0, kind: input, shape index: {}, may-alias: {0,1}]   ;;  %s5374_s1 = inlined_call_operand.vmem [shape: bf16[4,8,8,16], index: 1, kind: input, shape index: {}, may-alias: {0,1}]   ;;  %s5375_s2 = inlined_call_operand.vmem [shape: bf16[4,8,8,16], index: 2, kind: input, shape index: {}, may-alias: {2,3}]   ;;  %s5376_s3 = inlined_call_operand.vmem [shape: bf16[4,8,8,16], index: 3, kind: input, shape index: {}, may-alias: {2,3}]   ;;  %s5377_s4 = inlined_call_operand.vmem [shape: s32[4,8,1,8], index: 4, kind: input, shape index: {}, may-alias: {4,5}]   ;;  %s5378_s5 = inlined_call_operand.vmem [shape: s32[4,8,1,8], index: 5, kind: input, shape index: {}, may-alias: {4,5}]   ;;  %s5379_s6 = inlined_call_operand.vmem [shape: s32[4,8,1,8], index: 6, kind: input, shape index: {}, may-alias: {6,7}]   ;;  %s5380_s7 = inlined_call_operand.vmem [shape: s32[4,8,1,8], index: 7, kind: input, shape index: {}, may-alias: {6,7}]   ;;  %s5381_s8 = inlined_call_operand.vmem [shape: s32[4,8,4,8], index: 8, kind: input, shape index: {}, may-alias: {8,9}]   ;;  %s5382_s9 = inlined_call_operand.vmem [shape: s32[4,8,4,8], index: 9, kind: input, shape index: {}, may-alias: {8,9}]   ;;  %s5383_s10 = inlined_call_operand.vmem [shape: bf16[4,8,8,16], index: 10, kind: output, shape index: {0}]   ;;  %s5384_s11 = inlined_call_operand.vmem [shape: f32[4,8,1,8], index: 11, kind: output, shape index: {1}]  }
   0x1   :  { %s4327_s19 = smov 0  }
   0x2 LB: > { %s34_s20 = sadd.s32 1, %s4253_s18  ;;  %p3810_p0 = scmp.ge.s32.totalorder %s4257_s19, 1  ;;  %s4257_s19 = sphi %s4327_s19, %s22_s19   ;;  %s4253_s18 = sphi %s4325_s18, %s5390_s18   ;;  %s4249_s17 = sphi %s4323_s17, %s5389_s17  }
   0x3   : > { %p36_p1 = scmp.ge.s32.totalorder %s34_s20, 4  ;;  %p782_p2 = scmp.lt.s32.totalorder %s4257_s19, 5 }
   0x5   : > { %s5392_s20 = smov (%p36_p1, %s34_s20), 0  ;;  %p783_p3 = pnand %p3810_p0, %p782_p2 }
   0x6   : > { %p981_p4 = scmp.lt.s32.totalorder (!%p783_p3), %s4249_s17, 3  ;;  %s4259_s16 = smov (!%p783_p3), 8  }
   0x7   : > { %786 = sbr.rel (%p783_p3) target bundleno = 952 (0x3b8), region = 60 }
   0xc   : > { %s5394_s17 = smov (!%p981_p4, %s4249_s17), 3  ;;  %vm1268_vm0 = vcmask 1043456   ;;  %vm1333_vm1 = vcmask 130048   ;;  %vm2032_vm2 = vcmask 1040384   ;;  %vm4262_vm3 = vmmov 0  }
   0xd   : > { %s4344_s21 = sshll.u32 %s5394_s17, 5  ;;  %s4517_s22 = sshll.u32 %s5394_s17, 3 }
   0xe   : > { %s4350_s24 = scalar_lea.vmem %s5373_s0, %s4344_s21  ;;  %s4353_s25 = sadd.s32 28, %s4344_s21 }
   0xf   : > { %v4356_v0 = vld [vmem:[%s4350_s24] sm:$0xf]  ;;  %v4359_v1 = vld [vmem:[%s4350_s24 + $0x4] sm:$0xf]  ;;  %s1011_s28 = scalar_lea.vmem %s5374_s1, %s4353_s25  ;;  %v4366_v2 = vld [vmem:[%s4350_s24 + $0x8] sm:$0xf]  ;;  %s4500_s12 = scalar_lea.vmem %s5381_s8, %s4344_s21 }
  0x10   : > { %v3831_v3 = vcombine.low %v4356_v0, %v4356_v0  ;;  %v3832_v4 = vcombine.low %v4359_v1, %v4359_v1  ;;  %v4083_v5 = vld [vmem:[%s1011_s28] ss:$0 sps:$4 sm:$0xff]   ;;  %v3833_v6 = vcombine.low %v4366_v2, %v4366_v2  ;;  %v4375_v7 = vld [vmem:[%s4350_s24 + $0xc] sm:$0xf]  ;;  %v4410_v25 = vld [vmem:[%s4350_s24 + $0x10] sm:$0xf]  ;;  %s1191_s15 = scalar_lea.vmem %s5382_s9, %s4353_s25  ;;  %s4523_s26 = scalar_lea.vmem %s5377_s4, %s4517_s22 }
  0x11   : > { %v1271_v9 = vsel %vm1268_vm0, %v4356_v0, %v4083_v5  ;;  %v3834_v22 = vcombine.low %v4375_v7, %v4375_v7  ;;  %v3835_v33 = vcombine.low %v4410_v25, %v4410_v25  ;;  %v4427_v34 = vld [vmem:[%s4350_s24 + $0x14] sm:$0xf]  ;;  %v4442_v42 = vld [vmem:[%s4350_s24 + $0x18] sm:$0xf]  ;;  %v4461_v52 = vld [vmem:[%s4350_s24 + $0x1c] sm:$0xf]  ;;  %s4538_s28 = scalar_lea.vmem %s5379_s6, %s4517_s22  ;;  %s5271_s30 = scalar_lea.vmem %s5384_s11, %s4517_s22 }
  0x12   : > { %v1275_v8 = vsel %vm1268_vm0, %v4359_v1, %v3831_v3  ;;  %v1279_v10 = vsel %vm1268_vm0, %v4366_v2, %v3832_v4  ;;  %v4385_v12 = vunpack.c.l.bf16 %v1271_v9  ;;  %v4389_v14 = vunpack.c.h.bf16 %v1271_v9  ;;  %s1100_s29 = sadd.s32 7, %s4517_s22 }
  0x13   : > { %v4383_v11 = vunpack.c.l.bf16 %v1275_v8  ;;  %v4387_v13 = vunpack.c.h.bf16 %v1275_v8  ;;  %v4391_v15 = vunpack.c.h.bf16 %v1279_v10  ;;  %v4393_v16 = vunpack.c.l.bf16 %v1279_v10  ;;  %s1101_s14 = scalar_lea.vmem %s5378_s5, %s1100_s29  ;;  %s1145_s24 = scalar_lea.vmem %s5380_s7, %s1100_s29 }
  0x14   : > { %v1283_v17 = vsel %vm1268_vm0, %v4375_v7, %v3833_v6  ;;  %v1317_v19 = vmul.f32 %v4385_v12, %v4385_v12  ;;  %v1318_v21 = vmul.f32 %v4389_v14, %v4389_v14  ;;  %v1287_v32 = vsel %vm1268_vm0, %v4410_v25, %v3834_v22 }
  0x15   : > { %v1319_v18 = vmul.f32 %v4383_v11, %v4383_v11  ;;  %v1320_v20 = vmul.f32 %v4387_v13, %v4387_v13  ;;  %v4412_v26 = vunpack.c.h.bf16 %v1283_v17  ;;  %v4414_v27 = vunpack.c.l.bf16 %v1283_v17 }
  0x16   : > { %v1334_v24 = vsel %vm1333_vm1, %v1317_v19, 0.0  ;;  %v1337_v29 = vsel %vm1333_vm1, %v1318_v21, 0.0  ;;  %v1322_v30 = vmul.f32 %v4391_v15, %v4391_v15  ;;  %v1321_v31 = vmul.f32 %v4393_v16, %v4393_v16  ;;  %v2544_v21 = vld [vmem:[%s4500_s12] sm:$0xf] }
  0x17   : > { %v1340_v23 = vsel %vm1333_vm1, %v1319_v18, 0.0  ;;  %1335 = vadd.xlane.f32.xlu0 %v1334_v24  ;;  %v1343_v28 = vsel %vm1333_vm1, %v1320_v20, 0.0  ;;  %v1324_v35 = vmul.f32 %v4412_v26, %v4412_v26  ;;  %v1323_v36 = vmul.f32 %v4414_v27, %v4414_v27 }
  0x18   : > { %1341 = vadd.xlane.f32.xlu1 %v1340_v23  ;;  %v3836_v37 = vcombine.low %v4427_v34, %v4427_v34  ;;  %v1349_v38 = vsel %vm1333_vm1, %v1322_v30, 0.0  ;;  %v1346_v39 = vsel %vm1333_vm1, %v1321_v31, 0.0  ;;  %v4437_v40 = vunpack.c.h.bf16 %v1287_v32  ;;  %v2545_v23 = vld [vmem:[%s4500_s12 + $0x4] sm:$0xf]  ;;  %v2552_v30 = vld [vmem:[%s1191_s15] sm:$0xf] }
  0x19   : > { %v4439_v41 = vunpack.c.l.bf16 %v1287_v32  ;;  %v1291_v43 = vsel %vm1268_vm0, %v4427_v34, %v3835_v33  ;;  %v1355_v44 = vsel %vm1333_vm1, %v1324_v35, 0.0  ;;  %v1352_v45 = vsel %vm1333_vm1, %v1323_v36, 0.0  ;;  %v4527_v33 = vld [vmem:[%s4523_s26] sm:$0x1]  ;;  %v4530_v35 = vld [vmem:[%s4523_s26 + $0x1] sm:$0x1] }
  0x1a   : > { %v1295_v46 = vsel %vm1268_vm0, %v4442_v42, %v3836_v37  ;;  %v3837_v47 = vcombine.low %v4442_v42, %v4442_v42  ;;  %v1326_v48 = vmul.f32 %v4437_v40, %v4437_v40  ;;  %v4456_v50 = vunpack.c.h.bf16 %v1291_v43  ;;  %v4541_v37 = vld [vmem:[%s4523_s26 + $0x2] sm:$0x1] }
  0x1b   : > { %1338 = vadd.xlane.f32.xlu0 %v1337_v29  ;;  %v1325_v49 = vmul.f32 %v4439_v41, %v4439_v41  ;;  %v4458_v51 = vunpack.c.l.bf16 %v1291_v43  ;;  %v4463_v53 = vunpack.c.h.bf16 %v1295_v46  ;;  %v4465_v54 = vunpack.c.l.bf16 %v1295_v46  ;;  %v4558_v46 = vld [vmem:[%s4523_s26 + $0x6] sm:$0x1] }
  0x1c   : > { %1344 = vadd.xlane.f32.xlu1 %v1343_v28  ;;  %v1299_v55 = vsel %vm1268_vm0, %v4461_v52, %v3837_v47  ;;  %v1361_v56 = vsel %vm1333_vm1, %v1326_v48, 0.0  ;;  %v1328_v58 = vmul.f32 %v4456_v50, %v4456_v50  ;;  %v5385_v18 = vlaneseq }
  0x1d   : > { %v1358_v57 = vsel %vm1333_vm1, %v1325_v49, 0.0  ;;  %v1327_v59 = vmul.f32 %v4458_v51, %v4458_v51  ;;  %v4475_v60 = vunpack.c.h.bf16 %v1299_v55  ;;  %v4477_v61 = vunpack.c.l.bf16 %v1299_v55 }
  0x1e   : > { %v1367_v62 = vsel %vm1333_vm1, %v1328_v58, 0.0  ;;  %v1330_v3 = vmul.f32 %v4463_v53, %v4463_v53  ;;  %v1329_v4 = vmul.f32 %v4465_v54, %v4465_v54  ;;  %v4494_v19 = vshrl.u32 %v5385_v18, 7 }
  0x1f   : > { %1347 = vadd.xlane.f32.xlu0 %v1346_v39  ;;  %v1364_v63 = vsel %vm1333_vm1, %v1327_v59, 0.0  ;;  %v1332_v8 = vmul.f32 %v4475_v60, %v4475_v60  ;;  %v1331_v9 = vmul.f32 %v4477_v61, %v4477_v61  ;;  %v4260_v28 = vmov 1966171168  }
  0x20   : > { %1350 = vadd.xlane.f32.xlu1 %v1349_v38  ;;  %v1373_v5 = vsel %vm1333_vm1, %v1330_v3, 0.0  ;;  %v1370_v6 = vsel %vm1333_vm1, %v1329_v4, 0.0  ;;  %v4503_v20 = vsub.s32 0, %v4494_v19  ;;  %v4514_v24 = vsub.s32 1, %v4494_v19  ;;  %v4544_v38 = vld [vmem:[%s4523_s26 + $0x3] sm:$0x1] }
  0x21   : > { %v1379_v10 = vsel %vm1333_vm1, %v1332_v8, 0.0  ;;  %v1376_v17 = vsel %vm1333_vm1, %v1331_v9, 0.0  ;;  %v1988_v29 = vunpack.c.l.s4 %v4260_v28  ;;  %v1983_v39 = vcombine.low %v4527_v33, %v4527_v33  ;;  %v4589_v8 = vld [vmem:[%s4538_s28 + $0x5] sm:$0x1] }
  0x22   : > { %v2580_v22 = vrot.slane %v2544_v21, %v4503_v20  ;;  %v2587_v32 = vrot.slane %v2545_v23, %v4503_v20  ;;  %v2700_v36 = vrot.slane %v2544_v21, %v4514_v24  ;;  %v1984_v47 = vcombine.low %v4530_v35, %v4541_v37 }
  0x23   : > { %1353 = vadd.xlane.f32.xlu0 %v1352_v45  ;;  %v1989_v31 = vunpack.c.0.s8 %v1988_v29  ;;  %v4555_v45 = vld [vmem:[%s4523_s26 + $0x5] sm:$0x1]  ;;  %v2707_v58 = vrot.slane %v2545_v23, %v4514_v24 }
  0x24   : > { %1356 = vadd.xlane.f32.xlu1 %v1355_v44  ;;  %v4552_v44 = vld [vmem:[%s4523_s26 + $0x4] sm:$0x1]  ;;  %v1986_v49 = vcombine.low %v4555_v45, %v4558_v46 }
  0x25   : > { %v4549_v43 = vsub.s32 %v1989_v31, %v4494_v19  ;;  %v1985_v48 = vcombine.low %v4544_v38, %v4552_v44 }
  0x27   : > { %1359 = vadd.xlane.f32.xlu0 %v1358_v57  ;;  %v1993_v55 = vrot.slane %v1983_v39, %v4549_v43  ;;  %v4571_v57 = vld [vmem:[%s4538_s28 + $0x1] sm:$0x1]  ;;  %v2000_v59 = vrot.slane %v1984_v47, %v4549_v43  ;;  %v2007_v4 = vrot.slane %v1985_v48, %v4549_v43  ;;  %v2547_v39 = vld [vmem:[%s4500_s12 + $0xc] sm:$0xf]  ;;  %v4261_v47 = vmov 0.0  }
  0x28   : > { %1362 = vadd.xlane.f32.xlu1 %v1361_v56  ;;  %v4568_v56 = vld [vmem:[%s4538_s28] sm:$0x1]  ;;  %3963 = vmatprep.subr.bf16.mxu1 %v4261_v47 }
  0x29   : > { %v2096_v3 = vcombine.low %v4568_v56, %v4568_v56  ;;  %3957 = vmatprep.subr.bf16.mxu0 %v4261_v47  ;;  %3965 = vmatprep.mubr.msk.bf16.mxu1 %vm4262_vm3, %v4261_v47 }
  0x2a   : > { %3959 = vmatprep.mubr.msk.bf16.mxu0 %vm4262_vm3, %v4261_v47 }
  0x2b   : > { %1365 = vadd.xlane.f32.xlu0 %v1364_v63  ;;  %v4579_v63 = vld [vmem:[%s4538_s28 + $0x3] sm:$0x1]  ;;  %v2106_v28 = vrot.slane %v2096_v3, %v4549_v43 }
  0x2c   : > { %1368 = vadd.xlane.f32.xlu1 %v1367_v62  ;;  %v4576_v62 = vld [vmem:[%s4538_s28 + $0x2] sm:$0x1] }
  0x2d   : > { %v2097_v9 = vcombine.low %v4571_v57, %v4576_v62 }
  0x2f   : > { %1371 = vadd.xlane.f32.xlu0 %v1370_v6  ;;  %v4586_v6 = vld [vmem:[%s4538_s28 + $0x4] sm:$0x1]  ;;  %v2113_v31 = vrot.slane %v2097_v9, %v4549_v43 }
  0x30   : > { %1374 = vadd.xlane.f32.xlu1 %v1373_v5  ;;  %v2014_v5 = vrot.slane %v1986_v49, %v4549_v43 }
  0x31   : > { %v2128_v49 = vcombine.low %v2106_v28, %v2113_v31  ;;  %v2548_v31 = vld [vmem:[%s4500_s12 + $0x10] sm:$0xf] }
  0x32   : > { %v2016_v29 = vcombine.low %v2007_v4, %v2014_v5 }
  0x33   : > { %1377 = vadd.xlane.f32.xlu0 %v1376_v17  ;;  %v2015_v17 = vcombine.low %v1993_v55, %v2000_v59  ;;  %v2136_v4 = vrot.slane %v2128_v49, %v4549_v43  ;;  %v2728_v49 = vrot.slane %v2548_v31, %v4514_v24 }
  0x34   : > { %1380 = vadd.xlane.f32.xlu1 %v1379_v10  ;;  %v2546_v10 = vld [vmem:[%s4500_s12 + $0x8] sm:$0xf] }
  0x35   : > { %v2023_v55 = vrot.slane %v2015_v17, %v4549_v43  ;;  %v2714_v3 = vrot.slane %v2546_v10, %v4514_v24  ;;  %v1982_v17 = vld [vmem:[%s1101_s14] sm:$0x1]  ;;  %s5346_s14 = scalar_lea.vmem %s5383_s10, %s4344_s21 }
  0x45   : > { %2555 = vrot.lane.b32.xlu1 %v2544_v21, %s4259_s16  ;;  %v4595_v21 = vld [vmem:[%s4538_s28 + $0x6] sm:$0x1] }
  0x49   : > { %2582 = vbcast.lane.b32.xlu1 %v2580_v22, 256  ;;  %2553 = vrot.lane.b32.xlu0 %v2552_v30, %s4259_s16  ;;  %v2098_v22 = vcombine.low %v4579_v63, %v4586_v6  ;;  %v2099_v30 = vcombine.low %v4589_v8, %v4595_v21 }
  0x4b   : > { %v2127_v48 = vrot.slane %v2099_v30, %v4549_v43 }
  0x4d   : > { %2589 = vbcast.lane.b32.xlu1 %v2587_v32, 256  ;;  %2702 = vbcast.lane.b32.xlu0 %v2700_v36, 256  ;;  %v2120_v32 = vrot.slane %v2098_v22, %v4549_v43  ;;  %v2594_v36 = vrot.slane %v2546_v10, %v4503_v20  ;;  %v2721_v22 = vrot.slane %v2547_v39, %v4514_v24 }
  0x4f   : > { %v2129_v59 = vcombine.low %v2120_v32, %v2127_v48  ;;  %v2608_v32 = vrot.slane %v2548_v31, %v4503_v20 }
  0x51   : > { %2709 = vbcast.lane.b32.xlu1 %v2707_v58, 256  ;;  %2557 = vrot.lane.b32.xlu0 %v2545_v23, %s4259_s16  ;;  %v2030_v58 = vrot.slane %v2016_v29, %v4549_v43  ;;  %v2601_v23 = vrot.slane %v2547_v39, %v4503_v20  ;;  %v2143_v5 = vrot.slane %v2129_v59, %v4549_v43  ;;  %v2095_v29 = vld [vmem:[%s1145_s24] sm:$0x1] }
  0x52   : > { %v2370_v59 = vrot.slane %v4568_v56, %v4503_v20 }
  0x53   : > { %v2031_v9 = vcombine.low %v2023_v55, %v2030_v58  ;;  %v2208_v58 = vrot.slane %v4530_v35, %v4503_v20 }
  0x55   : > { %2559 = vrot.lane.b32.xlu1 %v2546_v10, %s4259_s16  ;;  %2596 = vbcast.lane.b32.xlu0 %v2594_v36, 256  ;;  %v2144_v10 = vcombine.low %v2136_v4, %v2143_v5  ;;  %v2033_v28 = vsel %vm2032_vm2, %v1982_v17, %v2031_v9  ;;  %v2549_v36 = vld [vmem:[%s4500_s12 + $0x14] sm:$0xf]  ;;  %v1981_v4 = vld [vmem:[%s4523_s26 + $0x7] sm:$0x1]  ;;  %v2036_v5 = vcombine.low %v4552_v44, %v4555_v45  ;;  %s5240_s26 = scalar_lea.vmem %s5375_s2, %s4344_s21 }
  0x56   : > { %v2615_v48 = vrot.slane %v2549_v36, %v4503_v20  ;;  %v2735_v55 = vrot.slane %v2549_v36, %v4514_v24  ;;  %v2037_v9 = vcombine.low %v4558_v46, %v1981_v4  ;;  %v2094_v17 = vld [vmem:[%s4538_s28 + $0x7] sm:$0x1]  ;;  %s1057_s28 = scalar_lea.vmem %s5376_s3, %s4353_s25 }
  0x57   : > { %v2145_v30 = vsel %vm2032_vm2, %v2095_v29, %v2144_v10  ;;  %v2058_v29 = vrot.slane %v2036_v5, %v4549_v43 }
  0x59   : > { %2603 = vbcast.lane.b32.xlu1 %v2601_v23, 256  ;;  %2716 = vbcast.lane.b32.xlu0 %v2714_v3, 256  ;;  %v2377_v23 = vrot.slane %v4571_v57, %v4503_v20  ;;  %v2550_v3 = vld [vmem:[%s4500_s12 + $0x18] sm:$0xf] }
  0x5a   : > { %v2622_v10 = vrot.slane %v2550_v3, %v4503_v20 }
  0x5d   : > { %2723 = vbcast.lane.b32.xlu1 %v2721_v22, 256  ;;  %2083 = vrot.lane.b32.xlu0 %v2033_v28, %s4259_s16  ;;  %v2148_v22 = vcombine.low %v4586_v6, %v4589_v8  ;;  %v2551_v28 = vld [vmem:[%s4500_s12 + $0x1c] sm:$0xf] }
  0x61   : > { %2195 = vrot.lane.b32.xlu1 %v2145_v30, %s4259_s16  ;;  %2561 = vrot.lane.b32.xlu0 %v2547_v39, %s4259_s16  ;;  %v2201_v39 = vrot.slane %v4527_v33, %v4503_v20  ;;  %v2149_v30 = vcombine.low %v4595_v21, %v2094_v17 }
  0x65   : > { %2563 = vrot.lane.b32.xlu1 %v2548_v31, %s4259_s16  ;;  %2610 = vbcast.lane.b32.xlu0 %v2608_v32, 256  ;;  %v2065_v31 = vrot.slane %v2037_v9, %v4549_v43  ;;  %v2170_v32 = vrot.slane %v2148_v22, %v4549_v43 }
  0x69   : > { %2617 = vbcast.lane.b32.xlu1 %v2615_v48, 256  ;;  %2730 = vbcast.lane.b32.xlu0 %v2728_v49, 256  ;;  %v2177_v48 = vrot.slane %v2149_v30, %v4549_v43  ;;  %v2034_v49 = vcombine.low %v4527_v33, %v4530_v35 }
  0x6b   : > { %v2179_v5 = vcombine.low %v2170_v32, %v2177_v48  ;;  %v2044_v33 = vrot.slane %v2034_v49, %v4549_v43 }
  0x6d   : > { %2737 = vbcast.lane.b32.xlu1 %v2735_v55, 256  ;;  %2203 = vbcast.lane.b32.xlu0 %v2201_v39, 256  ;;  %v2035_v55 = vcombine.low %v4541_v37, %v4544_v38  ;;  %v2629_v39 = vrot.slane %v2551_v28, %v4503_v20  ;;  %v4683_v30 = vrot.slane %v2179_v5, %v4549_v43 }
  0x6f   : > { %v2051_v35 = vrot.slane %v2035_v55, %v4549_v43  ;;  %v2391_v55 = vrot.slane %v4579_v63, %v4503_v20 }
  0x71   : > { %2210 = vbcast.lane.b32.xlu1 %v2208_v58, 256  ;;  %2372 = vbcast.lane.b32.xlu0 %v2370_v59, 256  ;;  %v2742_v58 = vrot.slane %v2550_v3, %v4514_v24  ;;  %v2067_v59 = vcombine.low %v2058_v29, %v2065_v31 }
  0x73   : > { %v4679_v22 = vrot.slane %v2067_v59, %v4549_v43 }
  0x75   : > { %2379 = vbcast.lane.b32.xlu1 %v2377_v23, 256  ;;  %2565 = vrot.lane.b32.xlu0 %v2549_v36, %s4259_s16  ;;  %v2146_v36 = vcombine.low %v4568_v56, %v4571_v57  ;;  %v2147_v23 = vcombine.low %v4576_v62, %v4579_v63  ;;  %v2066_v57 = vcombine.low %v2044_v33, %v2051_v35 }
  0x76   : > { %v2243_v63 = vrot.slane %v4558_v46, %v4503_v20 }
  0x77   : > { %v2156_v9 = vrot.slane %v2146_v36, %v4549_v43  ;;  %v2163_v56 = vrot.slane %v2147_v23, %v4549_v43  ;;  %v4688_v31 = vrot.slane %v2066_v57, %v4549_v43  ;;  %v2229_v36 = vrot.slane %v4552_v44, %v4503_v20 }
  0x78   : > { %v2412_v44 = vrot.slane %v4595_v21, %v4503_v20 }
  0x79   : > { %2567 = vrot.lane.b32.xlu1 %v2550_v3, %s4259_s16  ;;  %2624 = vbcast.lane.b32.xlu0 %v2622_v10, 256  ;;  %v2749_v3 = vrot.slane %v2551_v28, %v4514_v24  ;;  %v2178_v29 = vcombine.low %v2156_v9, %v2163_v56  ;;  %v2215_v10 = vrot.slane %v4541_v37, %v4503_v20 }
  0x7a   : > { %v2082_v48 = vcombine.low %v4688_v31, %v4679_v22  ;;  %v2222_v28 = vrot.slane %v4544_v38, %v4503_v20  ;;  %v2384_v37 = vrot.slane %v4576_v62, %v4503_v20  ;;  %v2398_v38 = vrot.slane %v4586_v6, %v4503_v20 }
  0x7b   : > { %v4691_v32 = vrot.slane %v2178_v29, %v4549_v43  ;;  %v2405_v62 = vrot.slane %v4589_v8, %v4503_v20 }
  0x7d   : > { %2631 = vbcast.lane.b32.xlu1 %v2629_v39, 256  ;;  %2744 = vbcast.lane.b32.xlu0 %v2742_v58, 256  ;;  %v2194_v49 = vcombine.low %v4691_v32, %v4683_v30  ;;  %v2236_v39 = vrot.slane %v4555_v45, %v4503_v20  ;;  %v2250_v58 = vrot.slane %v1981_v4, %v4503_v20 }
  0x7e   : > { %v2419_v45 = vrot.slane %v2094_v17, %v4503_v20 }
  0x81   : > { %2751 = vbcast.lane.b32.xlu1 %v2749_v3, 256  ;;  %2217 = vbcast.lane.b32.xlu0 %v2215_v10, 256 }
  0x85   : > { %2224 = vbcast.lane.b32.xlu1 %v2222_v28, 256  ;;  %2386 = vbcast.lane.b32.xlu0 %v2384_v37, 256 }
  0x89   : > { %2393 = vbcast.lane.b32.xlu1 %v2391_v55, 256  ;;  %2231 = vbcast.lane.b32.xlu0 %v2229_v36, 256 }
  0x8d   : > { %2238 = vbcast.lane.b32.xlu1 %v2236_v39, 256  ;;  %2400 = vbcast.lane.b32.xlu0 %v2398_v38, 256 }
  0x91   : > { %2407 = vbcast.lane.b32.xlu1 %v2405_v62, 256  ;;  %2245 = vbcast.lane.b32.xlu0 %v2243_v63, 256 }
  0x95   : > { %2252 = vbcast.lane.b32.xlu1 %v2250_v58, 256  ;;  %2414 = vbcast.lane.b32.xlu0 %v2412_v44, 256 }
  0x99   : > { %2421 = vbcast.lane.b32.xlu1 %v2419_v45, 256 }
  0xa0   : > { %v1336_v59 = vpop.xlane.xlu0 %1335 }
  0xa1   : > { %v1342_v6 = vpop.xlane.xlu1 %1341  ;;  %vm1384_vm6 = vcmp.eq.f32.partialorder %v1336_v59, inf  ;;  %vm1386_vm7 = vcmp.eq.f32.partialorder %v1336_v59, 0.0  ;;  %v1387_v57 = vand.u32 2147483648, %v1336_v59 }
  0xa2   : > { %4099 = vrsqrt.f32 %v1342_v6  ;;  %vm1398_vm4 = vcmp.eq.f32.partialorder %v1342_v6, inf  ;;  %vm1400_vm5 = vcmp.eq.f32.partialorder %v1342_v6, 0.0  ;;  %v1401_v9 = vand.u32 2147483648, %v1342_v6 }
  0xa3   : > { %4101 = vrsqrt.f32 %v1336_v59 }
  0xa4   : > { %v1339_v23 = vpop.xlane.xlu0 %1338 }
  0xa5   : > { %v1345_v8 = vpop.xlane.xlu1 %1344  ;;  %vm1391_vm10 = vcmp.eq.f32.partialorder %v1339_v23, inf  ;;  %vm1393_vm11 = vcmp.eq.f32.partialorder %v1339_v23, 0.0  ;;  %v1394_v58 = vand.u32 2147483648, %v1339_v23 }
  0xa6   : > { %4103 = vrsqrt.f32 %v1345_v8  ;;  %vm1405_vm8 = vcmp.eq.f32.partialorder %v1345_v8, inf  ;;  %vm1407_vm9 = vcmp.eq.f32.partialorder %v1345_v8, 0.0  ;;  %v1408_v28 = vand.u32 2147483648, %v1345_v8 }
  0xa7   : > { %4105 = vrsqrt.f32 %v1339_v23 }
  0xa8   : > { %v4719_v4 = vpop.xlane.xlu0 %1347 }
  0xa9   : > { %v4717_v46 = vpop.xlane.xlu1 %1350  ;;  %vm1412_vm14 = vcmp.eq.f32.partialorder %v4719_v4, inf  ;;  %vm1414_vm15 = vcmp.eq.f32.partialorder %v4719_v4, 0.0 }
  0xaa   : > { %4107 = vrsqrt.f32 %v4717_v46  ;;  %vm1419_vm12 = vcmp.eq.f32.partialorder %v4717_v46, inf  ;;  %vm1421_vm13 = vcmp.eq.f32.partialorder %v4717_v46, 0.0 }
  0xab   : > { %4109 = vrsqrt.f32 %v4719_v4 }
  0xac   : > { %v4725_v17 = vpop.xlane.xlu0 %1353 }
  0xad   : > { %v4723_v21 = vpop.xlane.xlu1 %1356 }
  0xae   : > { %4111 = vrsqrt.f32 %v4723_v21  ;;  %vm1433_vm2 = vcmp.eq.f32.partialorder %v4723_v21, inf }
  0xaf   : > { %v4100_v5 = vpop.eup %4099  ;;  %4113 = vrsqrt.f32 %v4725_v17 }
  0xb0   : > { %v4102_v33 = vpop.eup %4101  ;;  %v1397_v35 = vmul.f32 %v4100_v5, %v1342_v6  ;;  %v4731_v29 = vpop.xlane.xlu0 %1359 }
  0xb1   : > { %v1383_v56 = vmul.f32 %v4102_v33, %v1336_v59  ;;  %v4729_v3 = vpop.xlane.xlu1 %1362 }
  0xb2   : > { %v1399_v10 = vsel %vm1398_vm4, %v1342_v6, %v1397_v35  ;;  %4115 = vrsqrt.f32 %v4729_v3  ;;  %v1422_v35 = vand.u32 2147483648, %v4717_v46  ;;  %vm1435_vm4 = vcmp.eq.f32.partialorder %v4723_v21, 0.0 }
  0xb3   : > { %v4104_v37 = vpop.eup %4103  ;;  %v1402_v55 = vsel %vm1400_vm5, %v1401_v9, %v1399_v10  ;;  %v1385_v36 = vsel %vm1384_vm6, %v1336_v59, %v1383_v56  ;;  %4117 = vrsqrt.f32 %v4731_v29  ;;  %vm1426_vm5 = vcmp.eq.f32.partialorder %v4725_v17, inf }
  0xb4   : > { %v4106_v39 = vpop.eup %4105  ;;  %v1496_v38 = vadd.f32 1e-06, %v1402_v55  ;;  %v1388_v62 = vsel %vm1386_vm7, %v1387_v57, %v1385_v36  ;;  %v1404_v63 = vmul.f32 %v4104_v37, %v1345_v8  ;;  %v4741_v6 = vpop.xlane.xlu0 %1365  ;;  %vm1428_vm6 = vcmp.eq.f32.partialorder %v4725_v17, 0.0 }
  0xb5   : > { %v1494_v44 = vadd.f32 1e-06, %v1388_v62  ;;  %v1390_v45 = vmul.f32 %v4106_v39, %v1339_v23  ;;  %v4739_v5 = vpop.xlane.xlu1 %1368  ;;  %vm1447_vm7 = vcmp.eq.f32.partialorder %v4729_v3, inf }
  0xb6   : > { %4119 = vrcp.f32 %v1496_v38  ;;  %v1406_v33 = vsel %vm1405_vm8, %v1345_v8, %v1404_v63  ;;  %v1415_v38 = vand.u32 2147483648, %v4719_v4  ;;  %vm1449_vm8 = vcmp.eq.f32.partialorder %v4729_v3, 0.0 }
  0xb7   : > { %v4108_v59 = vpop.eup %4107  ;;  %4121 = vrcp.f32 %v1494_v44  ;;  %v1409_v9 = vsel %vm1407_vm9, %v1408_v28, %v1406_v33  ;;  %v1392_v56 = vsel %vm1391_vm10, %v1339_v23, %v1390_v45  ;;  %v1436_v44 = vand.u32 2147483648, %v4723_v21 }
  0xb8   : > { %v4110_v57 = vpop.eup %4109  ;;  %v1497_v10 = vadd.f32 1e-06, %v1409_v9  ;;  %v1395_v37 = vsel %vm1393_vm11, %v1394_v58, %v1392_v56  ;;  %v1418_v55 = vmul.f32 %v4108_v59, %v4717_v46  ;;  %4123 = vrsqrt.f32 %v4739_v5  ;;  %v4757_v28 = vpop.xlane.xlu0 %1371 }
  0xb9   : > { %v1495_v36 = vadd.f32 1e-06, %v1395_v37  ;;  %v1411_v39 = vmul.f32 %v4110_v57, %v4719_v4  ;;  %4125 = vrsqrt.f32 %v4741_v6  ;;  %v4755_v8 = vpop.xlane.xlu1 %1374  ;;  %vm1440_vm9 = vcmp.eq.f32.partialorder %v4731_v29, inf }
  0xba   : > { %4127 = vrcp.f32 %v1497_v10  ;;  %v1420_v23 = vsel %vm1419_vm12, %v4717_v46, %v1418_v55  ;;  %v1429_v10 = vand.u32 2147483648, %v4725_v17  ;;  %vm1442_vm10 = vcmp.eq.f32.partialorder %v4731_v29, 0.0 }
  0xbb   : > { %v4112_v62 = vpop.eup %4111  ;;  %4129 = vrcp.f32 %v1495_v36  ;;  %v1423_v63 = vsel %vm1421_vm13, %v1422_v35, %v1420_v23  ;;  %v1413_v58 = vsel %vm1412_vm14, %v4719_v4, %v1411_v39  ;;  %vm1461_vm11 = vcmp.eq.f32.partialorder %v4739_v5, inf }
  0xbc   : > { %v4114_v45 = vpop.eup %4113  ;;  %v1499_v33 = vadd.f32 1e-06, %v1423_v63  ;;  %v1416_v59 = vsel %vm1414_vm15, %v1415_v38, %v1413_v58  ;;  %v1432_v9 = vmul.f32 %v4112_v62, %v4723_v21  ;;  %4131 = vrsqrt.f32 %v4755_v8  ;;  %v4779_v35 = vpop.xlane.xlu0 %1377 }
  0xbd   : > { %v1498_v56 = vadd.f32 1e-06, %v1416_v59  ;;  %v1425_v57 = vmul.f32 %v4114_v45, %v4725_v17  ;;  %v4777_v46 = vpop.xlane.xlu1 %1380  ;;  %v1450_v58 = vand.u32 2147483648, %v4729_v3  ;;  %vm1463_vm12 = vcmp.eq.f32.partialorder %v4739_v5, 0.0 }
  0xbe   : > { %4133 = vrcp.f32 %v1499_v33  ;;  %v1434_v4 = vsel %vm1433_vm2, %v4723_v21, %v1432_v9  ;;  %v1443_v33 = vand.u32 2147483648, %v4731_v29  ;;  %vm1454_vm13 = vcmp.eq.f32.partialorder %v4741_v6, inf }
  0xbf   : > { %v4116_v37 = vpop.eup %4115  ;;  %4135 = vrcp.f32 %v1498_v56  ;;  %v1437_v55 = vsel %vm1435_vm4, %v1436_v44, %v1434_v4  ;;  %v1427_v36 = vsel %vm1426_vm5, %v4725_v17, %v1425_v57  ;;  %vm1456_vm14 = vcmp.eq.f32.partialorder %v4741_v6, 0.0 }
  0xc0   : > { %v4118_v39 = vpop.eup %4117  ;;  %v1501_v38 = vadd.f32 1e-06, %v1437_v55  ;;  %v1430_v23 = vsel %vm1428_vm6, %v1429_v10, %v1427_v36  ;;  %v1446_v62 = vmul.f32 %v4116_v37, %v4729_v3  ;;  %4137 = vrsqrt.f32 %v4757_v28  ;;  %v4797_v44 = vpop.permute.xlu0 %2553 }
  0xc1   : > { %v1500_v63 = vadd.f32 1e-06, %v1430_v23  ;;  %v1439_v45 = vmul.f32 %v4118_v39, %v4731_v29  ;;  %4139 = vrsqrt.f32 %v4777_v46  ;;  %v4795_v21 = vpop.permute.xlu1 %2555  ;;  %vm1475_vm15 = vcmp.eq.f32.partialorder %v4755_v8, inf }
  0xc2   : > { %4141 = vrcp.f32 %v1501_v38  ;;  %v1448_v17 = vsel %vm1447_vm7, %v4729_v3, %v1446_v62  ;;  %vm1477_vm2 = vcmp.eq.f32.partialorder %v4755_v8, 0.0  ;;  %vm1468_vm4 = vcmp.eq.f32.partialorder %v4757_v28, inf }
  0xc3   : > { %v4120_v59 = vpop.eup %4119  ;;  %4143 = vrcp.f32 %v1500_v63  ;;  %v1451_v9 = vsel %vm1449_vm8, %v1450_v58, %v1448_v17  ;;  %v1441_v56 = vsel %vm1440_vm9, %v4731_v29, %v1439_v45  ;;  %v1464_v29 = vand.u32 2147483648, %v4739_v5 }
  0xc4   : > { %v4122_v57 = vpop.eup %4121  ;;  %v1503_v4 = vadd.f32 1e-06, %v1451_v9  ;;  %v1444_v10 = vsel %vm1442_vm10, %v1443_v33, %v1441_v56  ;;  %4145 = vrsqrt.f32 %v4779_v35  ;;  %v4813_v39 = vpop.permute.xlu0 %2702  ;;  %v1457_v63 = vand.u32 2147483648, %v4741_v6 }
  0xc5   : > { %v4124_v37 = vpop.eup %4123  ;;  %v1502_v55 = vadd.f32 1e-06, %v1444_v10  ;;  %v4811_v36 = vpop.permute.xlu1 %2582  ;;  %v1515_v17 = vmul.f32 %v4120_v59, %v4383_v11  ;;  %v1511_v10 = vmul.f32 %v4122_v57, %v4385_v12  ;;  %vm1470_vm5 = vcmp.eq.f32.partialorder %v4757_v28, 0.0 }
  0xc6   : > { %v4126_v3 = vpop.eup %4125  ;;  %4147 = vrcp.f32 %v1503_v4  ;;  %v1460_v38 = vmul.f32 %v4124_v37, %v4739_v5  ;;  %vm1489_vm6 = vcmp.eq.f32.partialorder %v4777_v46, inf  ;;  %vm1491_vm7 = vcmp.eq.f32.partialorder %v4777_v46, 0.0 }
  0xc7   : > { %v4128_v23 = vpop.eup %4127  ;;  %4149 = vrcp.f32 %v1502_v55  ;;  %v1453_v62 = vmul.f32 %v4126_v3, %v4741_v6  ;;  %vm1482_vm8 = vcmp.eq.f32.partialorder %v4779_v35, inf  ;;  %vm1484_vm9 = vcmp.eq.f32.partialorder %v4779_v35, 0.0 }
  0xc8   : > { %v4130_v58 = vpop.eup %4129  ;;  %v1462_v45 = vsel %vm1461_vm11, %v4739_v5, %v1460_v38  ;;  %v1517_v33 = vmul.f32 %v4128_v23, %v4387_v13  ;;  %v4832_v3 = vpop.permute.xlu0 %2557  ;;  %v1478_v5 = vand.u32 2147483648, %v4755_v8  ;;  %vm2085_vm10 = vcmask 64512  }
  0xc9   : > { %v4132_v9 = vpop.eup %4131  ;;  %v1465_v56 = vsel %vm1463_vm12, %v1464_v29, %v1462_v45  ;;  %v1455_v4 = vsel %vm1454_vm13, %v4741_v6, %v1453_v62  ;;  %v1513_v37 = vmul.f32 %v4130_v58, %v4389_v14  ;;  %v4830_v55 = vpop.permute.xlu1 %2589 }
  0xca   : > { %v1505_v38 = vadd.f32 1e-06, %v1465_v56  ;;  %v1458_v18 = vsel %vm1456_vm14, %v1457_v63, %v1455_v4  ;;  %v1474_v11 = vmul.f32 %v4132_v9, %v4755_v8  ;;  %v1543_v59 = vpack.c.bf16 %v1517_v33, %v1515_v17 }
  0xcb   : > { %v4134_v13 = vpop.eup %4133  ;;  %v1504_v23 = vadd.f32 1e-06, %v1458_v18  ;;  %v1542_v6 = vpack.c.bf16 %v1513_v37, %v1511_v10  ;;  %v1471_v56 = vand.u32 2147483648, %v4757_v28  ;;  %v1492_v4 = vand.u32 2147483648, %v4777_v46 }
  0xcc   : > { %v4136_v29 = vpop.eup %4135  ;;  %4151 = vrcp.f32 %v1505_v38  ;;  %v1476_v12 = vsel %vm1475_vm15, %v4755_v8, %v1474_v11  ;;  %v1654_v14 = vsel %vm1333_vm1, %v1543_v59, 0  ;;  %v1521_v57 = vmul.f32 %v4134_v13, %v4391_v15  ;;  %v4846_v17 = vpop.permute.xlu0 %2596 }
  0xcd   : > { %v4138_v62 = vpop.eup %4137  ;;  %4153 = vrcp.f32 %v1504_v23  ;;  %v1479_v63 = vsel %vm1477_vm2, %v1478_v5, %v1476_v12  ;;  %3964 = vmatpush3.bf16.xpose.msra.mxu1 %v1654_v14  ;;  %v1609_v18 = vsel %vm1333_vm1, %v1542_v6, 0  ;;  %v1519_v58 = vmul.f32 %v4136_v29, %v4393_v16  ;;  %v4844_v45 = vpop.permute.xlu1 %2709 }
  0xce   : > { %v4140_v33 = vpop.eup %4139  ;;  %v1507_v9 = vadd.f32 1e-06, %v1479_v63  ;;  %v1467_v8 = vmul.f32 %v4138_v62, %v4757_v28  ;;  %3958 = vmatpush3.bf16.xpose.msra.mxu0 %v1609_v18  ;;  %3975 = vmatprep.subr.bf16.mxu1 %v4261_v47 }
  0xcf   : > { %v4142_v15 = vpop.eup %4141  ;;  %v1488_v16 = vmul.f32 %v4140_v33, %v4777_v46  ;;  %3969 = vmatprep.subr.bf16.mxu0 %v4261_v47  ;;  %v1544_v38 = vpack.c.bf16 %v1521_v57, %v1519_v58  ;;  %v1485_v57 = vand.u32 2147483648, %v4779_v35 }
  0xd0   : > { %v4144_v10 = vpop.eup %4143  ;;  %4155 = vrcp.f32 %v1507_v9  ;;  %v1469_v37 = vsel %vm1468_vm4, %v4757_v28, %v1467_v8  ;;  %v1525_v11 = vmul.f32 %v4142_v15, %v4412_v26  ;;  %v4864_v29 = vpop.permute.xlu0 %2716 }
  0xd1   : > { %v4146_v59 = vpop.eup %4145  ;;  %v1472_v13 = vsel %vm1470_vm5, %v1471_v56, %v1469_v37  ;;  %v1490_v23 = vsel %vm1489_vm6, %v4777_v46, %v1488_v16  ;;  %v1523_v5 = vmul.f32 %v4144_v10, %v4414_v27  ;;  %v4862_v6 = vpop.permute.xlu1 %2559  ;;  %v1699_v18 = vsel %vm1333_vm1, %v1544_v38, 0 }
  0xd2   : > { %v1506_v12 = vadd.f32 1e-06, %v1472_v13  ;;  %v1493_v14 = vsel %vm1491_vm7, %v1492_v4, %v1490_v23  ;;  %v1481_v62 = vmul.f32 %v4146_v59, %v4779_v35 }
  0xd3   : > { %v4148_v28 = vpop.eup %4147  ;;  %v1509_v26 = vadd.f32 1e-06, %v1493_v14  ;;  %v1545_v63 = vpack.c.bf16 %v1525_v11, %v1523_v5 }
  0xd4   : > { %v4150_v46 = vpop.eup %4149  ;;  %4157 = vrcp.f32 %v1506_v12  ;;  %v1483_v27 = vsel %vm1482_vm8, %v4779_v35, %v1481_v62  ;;  %3966 = vmatmul.mubr.msk.bf16.vlgmr.msra.gmra.mxu1 %vm1333_vm1, %v4359_v1  ;;  %v1529_v58 = vmul.f32 %v4148_v28, %v4437_v40  ;;  %v2084_v15 = vpop.permute.xlu0 %2083 }
  0xd5   : > { %4159 = vrcp.f32 %v1509_v26  ;;  %v1486_v33 = vsel %vm1484_vm9, %v1485_v57, %v1483_v27  ;;  %3960 = vmatmul.mubr.msk.bf16.vlgmr.msra.gmra.mxu0 %vm1333_vm1, %v4356_v0  ;;  %v1744_v9 = vsel %vm1333_vm1, %v1545_v63, 0  ;;  %3977 = vmatprep.mubr.msk.bf16.mxu1 %vm4262_vm3, %v4261_v47  ;;  %v1527_v8 = vmul.f32 %v4150_v46, %v4439_v41  ;;  %v4881_v35 = vpop.permute.xlu1 %2603 }
  0xd6   : > { %v1508_v1 = vadd.f32 1e-06, %v1486_v33  ;;  %3970 = vmatpush3.bf16.xpose.msra.mxu0 %v1699_v18  ;;  %3976 = vmatpush3.bf16.xpose.msra.mxu1 %v1744_v9 }
  0xd7   : > { %3971 = vmatprep.mubr.msk.bf16.mxu0 %vm4262_vm3, %v4261_v47  ;;  %3981 = vmatprep.subr.bf16.mxu0 %v4261_v47  ;;  %v1546_v40 = vpack.c.bf16 %v1529_v58, %v1527_v8 }
  0xd8   : > { %4161 = vrcp.f32 %v1508_v1  ;;  %3987 = vmatprep.subr.bf16.mxu1 %v4261_v47  ;;  %v4889_v16 = vpop.permute.xlu0 %2561 }
  0xd9   : > { %v4152_v0 = vpop.eup %4151  ;;  %v4887_v56 = vpop.permute.xlu1 %2723  ;;  %v1789_v38 = vsel %vm1333_vm1, %v1546_v40, 0 }
  0xda   : > { %v4154_v41 = vpop.eup %4153  ;;  %v1533_v4 = vmul.f32 %v4152_v0, %v4456_v50 }
  0xdb   : > { %v1531_v10 = vmul.f32 %v4154_v41, %v4458_v51 }
  0xdc   : > { %v4898_v13 = vpop.permute.xlu0 %2610 }
  0xdd   : > { %v4156_v37 = vpop.eup %4155  ;;  %3972 = vmatmul.mubr.msk.bf16.vlgmr.msra.gmra.mxu0 %vm1333_vm1, %v4366_v2  ;;  %3978 = vmatmul.mubr.msk.bf16.vlgmr.msra.gmra.mxu1 %vm1333_vm1, %v4375_v7  ;;  %v1547_v11 = vpack.c.bf16 %v1533_v4, %v1531_v10  ;;  %v2196_v59 = vpop.permute.xlu1 %2195 }
  0xde   : > { %3982 = vmatpush3.bf16.xpose.msra.mxu0 %v1789_v38  ;;  %3983 = vmatprep.mubr.msk.bf16.mxu0 %vm4262_vm3, %v4261_v47  ;;  %v1537_v2 = vmul.f32 %v4156_v37, %v4463_v53  ;;  %v2086_v53 = vsel %vm2085_vm10, %v2082_v48, %v2084_v15 }
  0xdf   : > { %v1834_v50 = vsel %vm1333_vm1, %v1547_v11, 0  ;;  %3989 = vmatprep.mubr.msk.bf16.mxu1 %vm4262_vm3, %v4261_v47  ;;  %3993 = vmatprep.subr.bf16.mxu0 %v4261_v47  ;;  %v2261_v22 = vrot.slane %v2086_v53, %v4549_v43 }
  0xe0   : > { %3988 = vmatpush3.bf16.xpose.msra.mxu1 %v1834_v50  ;;  %v4910_v23 = vpop.permute.xlu0 %2730 }
  0xe1   : > { %v4158_v7 = vpop.eup %4157  ;;  %3999 = vmatprep.subr.bf16.mxu1 %v4261_v47  ;;  %v4908_v51 = vpop.permute.xlu1 %2563  ;;  %v2269_v48 = vcombine.high %v2261_v22, %v2261_v22  ;;  %v2277_v27 = vrot.slane %v2261_v22, %v4549_v43 }
  0xe2   : > { %v4160_v5 = vpop.eup %4159  ;;  %v1535_v12 = vmul.f32 %v4158_v7, %v4465_v54 }
  0xe3   : > { %v1541_v62 = vmul.f32 %v4160_v5, %v4475_v60  ;;  %v2291_v18 = vrot.slane %v2269_v48, %v4549_v43  ;;  %v2306_v33 = vrot.slane %v2277_v27, %v4503_v20 }
  0xe4   : > { %v1548_v14 = vpack.c.bf16 %v1537_v2, %v1535_v12  ;;  %v2204_v57 = vpop.permute.xlu0 %2203  ;;  %v2254_v2 = vcombine.high %v2086_v53, %v2086_v53 }
  0xe5   : > { %v4162_v28 = vpop.eup %4161  ;;  %3984 = vmatmul.mubr.msk.bf16.vlgmr.msra.gmra.mxu0 %vm1333_vm1, %v4410_v25  ;;  %v4920_v26 = vpop.permute.xlu1 %2617  ;;  %v4930_v25 = vsel %vm2085_vm10, %v2194_v49, %v2196_v59  ;;  %vm2335_vm11 = vcmp.eq.s32.totalorder %v2204_v57, %v2306_v33  ;;  %v2299_v57 = vcombine.high %v2277_v27, %v2277_v27 }
  0xe6   : > { %v1879_v63 = vsel %vm1333_vm1, %v1548_v14, 0  ;;  %v1539_v54 = vmul.f32 %v4162_v28, %v4477_v61  ;;  %3995 = vmatprep.mubr.msk.bf16.mxu0 %vm4262_vm3, %v4261_v47  ;;  %v2430_v61 = vrot.slane %v4930_v25, %v4549_v43  ;;  %v3854_v40 = vsel %vm2335_vm11, 1.0, %v4261_v47 }
  0xe7   : > { %3990 = vmatmul.mubr.msk.bf16.vlgmr.msra.gmra.mxu1 %vm1333_vm1, %v4427_v34  ;;  %3994 = vmatpush3.bf16.xpose.msra.mxu0 %v1879_v63  ;;  %v2359_v41 = vmul.f32 -100000.0, %v3854_v40  ;;  %v2301_v63 = vcombine.high %v2291_v18, %v2291_v18  ;;  %v2314_v53 = vrot.slane %v2299_v57, %v4503_v20 }
  0xe8   : > { %v1549_v60 = vpack.c.bf16 %v1541_v62, %v1539_v54  ;;  %4001 = vmatprep.mubr.msk.bf16.mxu1 %vm4262_vm3, %v4261_v47  ;;  %4005 = vmatprep.subr.bf16.mxu0 %v4261_v47  ;;  %v2373_v30 = vpop.permute.xlu0 %2372  ;;  %v2438_v34 = vcombine.high %v2430_v61, %v2430_v61  ;;  %v2446_v58 = vrot.slane %v2430_v61, %v4549_v43 }
  0xe9   : > { %v4940_v31 = vpop.permute.xlu1 %2737  ;;  %v2268_v62 = vrot.slane %v2254_v2, %v4549_v43  ;;  %v2318_v61 = vrot.slane %v2301_v63, %v4503_v20 }
  0xea   : > { %v1924_v32 = vsel %vm1333_vm1, %v1549_v60, 0  ;;  %v2460_v9 = vrot.slane %v2438_v34, %v4549_v43  ;;  %v2475_v1 = vrot.slane %v2446_v58, %v4503_v20  ;;  %v2423_v60 = vcombine.high %v4930_v25, %v4930_v25 }
  0xeb   : > { %4000 = vmatpush3.bf16.xpose.msra.mxu1 %v1924_v32  ;;  %v2468_v22 = vcombine.high %v2446_v58, %v2446_v58  ;;  %v2284_v34 = vrot.slane %v2268_v62, %v4549_v43  ;;  %v2270_v27 = vcombine.high %v2268_v62, %v2268_v62 }
  0xec   : > { %4011 = vmatprep.subr.bf16.mxu1 %v4261_v47  ;;  %v4944_v46 = vpop.permute.xlu0 %2565  ;;  %v2479_v0 = vrot.slane %v2460_v9, %v4503_v20  ;;  %vm2504_vm13 = vcmp.ne.s32.totalorder %v2373_v30, %v2475_v1  ;;  %v2470_v48 = vcombine.high %v2460_v9, %v2460_v9  ;;  %v2437_v33 = vrot.slane %v2423_v60, %v4549_v43 }
  0xed   : > { %v2211_v49 = vpop.permute.xlu1 %2210  ;;  %v3862_v38 = vsel %vm2504_vm13, 1.0, %v4261_v47  ;;  %v2483_v32 = vrot.slane %v2468_v22, %v4503_v20  ;;  %v2300_v22 = vcombine.high %v2284_v34, %v2284_v34 }
  0xee   : > { %3996 = vmatmul.mubr.msk.bf16.vlgmr.msra.gmra.mxu0 %vm1333_vm1, %v4442_v42  ;;  %v2310_v42 = vrot.slane %v2291_v18, %v4503_v20  ;;  %v2528_v11 = vmul.f32 -10000000.0, %v3862_v38  ;;  %v2487_v1 = vrot.slane %v2470_v48, %v4503_v20 }
  0xef   : > { %4007 = vmatprep.mubr.msk.bf16.mxu0 %vm4262_vm3, %v4261_v47 }
  0xf0   : > { %v4955_v15 = vpop.permute.xlu0 %2624  ;;  %vm2336_vm12 = vcmp.eq.s32.totalorder %v2211_v49, %v2310_v42  ;;  %v4972_v7 = vadd.f32 %v2528_v11, %v2359_v41  ;;  %v2298_v41 = vrot.slane %v2270_v27, %v4549_v43 }
  0xf1   : > { %v2380_v8 = vpop.permute.xlu1 %2379  ;;  %v3855_v4 = vsel %vm2336_vm12, 1.0, %v4261_v47 }
  0xf2   : > { %4002 = vmatmul.mubr.msk.bf16.vlgmr.msra.gmra.mxu1 %vm1333_vm1, %v4461_v52  ;;  %vm2505_vm14 = vcmp.ne.s32.totalorder %v2380_v8, %v2479_v0  ;;  %v2360_v37 = vmul.f32 -100000.0, %v3855_v4  ;;  %v2322_v0 = vrot.slane %v2284_v34, %v4503_v20  ;;  %v2453_v4 = vrot.slane %v2437_v33, %v4549_v43 }
  0xf3   : > { %4013 = vmatprep.mubr.msk.bf16.mxu1 %vm4262_vm3, %v4261_v47  ;;  %v3863_v59 = vsel %vm2505_vm14, 1.0, %v4261_v47  ;;  %v2326_v2 = vrot.slane %v2298_v41, %v4503_v20 }
  0xf4   : > { %v4968_v52 = vpop.permute.xlu0 %2744  ;;  %v2529_v50 = vmul.f32 -10000000.0, %v3863_v59  ;;  %v2491_v63 = vrot.slane %v2453_v4, %v4503_v20 }
  0xf5   : > { %v4966_v10 = vpop.permute.xlu1 %2567 }
  0xf6   : > { %v4976_v14 = vadd.f32 %v2529_v50, %v2360_v37  ;;  %v2439_v37 = vcombine.high %v2437_v33, %v2437_v33  ;;  %v2330_v33 = vrot.slane %v2300_v22, %v4503_v20 }
  0xf8   : > { %v2218_v12 = vpop.permute.xlu0 %2217 }
  0xf9   : > { %v4974_v5 = vpop.permute.xlu1 %2631  ;;  %vm2337_vm15 = vcmp.eq.s32.totalorder %v2218_v12, %v2314_v53  ;;  %v2302_v53 = vcombine.high %v2298_v41, %v2298_v41 }
  0xfa   : > { %v3856_v18 = vsel %vm2337_vm15, 1.0, %v4261_v47 }
  0xfb   : > { %v2361_v25 = vmul.f32 -100000.0, %v3856_v18  ;;  %v2334_v34 = vrot.slane %v2302_v53, %v4503_v20  ;;  %v5028_v53 = vsub.s32 2, %v4494_v19 }
  0xfc   : > { %v2387_v54 = vpop.permute.xlu0 %2386 }
  0xfd   : > { %v4979_v28 = vpop.permute.xlu1 %2751  ;;  %vm2506_vm4 = vcmp.ne.s32.totalorder %v2387_v54, %v2483_v32  ;;  %v2467_v54 = vrot.slane %v2439_v37, %v4549_v43 }
  0xfe   : > { %v3864_v8 = vsel %vm2506_vm4, 1.0, %v4261_v47 }
  0xff   : > { %v2530_v42 = vmul.f32 -10000000.0, %v3864_v8  ;;  %v2495_v48 = vrot.slane %v2467_v54, %v4503_v20  ;;  %v2471_v8 = vcombine.high %v2467_v54, %v2467_v54 }
 0x100   : > { %v2232_v49 = vpop.permute.xlu0 %2231 }
 0x101   : > { %v2225_v30 = vpop.permute.xlu1 %2224  ;;  %v4995_v11 = vadd.f32 %v2530_v42, %v2361_v25  ;;  %vm2339_vm6 = vcmp.eq.s32.totalorder %v2232_v49, %v2322_v0 }
 0x102   : > { %vm2338_vm2 = vcmp.eq.s32.totalorder %v2225_v30, %v2318_v61  ;;  %v3858_v50 = vsel %vm2339_vm6, 1.0, %v4261_v47  ;;  %v2469_v61 = vcombine.high %v2453_v4, %v2453_v4 }
 0x103   : > { %v3857_v58 = vsel %vm2338_vm2, 1.0, %v4261_v47  ;;  %v2363_v62 = vmul.f32 -100000.0, %v3858_v50 }
 0x104   : > { %v2401_v40 = vpop.permute.xlu0 %2400  ;;  %v2362_v38 = vmul.f32 -100000.0, %v3857_v58  ;;  %v2499_v58 = vrot.slane %v2469_v61, %v4503_v20  ;;  %v4228_v61 = vld [vmem:[%s4500_s12] sm:$0xf] }
 0x105   : > { %v2394_v9 = vpop.permute.xlu1 %2393  ;;  %vm2508_vm8 = vcmp.ne.s32.totalorder %v2401_v40, %v2491_v63 }
 0x106   : > { %vm2507_vm5 = vcmp.ne.s32.totalorder %v2394_v9, %v2487_v1  ;;  %v3866_v49 = vsel %vm2508_vm8, 1.0, %v4261_v47 }
 0x107   : > { %v3865_v59 = vsel %vm2507_vm5, 1.0, %v4261_v47  ;;  %v2532_v18 = vmul.f32 -10000000.0, %v3866_v49 }
 0x108   : > { %v2531_v12 = vmul.f32 -10000000.0, %v3865_v59  ;;  %v2246_v60 = vpop.permute.xlu0 %2245  ;;  %v2503_v59 = vrot.slane %v2471_v8, %v4503_v20 }
 0x109   : > { %v2239_v57 = vpop.permute.xlu1 %2238  ;;  %vm2341_vm11 = vcmp.eq.s32.totalorder %v2246_v60, %v2330_v33  ;;  %v5010_v42 = vadd.f32 %v2532_v18, %v2363_v62  ;;  %v4227_v60 = vld [vmem:[%s4500_s12 + $0x4] sm:$0xf] }
 0x10a   : > { %vm2340_vm7 = vcmp.eq.s32.totalorder %v2239_v57, %v2326_v2  ;;  %v5002_v30 = vadd.f32 %v2531_v12, %v2362_v38  ;;  %v3860_v9 = vsel %vm2341_vm11, 1.0, %v4261_v47  ;;  %v2570_v22 = vsel %vm2085_vm10, %v4227_v60, %v4795_v21 }
 0x10b   : > { %v3859_v32 = vsel %vm2340_vm7, 1.0, %v4261_v47  ;;  %v2365_v40 = vmul.f32 -100000.0, %v3860_v9  ;;  %v2760_v49 = vrot.slane %v2570_v22, %v4514_v24  ;;  %v2824_v21 = vrot.slane %v2570_v22, %v5028_v53  ;;  %v4230_v9 = vld [vmem:[%s4500_s12 + $0xc] sm:$0xf] }
 0x10c   : > { %v2364_v27 = vmul.f32 -100000.0, %v3859_v32  ;;  %v2415_v43 = vpop.permute.xlu0 %2414  ;;  %v2569_v32 = vsel %vm2085_vm10, %v4228_v61, %v4797_v44 }
 0x10d   : > { %v2408_v25 = vpop.permute.xlu1 %2407  ;;  %vm2510_vm12 = vcmp.ne.s32.totalorder %v2415_v43, %v2499_v58  ;;  %v2636_v33 = vrot.slane %v2569_v32, %v4503_v20  ;;  %v2756_v18 = vrot.slane %v2569_v32, %v4514_v24  ;;  %vm2786_vm2 = vcmp.eq.s32.totalorder %v4844_v45, %v2760_v49 }
 0x10e   : > { %vm2509_vm9 = vcmp.ne.s32.totalorder %v2408_v25, %v2495_v48  ;;  %v3868_v41 = vsel %vm2510_vm12, 1.0, %v4261_v47  ;;  %v2640_v48 = vrot.slane %v2570_v22, %v4503_v20  ;;  %v2820_v44 = vrot.slane %v2569_v32, %v5028_v53 }
 0x10f   : > { %v3867_v1 = vsel %vm2509_vm9, 1.0, %v4261_v47  ;;  %v2534_v37 = vmul.f32 -10000000.0, %v3868_v41  ;;  %v3879_v43 = vsel %vm2786_vm2, 1.0, %v4261_v47  ;;  %vm2850_vm4 = vcmp.eq.s32.totalorder %v4830_v55, %v2824_v21 }
 0x110   : > { %v2533_v0 = vmul.f32 -10000000.0, %v3867_v1  ;;  %vm2666_vm15 = vcmp.eq.s32.totalorder %v4830_v55, %v2640_v48  ;;  %vm2665_vm5 = vcmp.eq.s32.totalorder %v4811_v36, %v2636_v33  ;;  %vm2785_vm6 = vcmp.eq.s32.totalorder %v4813_v39, %v2756_v18 }
 0x111   : > { %v2253_v4 = vpop.permute.xlu1 %2252  ;;  %v5019_v2 = vadd.f32 %v2534_v37, %v2365_v40  ;;  %v3871_v25 = vsel %vm2666_vm15, 1.0, %v4261_v47  ;;  %v3887_v40 = vsel %vm2850_vm4, 1.0, %v4261_v47  ;;  %v3870_v41 = vsel %vm2665_vm5, 1.0, %v4261_v47 }
 0x112   : > { %v5015_v38 = vadd.f32 %v2533_v0, %v2364_v27  ;;  %vm2342_vm13 = vcmp.eq.s32.totalorder %v2253_v4, %v2334_v34  ;;  %v5037_v27 = vsub.s32 3, %v4494_v19  ;;  %v4229_v34 = vld [vmem:[%s4500_s12 + $0x8] sm:$0xf]  ;;  %v2810_v1 = vadd.f32 %v3879_v43, %v3871_v25 }
 0x113   : > { %v3861_v50 = vsel %vm2342_vm13, 1.0, %v4261_v47  ;;  %v2571_v8 = vsel %vm2085_vm10, %v4229_v34, %v4832_v3  ;;  %v2572_v0 = vsel %vm2085_vm10, %v4230_v9, %v4862_v6  ;;  %v3878_v55 = vsel %vm2785_vm6, 1.0, %v4261_v47 }
 0x114   : > { %v2366_v62 = vmul.f32 -100000.0, %v3861_v50  ;;  %v2888_v58 = vrot.slane %v2570_v22, %v5037_v27  ;;  %v2884_v4 = vrot.slane %v2569_v32, %v5037_v27  ;;  %vm2849_vm7 = vcmp.eq.s32.totalorder %v4811_v36, %v2820_v44  ;;  %v4231_v22 = vld [vmem:[%s4500_s12 + $0x10] sm:$0xf]  ;;  %v4232_v44 = vld [vmem:[%s4500_s12 + $0x14] sm:$0xf] }
 0x115   : > { %v2422_v12 = vpop.permute.xlu1 %2421  ;;  %v2644_v37 = vrot.slane %v2571_v8, %v4503_v20  ;;  %v2648_v3 = vrot.slane %v2572_v0, %v4503_v20  ;;  %v2809_v6 = vadd.f32 %v3878_v55, %v3870_v41  ;;  %v2874_v50 = vadd.f32 %v3887_v40, %v2810_v1 }
 0x116   : > { %vm2511_vm14 = vcmp.ne.s32.totalorder %v2422_v12, %v2503_v59  ;;  %vm2914_vm8 = vcmp.eq.s32.totalorder %v4844_v45, %v2888_v58  ;;  %v2764_v59 = vrot.slane %v2571_v8, %v4514_v24  ;;  %v2768_v12 = vrot.slane %v2572_v0, %v4514_v24 }
 0x117   : > { %v3869_v57 = vsel %vm2511_vm14, 1.0, %v4261_v47  ;;  %vm2913_vm9 = vcmp.eq.s32.totalorder %v4813_v39, %v2884_v4  ;;  %vm2667_vm11 = vcmp.eq.s32.totalorder %v4846_v17, %v2644_v37  ;;  %v2832_v36 = vrot.slane %v2572_v0, %v5028_v53  ;;  %v4233_v37 = vld [vmem:[%s4500_s12 + $0x18] sm:$0xf] }
 0x118   : > { %v2535_v63 = vmul.f32 -10000000.0, %v3869_v57  ;;  %v3895_v57 = vsel %vm2914_vm8, 1.0, %v4261_v47  ;;  %vm2668_vm12 = vcmp.eq.s32.totalorder %v4881_v35, %v2648_v3  ;;  %vm2787_vm13 = vcmp.eq.s32.totalorder %v4864_v29, %v2764_v59 }
 0x119   : > { %v2938_v60 = vadd.f32 %v3895_v57, %v2874_v50  ;;  %vm2788_vm14 = vcmp.eq.s32.totalorder %v4887_v56, %v2768_v12  ;;  %v2573_v61 = vsel %vm2085_vm10, %v4231_v22, %v4889_v16  ;;  %v3894_v32 = vsel %vm2913_vm9, 1.0, %v4261_v47  ;;  %v4234_v22 = vld [vmem:[%s4500_s12 + $0x1c] sm:$0xf] }
 0x11a   : > { %v5022_v54 = vadd.f32 %v2535_v63, %v2366_v62  ;;  %v3886_v62 = vsel %vm2849_vm7, 1.0, %v4261_v47  ;;  %v2828_v63 = vrot.slane %v2571_v8, %v5028_v53  ;;  %v3872_v39 = vsel %vm2667_vm11, 1.0, %v4261_v47 }
 0x11b   : > { %v2873_v45 = vadd.f32 %v3886_v62, %v2809_v6  ;;  %v2892_v49 = vrot.slane %v2571_v8, %v5037_v27  ;;  %v3873_v33 = vsel %vm2668_vm12, 1.0, %v4261_v47  ;;  %v3880_v21 = vsel %vm2787_vm13, 1.0, %v4261_v47 }
 0x11c   : > { %vm5081_vm15 = vcmp.eq.s32.totalorder %v4846_v17, %v2828_v63  ;;  %v2896_v18 = vrot.slane %v2572_v0, %v5037_v27  ;;  %v2574_v16 = vsel %vm2085_vm10, %v4232_v44, %v4908_v51  ;;  %vm2852_vm2 = vcmp.eq.s32.totalorder %v4881_v35, %v2832_v36 }
 0x11d   : > { %v3881_v25 = vsel %vm2788_vm14, 1.0, %v4261_v47  ;;  %v2652_v17 = vrot.slane %v2573_v61, %v4503_v20  ;;  %v2772_v43 = vrot.slane %v2573_v61, %v4514_v24  ;;  %v2937_v58 = vadd.f32 %v3894_v32, %v2873_v45 }
 0x11e   : > { %v2946_v34 = vadd.f32 1e-09, %v2938_v60  ;;  %v2811_v8 = vadd.f32 %v3880_v21, %v3872_v39  ;;  %vm2915_vm4 = vcmp.eq.s32.totalorder %v4864_v29, %v2892_v49  ;;  %v2656_v1 = vrot.slane %v2574_v16, %v4503_v20 }
 0x11f   : > { %v2776_v9 = vrot.slane %v2574_v16, %v4514_v24  ;;  %v3888_v35 = vsel %vm5081_vm15, 1.0, %v4261_v47  ;;  %v3889_v51 = vsel %vm2852_vm2, 1.0, %v4261_v47  ;;  %v2812_v0 = vadd.f32 %v3881_v25, %v3873_v33 }
 0x120   : > { %vm2916_vm5 = vcmp.eq.s32.totalorder %v4887_v56, %v2896_v18  ;;  %v2836_v40 = vrot.slane %v2573_v61, %v5028_v53  ;;  %vm2669_vm6 = vcmp.eq.s32.totalorder %v4898_v13, %v2652_v17  ;;  %v2840_v29 = vrot.slane %v2574_v16, %v5028_v53 }
 0x121   : > { %vm2789_vm7 = vcmp.eq.s32.totalorder %v4910_v23, %v2772_v43  ;;  %v2945_v41 = vadd.f32 1e-09, %v2937_v58  ;;  %4163 = vlog2.f32 %v2946_v34  ;;  %v3896_v55 = vsel %vm2915_vm4, 1.0, %v4261_v47 }
 0x122   : > { %v2875_v4 = vadd.f32 %v3888_v35, %v2811_v8  ;;  %vm2670_vm8 = vcmp.eq.s32.totalorder %v4920_v26, %v2656_v1  ;;  %vm2790_vm9 = vcmp.eq.s32.totalorder %v4940_v31, %v2776_v9  ;;  %v2575_v56 = vsel %vm2085_vm10, %v4233_v37, %v4944_v46 }
 0x123   : > { %v2876_v3 = vadd.f32 %v3889_v51, %v2812_v0  ;;  %v3897_v59 = vsel %vm2916_vm5, 1.0, %v4261_v47  ;;  %v3874_v6 = vsel %vm2669_vm6, 1.0, %v4261_v47  ;;  %v3882_v50 = vsel %vm2789_vm7, 1.0, %v4261_v47 }
 0x124   : > { %vm2853_vm11 = vcmp.eq.s32.totalorder %v4898_v13, %v2836_v40  ;;  %vm2854_vm12 = vcmp.eq.s32.totalorder %v4920_v26, %v2840_v29  ;;  %v2900_v12 = vrot.slane %v2573_v61, %v5037_v27  ;;  %v2904_v62 = vrot.slane %v2574_v16, %v5037_v27 }
 0x125   : > { %v3875_v57 = vsel %vm2670_vm8, 1.0, %v4261_v47  ;;  %v3883_v46 = vsel %vm2790_vm9, 1.0, %v4261_v47  ;;  %v2660_v63 = vrot.slane %v2575_v56, %v4503_v20  ;;  %v2780_v36 = vrot.slane %v2575_v56, %v4514_v24 }
 0x126   : > { %4165 = vlog2.f32 %v2945_v41  ;;  %v2939_v45 = vadd.f32 %v3896_v55, %v2875_v4  ;;  %v2813_v60 = vadd.f32 %v3882_v50, %v3874_v6  ;;  %v2576_v13 = vsel %vm2085_vm10, %v4234_v22, %v4966_v10 }
 0x127   : > { %v2940_v26 = vadd.f32 %v3897_v59, %v2876_v3  ;;  %v3890_v61 = vsel %vm2853_vm11, 1.0, %v4261_v47  ;;  %v3891_v32 = vsel %vm2854_vm12, 1.0, %v4261_v47  ;;  %vm2917_vm13 = vcmp.eq.s32.totalorder %v4910_v23, %v2900_v12 }
 0x128   : > { %v2814_v39 = vadd.f32 %v3883_v46, %v3875_v57  ;;  %vm2918_vm14 = vcmp.eq.s32.totalorder %v4940_v31, %v2904_v62  ;;  %v2844_v48 = vrot.slane %v2575_v56, %v5028_v53  ;;  %vm2671_vm15 = vcmp.eq.s32.totalorder %v4955_v15, %v2660_v63 }
 0x129   : > { %v2664_v49 = vrot.slane %v2576_v13, %v4503_v20  ;;  %vm2791_vm2 = vcmp.eq.s32.totalorder %v4968_v52, %v2780_v36  ;;  %v2784_v10 = vrot.slane %v2576_v13, %v4514_v24  ;;  %v2947_v33 = vadd.f32 1e-09, %v2939_v45 }
 0x12a   : > { %v2877_v21 = vadd.f32 %v3890_v61, %v2813_v60  ;;  %v2948_v18 = vadd.f32 1e-09, %v2940_v26  ;;  %v3898_v44 = vsel %vm2917_vm13, 1.0, %v4261_v47  ;;  %v3899_v23 = vsel %vm2918_vm14, 1.0, %v4261_v47 }
 0x12b   : > { %v2878_v16 = vadd.f32 %v3891_v32, %v2814_v39  ;;  %v3876_v31 = vsel %vm2671_vm15, 1.0, %v4261_v47  ;;  %v2848_v25 = vrot.slane %v2576_v13, %v5028_v53  ;;  %v3884_v17 = vsel %vm2791_vm2, 1.0, %v4261_v47 }
 0x12c   : > { %vm2855_vm10 = vcmp.eq.s32.totalorder %v4955_v15, %v2844_v48  ;;  %vm2672_vm4 = vcmp.eq.s32.totalorder %v4974_v5, %v2664_v49  ;;  %v2908_v20 = vrot.slane %v2575_v56, %v5037_v27  ;;  %vm2792_vm5 = vcmp.eq.s32.totalorder %v4979_v28, %v2784_v10 }
 0x12d   : > { %4167 = vlog2.f32 %v2947_v33  ;;  %v2941_v43 = vadd.f32 %v3898_v44, %v2877_v21  ;;  %v2815_v58 = vadd.f32 %v3884_v17, %v3876_v31  ;;  %v2942_v34 = vadd.f32 %v3899_v23, %v2878_v16 }
 0x12e   : > { %v4164_v24 = vpop.eup %4163  ;;  %4169 = vlog2.f32 %v2948_v18  ;;  %v3892_v8 = vsel %vm2855_vm10, 1.0, %v4261_v47  ;;  %v3877_v53 = vsel %vm2672_vm4, 1.0, %v4261_v47  ;;  %v3885_v1 = vsel %vm2792_vm5, 1.0, %v4261_v47 }
 0x12f   : > { %vm2856_vm6 = vcmp.eq.s32.totalorder %v4974_v5, %v2848_v25  ;;  %vm2919_vm7 = vcmp.eq.s32.totalorder %v4968_v52, %v2908_v20  ;;  %v2912_v15 = vrot.slane %v2576_v13, %v5037_v27  ;;  %v2949_v9 = vadd.f32 1e-09, %v2941_v43 }
 0x130   : > { %v2879_v51 = vadd.f32 %v3892_v8, %v2815_v58  ;;  %v2816_v0 = vadd.f32 %v3885_v1, %v3877_v53  ;;  %v2950_v40 = vadd.f32 1e-09, %v2942_v34  ;;  %v3893_v29 = vsel %vm2856_vm6, 1.0, %v4261_v47 }
 0x131   : > { %v3900_v41 = vsel %vm2919_vm7, 1.0, %v4261_v47  ;;  %vm2920_vm8 = vcmp.eq.s32.totalorder %v4979_v28, %v2912_v15  ;;  %v2956_v55 = vmul.f32 0.6931472, %v4164_v24  ;;  %4171 = vlog2.f32 %v2949_v9 }
 0x132   : > { %v2943_v37 = vadd.f32 %v3900_v41, %v2879_v51  ;;  %v2880_v5 = vadd.f32 %v3893_v29, %v2816_v0  ;;  %4173 = vlog2.f32 %v2950_v40  ;;  %v3901_v52 = vsel %vm2920_vm8, 1.0, %v4261_v47 }
 0x133   : > { %v4166_v35 = vpop.eup %4165  ;;  %v2970_v59 = vsub.f32 %v4976_v14, %v2956_v55  ;;  %vm3516_vm9 = vcmask 57344  }
 0x134   : > { %v2954_v4 = vmul.f32 0.6931472, %v4166_v35  ;;  %v2951_v57 = vadd.f32 1e-09, %v2943_v37  ;;  %v2944_v28 = vadd.f32 %v3901_v52, %v2880_v5 }
 0x136   : > { %v2969_v12 = vsub.f32 %v4972_v7, %v2954_v4  ;;  %4175 = vlog2.f32 %v2951_v57  ;;  %v2952_v61 = vadd.f32 1e-09, %v2944_v28 }
 0x138   : > { %4177 = vlog2.f32 %v2952_v61 }
 0x13a   : > { %v4168_v62 = vpop.eup %4167 }
 0x13b   : > { %v4170_v36 = vpop.eup %4169  ;;  %v2958_v7 = vmul.f32 0.6931472, %v4168_v62 }
 0x13c   : > { %v2960_v39 = vmul.f32 0.6931472, %v4170_v36 }
 0x13d   : > { %v2971_v21 = vsub.f32 %v4995_v11, %v2958_v7 }
 0x13e   : > { %v4172_v18 = vpop.eup %4171  ;;  %v2972_v31 = vsub.f32 %v5002_v30, %v2960_v39 }
 0x13f   : > { %v4174_v25 = vpop.eup %4173  ;;  %v2962_v58 = vmul.f32 0.6931472, %v4172_v18 }
 0x140   : > { %v2964_v11 = vmul.f32 0.6931472, %v4174_v25 }
 0x141   : > { %v2973_v9 = vsub.f32 %v5010_v42, %v2962_v58 }
 0x142   : > { %v2974_v29 = vsub.f32 %v5015_v38, %v2964_v11 }
 0x143   : > { %v4176_v51 = vpop.eup %4175 }
 0x194   : > { %v1690_v27 = vpop.f32.mrf.mxu1 }
 0x195   : > { %v1967_v56 = vmul.f32 0.25, %v1690_v27  ;;  %v1645_v3 = vpop.f32.mrf.mxu0  ;;  %v2966_v27 = vmul.f32 0.6931472, %v4176_v51 }
 0x196   : > { %v1966_v6 = vmul.f32 0.25, %v1645_v3  ;;  %v3967_v50 = vpop.f32.mrf.mxu1 }
 0x197   : > { %v3961_v46 = vpop.f32.mrf.mxu0  ;;  %v5158_v63 = vadd.f32 %v2970_v59, %v1967_v56  ;;  %v4178_v56 = vpop.eup %4177  ;;  %v2975_v50 = vsub.f32 %v5019_v2, %v2966_v27  ;;  %v4093_v27 = vld [vmem:[%s1057_s28] ss:$0 sps:$4 sm:$0xff]  }
 0x198   : > { %v1693_v45 = vpop.f32.mrf.mxu1  ;;  %v5160_v60 = vadd.f32 %v2969_v12, %v1966_v6  ;;  %v2968_v12 = vmul.f32 0.6931472, %v4178_v56 }
 0x199   : > { %v1648_v22 = vpop.f32.mrf.mxu0  ;;  %v2988_v13 = vsel %vm1333_vm1, %v5158_v63, -inf }
 0x19a   : > { %v3968_v26 = vpop.f32.mrf.mxu1  ;;  %2989 = vmax.xlane.f32.xlu1 %v2988_v13  ;;  %v2985_v14 = vsel %vm1333_vm1, %v5160_v60, -inf  ;;  %v2976_v45 = vsub.f32 %v5022_v54, %v2968_v12 }
 0x19b   : > { %v3962_v32 = vpop.f32.mrf.mxu0  ;;  %2986 = vmax.xlane.f32.xlu0 %v2985_v14 }
 0x19d   : > { %v1735_v48 = vpop.f32.mrf.mxu0  ;;  %v1780_v49 = vpop.f32.mrf.mxu1 }
 0x19e   : > { %v1968_v10 = vmul.f32 0.25, %v1735_v48  ;;  %v1969_v33 = vmul.f32 0.25, %v1780_v49 }
 0x19f   : > { %v3973_v44 = vpop.f32.mrf.mxu0  ;;  %v3979_v23 = vpop.f32.mrf.mxu1 }
 0x1a0   : > { %v5167_v16 = vadd.f32 %v2971_v21, %v1968_v10  ;;  %v2980_v43 = vadd.f32 %v2972_v31, %v1969_v33 }
 0x1a1   : > { %v1738_v17 = vpop.f32.mrf.mxu0  ;;  %v1783_v20 = vpop.f32.mrf.mxu1 }
 0x1a2   : > { %v2991_v24 = vsel %vm1333_vm1, %v5167_v16, -inf  ;;  %v2994_v15 = vsel %vm1333_vm1, %v2980_v43, -inf }
 0x1a3   : > { %v3974_v34 = vpop.f32.mrf.mxu0  ;;  %v3980_v8 = vpop.f32.mrf.mxu1  ;;  %2992 = vmax.xlane.f32.xlu0 %v2991_v24 }
 0x1a5   : > { %v1825_v53 = vpop.f32.mrf.mxu0 }
 0x1a6   : > { %v1970_v1 = vmul.f32 0.25, %v1825_v53 }
 0x1a7   : > { %v1870_v35 = vpop.f32.mrf.mxu1  ;;  %v3985_v30 = vpop.f32.mrf.mxu0  ;;  %2995 = vmax.xlane.f32.xlu0 %v2994_v15 }
 0x1a8   : > { %v1971_v0 = vmul.f32 0.25, %v1870_v35  ;;  %v2981_v40 = vadd.f32 %v2973_v9, %v1970_v1 }
 0x1a9   : > { %v3991_v41 = vpop.f32.mrf.mxu1  ;;  %v1828_v55 = vpop.f32.mrf.mxu0 }
 0x1aa   : > { %v2997_v4 = vsel %vm1333_vm1, %v2981_v40, -inf  ;;  %v2982_v37 = vadd.f32 %v2974_v29, %v1971_v0 }
 0x1ab   : > { %v1873_v5 = vpop.f32.mrf.mxu1  ;;  %v3986_v52 = vpop.f32.mrf.mxu0  ;;  %2998 = vmax.xlane.f32.xlu0 %v2997_v4 }
 0x1ac   : > { %v3000_v42 = vsel %vm1333_vm1, %v2982_v37, -inf }
 0x1ad   : > { %v3992_v3 = vpop.f32.mrf.mxu1  ;;  %3001 = vmax.xlane.f32.xlu1 %v3000_v42  ;;  %v1236_v42 = vld [vmem:[%s5240_s26 + $0x4] sm:$0xf] }
 0x1ae   : > { %v1915_v59 = vpop.f32.mrf.mxu0 }
 0x1af   : > { %v1972_v6 = vmul.f32 0.25, %v1915_v59 }
 0x1b0   : > { %v3997_v38 = vpop.f32.mrf.mxu0 }
 0x1b1   : > { %v2983_v62 = vadd.f32 %v2975_v50, %v1972_v6  ;;  %v3840_v6 = vcombine.low %v1236_v42, %v1236_v42  ;;  %v1237_v50 = vld [vmem:[%s5240_s26 + $0x8] sm:$0xf] }
 0x1b2   : > { %v1960_v57 = vpop.f32.mrf.mxu1  ;;  %v1918_v28 = vpop.f32.mrf.mxu0 }
 0x1b3   : > { %v1973_v46 = vmul.f32 0.25, %v1960_v57  ;;  %v3003_v36 = vsel %vm1333_vm1, %v2983_v62, -inf  ;;  %v1584_v12 = vsel %vm1268_vm0, %v1237_v50, %v3840_v6  ;;  %v5388_v28 = vlaneseq  ;;  %v1241_v6 = vld [vmem:[%s5240_s26 + $0x18] sm:$0xf] }
 0x1b4   : > { %v4003_v22 = vpop.f32.mrf.mxu1  ;;  %v3998_v13 = vpop.f32.mrf.mxu0  ;;  %3004 = vmax.xlane.f32.xlu0 %v3003_v36 }
 0x1b5   : > { %v2984_v26 = vadd.f32 %v2976_v45, %v1973_v46  ;;  %v3475_v46 = vand.u32 127, %v5388_v28  ;;  %v3841_v45 = vcombine.low %v1237_v50, %v1237_v50  ;;  %v1238_v13 = vld [vmem:[%s5240_s26 + $0xc] sm:$0xf]  ;;  %v3845_v28 = vcombine.low %v1241_v6, %v1241_v6 }
 0x1b6   : > { %v1963_v14 = vpop.f32.mrf.mxu1 }
 0x1b7   : > { %v3006_v7 = vsel %vm1333_vm1, %v2984_v26, -inf }
 0x1b8   : > { %v4004_v61 = vpop.f32.mrf.mxu1  ;;  %3007 = vmax.xlane.f32.xlu1 %v3006_v7 }
 0x1b9   : > { %v5262_v61 = vsub.s32 %v3475_v46, %v4494_v19 }
 0x223   : > { %v5181_v2 = vpop.xlane.xlu1 %2989 }
 0x224   : > { %v3010_v32 = vsub.f32 %v5158_v63, %v5181_v2  ;;  %v5185_v39 = vpop.xlane.xlu0 %2986 }
 0x225   : > { %v3009_v48 = vsub.f32 %v5160_v60, %v5185_v39 }
 0x226   : > { %v3019_v54 = vmul.f32 1.442695, %v3010_v32 }
 0x227   : > { %v3017_v49 = vmul.f32 1.442695, %v3009_v48 }
 0x228   : > { %4179 = vpow2.f32 %v3019_v54 }
 0x229   : > { %4181 = vpow2.f32 %v3017_v49 }
 0x22c   : > { %v5189_v10 = vpop.xlane.xlu0 %2992 }
 0x22d   : > { %v3011_v33 = vsub.f32 %v5167_v16, %v5189_v10 }
 0x22f   : > { %v3021_v21 = vmul.f32 1.442695, %v3011_v33 }
 0x230   : > { %v5193_v18 = vpop.xlane.xlu0 %2995 }
 0x231   : > { %4183 = vpow2.f32 %v3021_v21  ;;  %v3012_v63 = vsub.f32 %v2980_v43, %v5193_v18  ;;  %v1588_v21 = vsel %vm1268_vm0, %v1238_v13, %v3841_v45  ;;  %v1242_v45 = vld [vmem:[%s5240_s26 + $0x1c] sm:$0xf] }
 0x233   : > { %v3023_v44 = vmul.f32 1.442695, %v3012_v63 }
 0x234   : > { %v5196_v23 = vpop.xlane.xlu0 %2998 }
 0x235   : > { %v5198_v31 = vpop.eup %4179  ;;  %4185 = vpow2.f32 %v3023_v44  ;;  %v3013_v60 = vsub.f32 %v2981_v40, %v5196_v23 }
 0x236   : > { %v5201_v25 = vpop.eup %4181  ;;  %v5203_v17 = vpop.xlane.xlu1 %3001  ;;  %v3036_v16 = vsel %vm1333_vm1, %v5198_v31, 0.0 }
 0x237   : > { %v3025_v20 = vmul.f32 1.442695, %v3013_v60  ;;  %v3014_v24 = vsub.f32 %v2982_v37, %v5203_v17  ;;  %3037 = vadd.xlane.f32.xlu1 %v3036_v16  ;;  %v3033_v43 = vsel %vm1333_vm1, %v5201_v25, 0.0  ;;  %v1235_v37 = vld [vmem:[%s5240_s26] sm:$0xf]  ;;  %v3842_v16 = vcombine.low %v1238_v13, %v1238_v13 }
 0x238   : > { %3034 = vadd.xlane.f32.xlu0 %v3033_v43  ;;  %v3839_v52 = vcombine.low %v1235_v37, %v1235_v37  ;;  %v1576_v59 = vsel %vm1268_vm0, %v1235_v37, %v4093_v27  ;;  %v1239_v43 = vld [vmem:[%s5240_s26 + $0x10] sm:$0xf] }
 0x239   : > { %4187 = vpow2.f32 %v3025_v20  ;;  %v3027_v58 = vmul.f32 1.442695, %v3014_v24  ;;  %4006 = vmatpush3.bf16.msra.mxu0 %v1576_v59 }
 0x23a   : > { %v1580_v3 = vsel %vm1268_vm0, %v1236_v42, %v3839_v52  ;;  %4017 = vmatprep.subr.bf16.mxu0 %v4261_v47 }
 0x23b   : > { %4189 = vpow2.f32 %v3027_v58  ;;  %4012 = vmatpush3.bf16.msra.mxu1 %v1580_v3 }
 0x23c   : > { %4023 = vmatprep.subr.bf16.mxu1 %v4261_v47 }
 0x23d   : > { %v5210_v34 = vpop.xlane.xlu0 %3004 }
 0x23e   : > { %v5212_v8 = vpop.eup %4183  ;;  %v3015_v11 = vsub.f32 %v2983_v62, %v5210_v34 }
 0x23f   : > { %v3039_v53 = vsel %vm1333_vm1, %v5212_v8, 0.0 }
 0x240   : > { %v3029_v1 = vmul.f32 1.442695, %v3015_v11  ;;  %3040 = vadd.xlane.f32.xlu0 %v3039_v53 }
 0x241   : > { %v5217_v15 = vpop.xlane.xlu1 %3007 }
 0x242   : > { %v5219_v9 = vpop.eup %4185  ;;  %4191 = vpow2.f32 %v3029_v1  ;;  %v3016_v35 = vsub.f32 %v2984_v26, %v5217_v15  ;;  %v3843_v1 = vcombine.low %v1239_v43, %v1239_v43 }
 0x243   : > { %v3042_v30 = vsel %vm1333_vm1, %v5219_v9, 0.0 }
 0x244   : > { %v3031_v51 = vmul.f32 1.442695, %v3016_v35  ;;  %3043 = vadd.xlane.f32.xlu1 %v3042_v30 }
 0x246   : > { %v5224_v0 = vpop.eup %4187  ;;  %4193 = vpow2.f32 %v3031_v51  ;;  %v1592_v51 = vsel %vm1268_vm0, %v1239_v43, %v3842_v16 }
 0x247   : > { %v3045_v40 = vsel %vm1333_vm1, %v5224_v0, 0.0 }
 0x248   : > { %v5228_v29 = vpop.eup %4189  ;;  %3046 = vadd.xlane.f32.xlu0 %v3045_v40  ;;  %v1240_v40 = vld [vmem:[%s5240_s26 + $0x14] sm:$0xf] }
 0x249   : > { %v3048_v41 = vsel %vm1333_vm1, %v5228_v29, 0.0 }
 0x24a   : > { %3049 = vadd.xlane.f32.xlu1 %v3048_v41 }
 0x24f   : > { %v5232_v55 = vpop.eup %4191 }
 0x250   : > { %v3051_v4 = vsel %vm1333_vm1, %v5232_v55, 0.0 }
 0x251   : > { %3052 = vadd.xlane.f32.xlu0 %v3051_v4 }
 0x253   : > { %v5247_v5 = vpop.eup %4193 }
 0x254   : > { %v3054_v56 = vsel %vm1333_vm1, %v5247_v5, 0.0 }
 0x255   : > { %3055 = vadd.xlane.f32.xlu1 %v3054_v56 }
 0x2c0   : > { %v3038_v38 = vpop.xlane.xlu1 %3037 }
 0x2c1   : > { %4195 = vrcp.f32 %v3038_v38  ;;  %v3035_v62 = vpop.xlane.xlu0 %3034 }
 0x2c2   : > { %4197 = vlog2.f32 %v3038_v38 }
 0x2c3   : > { %4199 = vrcp.f32 %v3035_v62 }
 0x2c4   : > { %4201 = vlog2.f32 %v3035_v62 }
 0x2c9   : > { %v3041_v57 = vpop.xlane.xlu0 %3040 }
 0x2ca   : > { %4203 = vrcp.f32 %v3041_v57 }
 0x2cb   : > { %4205 = vlog2.f32 %v3041_v57 }
 0x2cd   : > { %v3044_v36 = vpop.xlane.xlu1 %3043 }
 0x2ce   : > { %v4196_v22 = vpop.eup %4195  ;;  %4207 = vrcp.f32 %v3044_v36 }
 0x2cf   : > { %v4198_v26 = vpop.eup %4197  ;;  %4209 = vlog2.f32 %v3044_v36  ;;  %v3066_v14 = vmul.f32 %v4196_v22, %v5198_v31 }
 0x2d0   : > { %v4200_v7 = vpop.eup %4199  ;;  %v3445_v32 = vmul.f32 0.6931472, %v4198_v26 }
 0x2d1   : > { %v4202_v48 = vpop.eup %4201  ;;  %v3047_v54 = vpop.xlane.xlu0 %3046  ;;  %v3074_v49 = vpack.c.bf16 %v3066_v14, %v3066_v14  ;;  %v3065_v33 = vmul.f32 %v4200_v7, %v5201_v25 }
 0x2d2   : > { %v3459_v63 = vadd.f32 %v3445_v32, %v5181_v2  ;;  %v3443_v44 = vmul.f32 0.6931472, %v4202_v48  ;;  %4211 = vrcp.f32 %v3047_v54 }
 0x2d3   : > { %4213 = vlog2.f32 %v3047_v54  ;;  %v3050_v19 = vpop.xlane.xlu1 %3049  ;;  %4014 = vmatmul.mubr.msk.bf16.vlgmr.msra.gmra.mxu1 %vm1333_vm1, %v3074_v49  ;;  %v3073_v31 = vpack.c.bf16 %v3065_v33, %v3065_v33 }
 0x2d4   : > { %v3483_v60 = vrot.slane %v3459_v63, %v5262_v61  ;;  %v3458_v25 = vadd.f32 %v3443_v44, %v5185_v39  ;;  %4215 = vrcp.f32 %v3050_v19  ;;  %4024 = vmatpush3.bf16.msra.mxu1 %v1588_v21  ;;  %4025 = vmatprep.mubr.msk.bf16.mxu1 %vm4262_vm3, %v4261_v47 }
 0x2d5   : > { %4217 = vlog2.f32 %v3050_v19  ;;  %4008 = vmatmul.mubr.msk.bf16.vlgmr.msra.gmra.mxu0 %vm1333_vm1, %v3073_v31  ;;  %4035 = vmatprep.subr.bf16.mxu1 %v4261_v47 }
 0x2d6   : > { %3518 = vst.msk [vmem:[%s5271_s30 + $0x1] sm:$0x1] %vm3516_vm9, %v3483_v60  ;;  %v3479_v2 = vrot.slane %v3458_v25, %v5262_v61  ;;  %4018 = vmatpush3.bf16.msra.mxu0 %v1584_v12  ;;  %4019 = vmatprep.mubr.msk.bf16.mxu0 %vm4262_vm3, %v4261_v47 }
 0x2d7   : > { %v4204_v39 = vpop.eup %4203  ;;  %4029 = vmatprep.subr.bf16.mxu0 %v4261_v47 }
 0x2d8   : > { %v4206_v20 = vpop.eup %4205  ;;  %3517 = vst.msk [vmem:[%s5271_s30] sm:$0x1] %vm3516_vm9, %v3479_v2  ;;  %v3067_v24 = vmul.f32 %v4204_v39, %v5212_v8 }
 0x2d9   : > { %v3447_v58 = vmul.f32 0.6931472, %v4206_v20 }
 0x2da   : > { %v3053_v11 = vpop.xlane.xlu0 %3052  ;;  %v3075_v53 = vpack.c.bf16 %v3067_v24, %v3067_v24 }
 0x2db   : > { %v4208_v35 = vpop.eup %4207  ;;  %v3460_v30 = vadd.f32 %v3447_v58, %v5189_v10  ;;  %4219 = vrcp.f32 %v3053_v11  ;;  %v1596_v10 = vsel %vm1268_vm0, %v1240_v40, %v3843_v1 }
 0x2dc   : > { %v4210_v41 = vpop.eup %4209  ;;  %4221 = vlog2.f32 %v3053_v11  ;;  %v3068_v4 = vmul.f32 %v4208_v35, %v5219_v9  ;;  %v3844_v9 = vcombine.low %v1240_v40, %v1240_v40 }
 0x2dd   : > { %v3487_v37 = vrot.slane %v3460_v30, %v5262_v61  ;;  %v3449_v8 = vmul.f32 0.6931472, %v4210_v41  ;;  %4020 = vmatmul.mubr.msk.bf16.vlgmr.msra.gmra.mxu0 %vm1333_vm1, %v3075_v53 }
 0x2de   : > { %v3056_v52 = vpop.xlane.xlu1 %3055  ;;  %v3076_v27 = vpack.c.bf16 %v3068_v4, %v3068_v4  ;;  %4030 = vmatpush3.bf16.msra.mxu0 %v1592_v51  ;;  %4031 = vmatprep.mubr.msk.bf16.mxu0 %vm4262_vm3, %v4261_v47  ;;  %v1600_v36 = vsel %vm1268_vm0, %v1241_v6, %v3844_v9 }
 0x2df   : > { %v4212_v56 = vpop.eup %4211  ;;  %3519 = vst.msk [vmem:[%s5271_s30 + $0x2] sm:$0x1] %vm3516_vm9, %v3487_v37  ;;  %v3461_v42 = vadd.f32 %v3449_v8, %v5193_v18  ;;  %4223 = vrcp.f32 %v3056_v52  ;;  %4041 = vmatprep.subr.bf16.mxu0 %v4261_v47 }
 0x2e0   : > { %v4214_v3 = vpop.eup %4213  ;;  %4225 = vlog2.f32 %v3056_v52  ;;  %4026 = vmatmul.mubr.msk.bf16.vlgmr.msra.gmra.mxu1 %vm1333_vm1, %v3076_v27  ;;  %v3069_v59 = vmul.f32 %v4212_v56, %v5224_v0 }
 0x2e1   : > { %v4216_v50 = vpop.eup %4215  ;;  %v3491_v12 = vrot.slane %v3461_v42, %v5262_v61  ;;  %v3451_v38 = vmul.f32 0.6931472, %v4214_v3  ;;  %4036 = vmatpush3.bf16.msra.mxu1 %v1596_v10  ;;  %4037 = vmatprep.mubr.msk.bf16.mxu1 %vm4262_vm3, %v4261_v47 }
 0x2e2   : > { %v4218_v18 = vpop.eup %4217  ;;  %v3077_v62 = vpack.c.bf16 %v3069_v59, %v3069_v59  ;;  %v3070_v57 = vmul.f32 %v4216_v50, %v5228_v29  ;;  %4047 = vmatprep.subr.bf16.mxu1 %v4261_v47  ;;  %v1604_v29 = vsel %vm1268_vm0, %v1242_v45, %v3845_v28  ;;  %vm3433_vm0 = vcmask 125952  }
 0x2e3   : > { %3520 = vst.msk [vmem:[%s5271_s30 + $0x3] sm:$0x1] %vm3516_vm9, %v3491_v12  ;;  %v3462_v0 = vadd.f32 %v3451_v38, %v5196_v23  ;;  %v3453_v46 = vmul.f32 0.6931472, %v4218_v18 }
 0x2e4   : > { %v3078_v26 = vpack.c.bf16 %v3070_v57, %v3070_v57 }
 0x2e5   : > { %v3495_v22 = vrot.slane %v3462_v0, %v5262_v61  ;;  %v3463_v13 = vadd.f32 %v3453_v46, %v5203_v17  ;;  %4032 = vmatmul.mubr.msk.bf16.vlgmr.msra.gmra.mxu0 %vm1333_vm1, %v3077_v62 }
 0x2e6   : > { %4042 = vmatpush3.bf16.msra.mxu0 %v1600_v36  ;;  %4043 = vmatprep.mubr.msk.bf16.mxu0 %vm4262_vm3, %v4261_v47 }
 0x2e7   : > { %3521 = vst.msk [vmem:[%s5271_s30 + $0x4] sm:$0x1] %vm3516_vm9, %v3495_v22  ;;  %v3499_v23 = vrot.slane %v3463_v13, %v5262_v61 }
 0x2e8   : > { %v4220_v14 = vpop.eup %4219  ;;  %4038 = vmatmul.mubr.msk.bf16.vlgmr.msra.gmra.mxu1 %vm1333_vm1, %v3078_v26 }
 0x2e9   : > { %v4222_v7 = vpop.eup %4221  ;;  %3522 = vst.msk [vmem:[%s5271_s30 + $0x5] sm:$0x1] %vm3516_vm9, %v3499_v23  ;;  %4048 = vmatpush3.bf16.msra.mxu1 %v1604_v29  ;;  %v3071_v17 = vmul.f32 %v4220_v14, %v5232_v55  ;;  %4049 = vmatprep.mubr.msk.bf16.mxu1 %vm4262_vm3, %v4261_v47 }
 0x2ea   : > { %v3455_v32 = vmul.f32 0.6931472, %v4222_v7 }
 0x2eb   : > { %v3079_v48 = vpack.c.bf16 %v3071_v17, %v3071_v17 }
 0x2ec   : > { %v4224_v54 = vpop.eup %4223  ;;  %v3464_v49 = vadd.f32 %v3455_v32, %v5210_v34 }
 0x2ed   : > { %v4226_v33 = vpop.eup %4225  ;;  %4044 = vmatmul.mubr.msk.bf16.vlgmr.msra.gmra.mxu0 %vm1333_vm1, %v3079_v48  ;;  %v3072_v21 = vmul.f32 %v4224_v54, %v5247_v5 }
 0x2ee   : > { %v3503_v63 = vrot.slane %v3464_v49, %v5262_v61  ;;  %v3457_v44 = vmul.f32 0.6931472, %v4226_v33 }
 0x2ef   : > { %v3080_v19 = vpack.c.bf16 %v3072_v21, %v3072_v21 }
 0x2f0   : > { %3523 = vst.msk [vmem:[%s5271_s30 + $0x6] sm:$0x1] %vm3516_vm9, %v3503_v63  ;;  %v3465_v55 = vadd.f32 %v3457_v44, %v5217_v15 }
 0x2f1   : > { %4050 = vmatmul.mubr.msk.bf16.vlgmr.msra.gmra.mxu1 %vm1333_vm1, %v3080_v19 }
 0x2f2   : > { %v3507_v47 = vrot.slane %v3465_v55, %v5262_v61 }
 0x2f4   : > { %3524 = vst.msk [vmem:[%s5271_s30 + $0x7] sm:$0x1] %vm3516_vm9, %v3507_v47 }
 0x393   : > { %v3161_v34 = vpop.f32.mrf.mxu1 }
 0x394   : > { %v3426_v5 = vpack.c.bf16 %v3161_v34, %v3161_v34 }
 0x395   : > { %v3118_v31 = vpop.f32.mrf.mxu0  ;;  %v4015_v60 = vpop.f32.mrf.mxu1 }
 0x396   : > { %3435 = vst.msk [vmem:[%s5346_s14 + $0x4] sm:$0xf] %vm3433_vm0, %v3426_v5  ;;  %v3425_v15 = vpack.c.bf16 %v3118_v31, %v3118_v31 }
 0x397   : > { %v4009_v61 = vpop.f32.mrf.mxu0  ;;  %v3164_v25 = vpop.f32.mrf.mxu1 }
 0x398   : > { %3434 = vst.msk [vmem:[%s5346_s14] sm:$0xf] %vm3433_vm0, %v3425_v15 }
 0x399   : > { %v3121_v2 = vpop.f32.mrf.mxu0  ;;  %v4016_v39 = vpop.f32.mrf.mxu1 }
 0x39b   : > { %v4010_v16 = vpop.f32.mrf.mxu0 }
 0x39d   : > { %v3204_v20 = vpop.f32.mrf.mxu0 }
 0x39e   : > { %v3427_v24 = vpack.c.bf16 %v3204_v20, %v3204_v20 }
 0x39f   : > { %v4021_v43 = vpop.f32.mrf.mxu0 }
 0x3a0   : > { %3436 = vst.msk [vmem:[%s5346_s14 + $0x8] sm:$0xf] %vm3433_vm0, %v3427_v24  ;;  %v3247_v58 = vpop.f32.mrf.mxu1 }
 0x3a1   : > { %v3207_v11 = vpop.f32.mrf.mxu0  ;;  %v3428_v53 = vpack.c.bf16 %v3247_v58, %v3247_v58 }
 0x3a2   : > { %v4027_v1 = vpop.f32.mrf.mxu1 }
 0x3a3   : > { %3437 = vst.msk [vmem:[%s5346_s14 + $0xc] sm:$0xf] %vm3433_vm0, %v3428_v53  ;;  %v4022_v35 = vpop.f32.mrf.mxu0 }
 0x3a4   : > { %v3250_v30 = vpop.f32.mrf.mxu1 }
 0x3a5   : > { %v3290_v51 = vpop.f32.mrf.mxu0 }
 0x3a6   : > { %v3429_v40 = vpack.c.bf16 %v3290_v51, %v3290_v51  ;;  %v4028_v41 = vpop.f32.mrf.mxu1 }
 0x3a7   : > { %v4033_v4 = vpop.f32.mrf.mxu0 }
 0x3a8   : > { %3438 = vst.msk [vmem:[%s5346_s14 + $0x10] sm:$0xf] %vm3433_vm0, %v3429_v40  ;;  %v3333_v37 = vpop.f32.mrf.mxu1 }
 0x3a9   : > { %v3293_v8 = vpop.f32.mrf.mxu0  ;;  %v3430_v52 = vpack.c.bf16 %v3333_v37, %v3333_v37 }
 0x3aa   : > { %v4039_v27 = vpop.f32.mrf.mxu1 }
 0x3ab   : > { %3439 = vst.msk [vmem:[%s5346_s14 + $0x14] sm:$0xf] %vm3433_vm0, %v3430_v52  ;;  %v4034_v10 = vpop.f32.mrf.mxu0 }
 0x3ac   : > { %v3336_v56 = vpop.f32.mrf.mxu1 }
 0x3ad   : > { %v3376_v42 = vpop.f32.mrf.mxu0 }
 0x3ae   : > { %v3431_v9 = vpack.c.bf16 %v3376_v42, %v3376_v42  ;;  %v4040_v3 = vpop.f32.mrf.mxu1 }
 0x3af   : > { %v4045_v59 = vpop.f32.mrf.mxu0 }
 0x3b0   : > { %3440 = vst.msk [vmem:[%s5346_s14 + $0x18] sm:$0xf] %vm3433_vm0, %v3431_v9 }
 0x3b1   : > { %v3379_v6 = vpop.f32.mrf.mxu0  ;;  %v3419_v50 = vpop.f32.mrf.mxu1 }
 0x3b2   : > { %v3432_v12 = vpack.c.bf16 %v3419_v50, %v3419_v50 }
 0x3b3   : > { %v4046_v38 = vpop.f32.mrf.mxu0  ;;  %v4051_v18 = vpop.f32.mrf.mxu1 }
 0x3b4   : > { %3441 = vst.msk [vmem:[%s5346_s14 + $0x1c] sm:$0xf] %vm3433_vm0, %v3432_v12 }
 0x3b5   : > { %v3422_v62 = vpop.f32.mrf.mxu1 }
 0x3b7   : > { %v4052_v57 = vpop.f32.mrf.mxu1 }
 0x3b8 PF: > { %s22_s19 = sadd.s32 1, %s4257_s19   ;;  %s5389_s17 = smov %s4253_s18 }
 0x3b9   : > { %p19_p5 = scmp.ge.s32.totalorder %s22_s19, 6   ;;  %s5390_s18 = smov %s5392_s20 }
 0x3bb   :  { %21 = sbr.rel (!%p19_p5) target bundleno = 2 (0x2), region = 129 }

// kernel: reformer_forward.16
= control target key start
LH: loop header
LB: loop body
LE: loop exit
PB: predicated region body
PF: predicated region fallthrough
CT: control target
= control target key end

     0   :  { %vm66_vm0 = vcmask 261120   ;;  %vm176_vm1 = vcmask 125952   ;;  %s317_s1 = inlined_call_operand.vmem [shape: bf16[32,16], index: 1, kind: input, shape index: {}]   ;;  %s318_s0 = inlined_call_operand.vmem [shape: bf16[64,32], index: 0, kind: input, shape index: {}]   ;;  %s319_s2 = inlined_call_operand.vmem [shape: f32[1,16], index: 2, kind: input, shape index: {}]   ;;  %s320_s3 = inlined_call_operand.vmem [shape: bf16[64,16], index: 3, kind: output, shape index: {}]  }
   0x1   :  { %v238_v0 = vld [vmem:[%s317_s1 + $0x8] sm:$0xff]   ;;  %v239_v1 = vld [vmem:[%s317_s1] sm:$0xff]   ;;  %v241_v3 = vld [vmem:[%s318_s0 + $0x10] sm:$0xff]  }
   0x2   :  { %222 = vmatprep.subr.bf16.mxu0 %v238_v0  ;;  %234 = vmatprep.subr.bf16.mxu1 %v238_v0  ;;  %v240_v2 = vld [vmem:[%s318_s0] sm:$0xff]   ;;  %v242_v4 = vld [vmem:[%s318_s0 + $0x8] sm:$0xff]   ;;  %v243_v5 = vld [vmem:[%s318_s0 + $0x18] sm:$0xff]  }
   0x3   :  { %223 = vmatpush3.bf16.msra.mxu0 %v238_v0  ;;  %236 = vmatpush3.bf16.msra.mxu1 %v238_v0  ;;  %v189_v6 = vld [vmem:[%s319_s2] ss:$0 sm:$0xff] }
   0x4   :  { %224 = vmatprep.subr.bf16.mxu0 %v239_v1  ;;  %235 = vmatprep.subr.bf16.mxu1 %v239_v1 }
   0x5   :  { %226 = vmatprep.mubr.msk.bf16.mxu0 %vm66_vm0, %v240_v2  ;;  %230 = vmatprep.mubr.msk.bf16.mxu1 %vm66_vm0, %v241_v3 }
   0x7   :  { %225 = vmatpush3.bf16.msra.mxu0 %v239_v1  ;;  %237 = vmatpush3.bf16.msra.mxu1 %v239_v1 }
   0xa   :  { %227 = vmatmul.mubr.msk.bf16.vlgmr.msra.gmra.mxu0 %vm66_vm0, %v242_v4  ;;  %231 = vmatmul.mubr.msk.bf16.vlgmr.msra.gmra.mxu1 %vm66_vm0, %v243_v5 }
  0xca   :  { %v228_v7 = vpop.f32.mrf.mxu0  ;;  %v232_v8 = vpop.f32.mrf.mxu1 }
  0xcb   :  { %v122_v9 = vadd.f32 %v228_v7, %v189_v6  ;;  %v138_v10 = vadd.f32 %v232_v8, %v189_v6 }
  0xcc   :  { %v113_v11 = vpop.f32.mrf.mxu0  ;;  %v129_v12 = vpop.f32.mrf.mxu1 }
  0xcd   :  { %v210_v13 = vpack.c.bf16 %v122_v9, %v122_v9  ;;  %v214_v14 = vpack.c.bf16 %v138_v10, %v138_v10  ;;  %v114_v15 = vadd.f32 %v189_v6, %v113_v11  ;;  %v130_v16 = vadd.f32 %v189_v6, %v129_v12 }
  0xce   :  { %v229_v17 = vpop.f32.mrf.mxu0  ;;  %v233_v18 = vpop.f32.mrf.mxu1 }
  0xcf   :  { %179 = vst.msk [vmem:[%s320_s3 + $0x8] sm:$0xf] %vm176_vm1, %v210_v13  ;;  %183 = vst.msk [vmem:[%s320_s3 + $0x18] sm:$0xf] %vm176_vm1, %v214_v14  ;;  %v208_v19 = vpack.c.bf16 %v114_v15, %v114_v15  ;;  %v212_v20 = vpack.c.bf16 %v130_v16, %v130_v16  ;;  %v125_v21 = vadd.f32 %v229_v17, %v189_v6 }
  0xd0   :  { %v141_v22 = vadd.f32 %v233_v18, %v189_v6  ;;  %v116_v23 = vpop.f32.mrf.mxu0  ;;  %v132_v24 = vpop.f32.mrf.mxu1 }
  0xd1   :  { %177 = vst.msk [vmem:[%s320_s3] sm:$0xf] %vm176_vm1, %v208_v19  ;;  %181 = vst.msk [vmem:[%s320_s3 + $0x10] sm:$0xf] %vm176_vm1, %v212_v20  ;;  %v211_v25 = vpack.c.bf16 %v125_v21, %v125_v21  ;;  %v117_v27 = vadd.f32 %v189_v6, %v116_v23  ;;  %v133_v28 = vadd.f32 %v189_v6, %v132_v24 }
  0xd2   :  { %v215_v26 = vpack.c.bf16 %v141_v22, %v141_v22 }
  0xd3   :  { %180 = vst.msk [vmem:[%s320_s3 + $0xc] sm:$0xf] %vm176_vm1, %v211_v25  ;;  %v209_v29 = vpack.c.bf16 %v117_v27, %v117_v27  ;;  %v213_v30 = vpack.c.bf16 %v133_v28, %v133_v28 }
  0xd4   :  { %184 = vst.msk [vmem:[%s320_s3 + $0x1c] sm:$0xf] %vm176_vm1, %v215_v26 }
  0xd5   :  { %178 = vst.msk [vmem:[%s320_s3 + $0x4] sm:$0xf] %vm176_vm1, %v209_v29  ;;  %182 = vst.msk [vmem:[%s320_s3 + $0x14] sm:$0xf] %vm176_vm1, %v213_v30 }

// kernel: reformer_forward.18
= control target key start
LH: loop header
LB: loop body
LE: loop exit
PB: predicated region body
PF: predicated region fallthrough
CT: control target
= control target key end

     0   :  { %vm82_vm0 = vcmask 523264   ;;  %vm192_vm1 = vcmask 125952   ;;  %s357_s1 = inlined_call_operand.vmem [shape: bf16[64,16], index: 1, kind: input, shape index: {}]   ;;  %s358_s0 = inlined_call_operand.vmem [shape: bf16[64,64], index: 0, kind: input, shape index: {}]   ;;  %s359_s2 = inlined_call_operand.vmem [shape: f32[1,16], index: 2, kind: input, shape index: {}]   ;;  %s360_s3 = inlined_call_operand.vmem [shape: bf16[64,16], index: 3, kind: output, shape index: {}]  }
   0x1   :  { %v266_v0 = vld [vmem:[%s357_s1 + $0x18] sm:$0xff]   ;;  %v267_v1 = vld [vmem:[%s357_s1 + $0x10] sm:$0xff]   ;;  %v268_v2 = vld [vmem:[%s357_s1 + $0x8] sm:$0xff]  }
   0x2   :  { %242 = vmatprep.subr.bf16.mxu0 %v266_v0  ;;  %258 = vmatprep.subr.bf16.mxu1 %v266_v0  ;;  %v270_v3 = vld [vmem:[%s358_s0] sm:$0xff]   ;;  %v271_v4 = vld [vmem:[%s358_s0 + $0x10] sm:$0xff]   ;;  %v272_v6 = vld [vmem:[%s358_s0 + $0x8] sm:$0xff]  }
   0x3   :  { %243 = vmatpush3.bf16.msra.mxu0 %v266_v0  ;;  %262 = vmatpush3.bf16.msra.mxu1 %v266_v0  ;;  %v269_v5 = vld [vmem:[%s357_s1] sm:$0xff]   ;;  %v273_v7 = vld [vmem:[%s358_s0 + $0x18] sm:$0xff]  }
   0x4   :  { %244 = vmatprep.subr.bf16.mxu0 %v267_v1  ;;  %259 = vmatprep.subr.bf16.mxu1 %v267_v1  ;;  %v205_v8 = vld [vmem:[%s359_s2] ss:$0 sm:$0xff] }
   0x5   :  { %250 = vmatprep.mubr.msk.bf16.mxu0 %vm82_vm0, %v270_v3  ;;  %254 = vmatprep.mubr.msk.bf16.mxu1 %vm82_vm0, %v271_v4 }
   0x7   :  { %245 = vmatpush3.bf16.msra.mxu0 %v267_v1  ;;  %263 = vmatpush3.bf16.msra.mxu1 %v267_v1 }
   0x8   :  { %246 = vmatprep.subr.bf16.mxu0 %v268_v2  ;;  %260 = vmatprep.subr.bf16.mxu1 %v268_v2 }
   0xb   :  { %247 = vmatpush3.bf16.msra.mxu0 %v268_v2  ;;  %264 = vmatpush3.bf16.msra.mxu1 %v268_v2 }
   0xc   :  { %248 = vmatprep.subr.bf16.mxu0 %v269_v5  ;;  %261 = vmatprep.subr.bf16.mxu1 %v269_v5 }
   0xf   :  { %249 = vmatpush3.bf16.msra.mxu0 %v269_v5  ;;  %265 = vmatpush3.bf16.msra.mxu1 %v269_v5 }
  0x12   :  { %251 = vmatmul.mubr.msk.bf16.vlgmr.msra.gmra.mxu0 %vm82_vm0, %v272_v6  ;;  %255 = vmatmul.mubr.msk.bf16.vlgmr.msra.gmra.mxu1 %vm82_vm0, %v273_v7 }
  0xd2   :  { %v252_v9 = vpop.f32.mrf.mxu0  ;;  %v256_v10 = vpop.f32.mrf.mxu1 }
  0xd3   :  { %v138_v11 = vadd.f32 %v252_v9, %v205_v8  ;;  %v154_v12 = vadd.f32 %v256_v10, %v205_v8 }
  0xd4   :  { %v129_v13 = vpop.f32.mrf.mxu0  ;;  %v145_v14 = vpop.f32.mrf.mxu1 }
  0xd5   :  { %v228_v15 = vpack.c.bf16 %v138_v11, %v138_v11  ;;  %v232_v16 = vpack.c.bf16 %v154_v12, %v154_v12  ;;  %v130_v17 = vadd.f32 %v205_v8, %v129_v13  ;;  %v146_v18 = vadd.f32 %v205_v8, %v145_v14 }
  0xd6   :  { %v253_v19 = vpop.f32.mrf.mxu0  ;;  %v257_v20 = vpop.f32.mrf.mxu1 }
  0xd7   :  { %195 = vst.msk [vmem:[%s360_s3 + $0x8] sm:$0xf] %vm192_vm1, %v228_v15  ;;  %199 = vst.msk [vmem:[%s360_s3 + $0x18] sm:$0xf] %vm192_vm1, %v232_v16  ;;  %v226_v21 = vpack.c.bf16 %v130_v17, %v130_v17  ;;  %v230_v22 = vpack.c.bf16 %v146_v18, %v146_v18  ;;  %v141_v23 = vadd.f32 %v253_v19, %v205_v8 }
  0xd8   :  { %v157_v24 = vadd.f32 %v257_v20, %v205_v8  ;;  %v132_v25 = vpop.f32.mrf.mxu0  ;;  %v148_v26 = vpop.f32.mrf.mxu1 }
  0xd9   :  { %193 = vst.msk [vmem:[%s360_s3] sm:$0xf] %vm192_vm1, %v226_v21  ;;  %197 = vst.msk [vmem:[%s360_s3 + $0x10] sm:$0xf] %vm192_vm1, %v230_v22  ;;  %v229_v27 = vpack.c.bf16 %v141_v23, %v141_v23  ;;  %v133_v29 = vadd.f32 %v205_v8, %v132_v25  ;;  %v149_v30 = vadd.f32 %v205_v8, %v148_v26 }
  0xda   :  { %v233_v28 = vpack.c.bf16 %v157_v24, %v157_v24 }
  0xdb   :  { %196 = vst.msk [vmem:[%s360_s3 + $0xc] sm:$0xf] %vm192_vm1, %v229_v27  ;;  %v227_v31 = vpack.c.bf16 %v133_v29, %v133_v29  ;;  %v231_v32 = vpack.c.bf16 %v149_v30, %v149_v30 }
  0xdc   :  { %200 = vst.msk [vmem:[%s360_s3 + $0x1c] sm:$0xf] %vm192_vm1, %v233_v28 }
  0xdd   :  { %194 = vst.msk [vmem:[%s360_s3 + $0x4] sm:$0xf] %vm192_vm1, %v227_v31  ;;  %198 = vst.msk [vmem:[%s360_s3 + $0x14] sm:$0xf] %vm192_vm1, %v231_v32 }

// kernel: reformer_forward.25
= control target key start
LH: loop header
LB: loop body
LE: loop exit
PB: predicated region body
PF: predicated region fallthrough
CT: control target
= control target key end

     0   :  { %vm59_vm0 = vcmask 130048   ;;  %s271_s0 = inlined_call_operand.vmem [shape: bf16[64,16], index: 0, kind: input, shape index: {}]   ;;  %s272_s1 = inlined_call_operand.vmem [shape: bf16[16,100], index: 1, kind: input, shape index: {}]   ;;  %s273_s2 = inlined_call_operand.vmem [shape: f32[1,100], index: 2, kind: input, shape index: {}]   ;;  %s274_s3 = inlined_call_operand.hbm [shape: f32[64,100], index: 3, kind: output, shape index: {}]  }
   0x1   :  { %v192_v0 = vld [vmem:[%s272_s1] sm:$0xff]   ;;  %v194_v2 = vld [vmem:[%s271_s0 + $0x10] sm:$0xff]   ;;  %v195_v3 = vld [vmem:[%s271_s0 + $0x8] sm:$0xff]  }
   0x2   :  { %v193_v1 = vld [vmem:[%s271_s0] sm:$0xff]   ;;  %177 = vmatprep.subr.bf16.mxu0 %v192_v0  ;;  %187 = vmatprep.subr.bf16.mxu1 %v192_v0  ;;  %v196_v4 = vld [vmem:[%s271_s0 + $0x18] sm:$0xff]  }
   0x3   :  { %178 = vmatpush3.bf16.msra.mxu0 %v192_v0  ;;  %188 = vmatpush3.bf16.msra.mxu1 %v192_v0 }
   0x4   :  { %179 = vmatprep.mubr.msk.bf16.mxu0 %vm59_vm0, %v193_v1  ;;  %183 = vmatprep.mubr.msk.bf16.mxu1 %vm59_vm0, %v194_v2 }
   0x5   :  { %8 = vsyncpa [#allocation3], 0  ;;  %v162_v5 = vld [vmem:[%s273_s2] ss:$0 sm:$0xff]  ;;  %vm137_vm1 = vcmask 818176   ;;  %s219_s0 = smov [#allocation2]  }
   0x6   :  { %180 = vmatmul.mubr.msk.bf16.vlgmr.msra.gmra.mxu0 %vm59_vm0, %v195_v3  ;;  %184 = vmatmul.mubr.msk.bf16.vlgmr.msra.gmra.mxu1 %vm59_vm0, %v196_v4  ;;  %s151_s23 = sshll.u32 %s219_s0, 4  ;;  %s152_s23 = int_to_ptr.vmem [resolvable:$true] %s151_s23 }
   0x7   :  { %s197_s2 = scalar_lea.vmem %s152_s23, 1024  ;;  %p202_p1 = scmp.lt.s32.totalorder %s152_s23, %s152_s23 }
   0x8   :  { %p198_p0 = scmp.ne.s32.totalorder %s152_s23, %s197_s2  ;;  %p203_p2 = scmp.lt.s32.totalorder %s197_s2, %s197_s2 }
   0xa   :  { %p204_p3 = por %p203_p2, %p202_p1 }
   0xc   :  { %p205_p4 = pnand %p204_p3, %p198_p0 }
  0xc6   :  { %v181_v6 = vpop.f32.mrf.mxu0  ;;  %v185_v7 = vpop.f32.mrf.mxu1 }
  0xc7   :  { %v115_v8 = vadd.f32 %v181_v6, %v162_v5  ;;  %v131_v9 = vadd.f32 %v185_v7, %v162_v5 }
  0xc8   :  { %v106_v10 = vpop.f32.mrf.mxu0  ;;  %v122_v11 = vpop.f32.mrf.mxu1 }
  0xc9   :  { %140 = vst.msk [vmem:[#allocation2 + $0x10] sm:$0xff] %vm137_vm1, %v115_v8  ;;  %144 = vst.msk [vmem:[#allocation2 + $0x30] sm:$0xff] %vm137_vm1, %v131_v9  ;;  %v107_v12 = vadd.f32 %v162_v5, %v106_v10  ;;  %v123_v13 = vadd.f32 %v162_v5, %v122_v11 }
  0xca   :  { %v182_v14 = vpop.f32.mrf.mxu0  ;;  %v186_v15 = vpop.f32.mrf.mxu1 }
  0xcb   :  { %138 = vst.msk [vmem:[#allocation2] sm:$0xff] %vm137_vm1, %v107_v12  ;;  %142 = vst.msk [vmem:[#allocation2 + $0x20] sm:$0xff] %vm137_vm1, %v123_v13  ;;  %v118_v16 = vadd.f32 %v182_v14, %v162_v5  ;;  %v134_v17 = vadd.f32 %v186_v15, %v162_v5 }
  0xcc   :  { %v109_v18 = vpop.f32.mrf.mxu0  ;;  %v125_v19 = vpop.f32.mrf.mxu1 }
  0xcd   :  { %141 = vst.msk [vmem:[#allocation2 + $0x18] sm:$0xff] %vm137_vm1, %v118_v16  ;;  %145 = vst.msk [vmem:[#allocation2 + $0x38] sm:$0xff] %vm137_vm1, %v134_v17  ;;  %v110_v20 = vadd.f32 %v162_v5, %v109_v18  ;;  %v126_v21 = vadd.f32 %v162_v5, %v125_v19 }
  0xcf   :  { %139 = vst.msk [vmem:[#allocation2 + $0x8] sm:$0xff] %vm137_vm1, %v110_v20  ;;  %143 = vst.msk [vmem:[#allocation2 + $0x28] sm:$0xff] %vm137_vm1, %v126_v21 }
  0xd0   :  { %208 = shalt.err (!%p205_p4)
}
  0xd1   :  { %s220_s24 = smov 128   ;;  %s221_s25 = smov 8  }
  0xd2   :  { %157 = dma.vmem_to_hbm [thread:$0]  %s152_s23, 1024, %s274_s3, [#allocation3], %s220_s24, %s220_s24, %s221_s25  }
  0xd3   :  { %217 = dma.done.wait [#allocation3], 1024  }
  0xd4   :  { %218 = vsyncadd [#allocation3], 4294966272 }
  0xd5   :  { %161 = vsyncpa [#allocation3], 1 }

</bundles_post_ra>
